<compile_context>
chip_gen: v6e
topology: v6e:2x2x1
jax: 0.10.0
libtpu: 0.0.40
codegen_flags: <defaults>
</compile_context>

<pallas_src>
import functools

import jax
import jax.numpy as jnp
import numpy as np
from jax.experimental import pallas as pl
from jax.experimental.pallas import tpu as pltpu


# ----------------------------- fused Pallas kernel --------------------------------


def _msa_fused_kernel(
    x_ref,        # (1, N, dim)
    wqkv_ref,     # (dim, 3*dim_out)
    bqkv_ref,     # (1, 3*dim_out)
    shift_ref,    # (9, N, N)      0/1 shift matrices for the 3x3 SAME depthwise conv
    taps_ref,     # (9, 1, 3*dim_out) per-channel conv taps (q|k|v, tiled over heads)
    grp_ref,      # (3*dim_out, 3*dim_out) block-diag ones (head_dim groups) for LN
    gamma_ref,    # (1, 3*dim_out) LN gamma (scale folded into the k section)
    beta_ref,     # (1, 3*dim_out) LN beta  (scale folded into the k section)
    wproj_ref,    # (dim_out, dim_out)
    bproj_ref,    # (1, dim_out)
    o_ref,        # (1, N, dim_out)
    *,
    num_heads,
    head_dim,
    eps,
):
    N = x_ref.shape[1]
    C3 = wqkv_ref.shape[1]
    dim_out = num_heads * head_dim

    # ---- qkv projection -----------------------------------------------------------
    x = x_ref[0]                                                        # (N, dim)
    qkv = (
        jnp.dot(x, wqkv_ref[...], preferred_element_type=jnp.float32)
        + bqkv_ref[...]
    )                                                                   # (N, C3)

    # ---- depthwise 3x3 conv (stride 1, pad 1) as 9 shift-matrix matmuls ------------
    acc = jnp.zeros((N, C3), jnp.float32)
    for t in range(9):
        acc = acc + jnp.dot(
            shift_ref[t], qkv * taps_ref[t],
            preferred_element_type=jnp.float32,
        )

    # ---- grouped LayerNorm over each head_dim channel group (block-diag matmul) ----
    inv_hd = 1.0 / float(head_dim)
    mean = jnp.dot(acc, grp_ref[...], preferred_element_type=jnp.float32) * inv_hd
    xc = acc - mean
    var = jnp.dot(xc * xc, grp_ref[...], preferred_element_type=jnp.float32) * inv_hd
    y = xc * jax.lax.rsqrt(var + eps) * gamma_ref[...] + beta_ref[...]  # (N, C3)

    # ---- per-head attention (all heads inside this one grid step) ------------------
    out = jnp.zeros((N, dim_out), jnp.float32) + bproj_ref[...]
    for h in range(num_heads):
        c0 = h * head_dim
        qh = y[:, c0:c0 + head_dim]                            # (N, hd) (unscaled)
        kh = y[:, dim_out + c0:dim_out + c0 + head_dim]        # (N, hd) (scale folded)
        vh = y[:, 2 * dim_out + c0:2 * dim_out + c0 + head_dim]

        s = jax.lax.dot_general(
            qh, kh, (((1,), (1,)), ((), ())),
            preferred_element_type=jnp.float32,
        )                                                      # (N, N) = q @ k^T
        s = s - jnp.max(s, axis=-1, keepdims=True)
        p = jnp.exp(s)
        p = p * pl.reciprocal(jnp.sum(p, axis=-1, keepdims=True), approx=True)
        oh = jnp.dot(p, vh, preferred_element_type=jnp.float32) + qh  # + residual q
        # fold the head-concat into the output projection (rows h*hd:(h+1)*hd)
        out = out + jnp.dot(
            oh, wproj_ref[c0:c0 + head_dim, :],
            preferred_element_type=jnp.float32,
        )

    o_ref[0] = out.astype(o_ref.dtype)


# ----------------------------- host-side constant builders -------------------------


def _make_shift_mats(H, W):
    """(9, N, N) 0/1 matrices: (S_t @ x)[n] = x[n + offset_t] with SAME zero padding."""
    N = H * W
    mats = np.zeros((9, N, N), np.float32)
    t = 0
    for dh in (-1, 0, 1):
        for dw in (-1, 0, 1):
            for h in range(H):
                for w in range(W):
                    hh, ww = h + dh, w + dw
                    if 0 <= hh < H and 0 <= ww < W:
                        mats[t, h * W + w, hh * W + ww] = 1.0
            t += 1
    return jnp.asarray(mats)


def _make_group_matrix(c3, head_dim):
    """Block-diagonal ones matrix: (x @ G)[:, j] = sum of x over j's head_dim group."""
    n_groups = c3 // head_dim
    return jnp.asarray(np.kron(np.eye(n_groups, dtype=np.float32),
                               np.ones((head_dim, head_dim), np.float32)))


# ----------------------------- module forward --------------------------------------


def multi_scale_attention(x, params, num_heads):
    """Pallas implementation of MultiScaleAttention.forward. x: (B, H, W, dim)."""
    B, H, W, dim = x.shape
    dim_out = params["w_proj"].shape[0]
    hd = dim_out // num_heads
    scale = hd ** (-0.5)
    N = H * W
    C3 = 3 * dim_out

    # per-channel conv taps for the concatenated [q|k|v] slab, layout (comp, head, hd)
    taps = jnp.concatenate(
        [jnp.tile(params["w_pool_q"], (1, num_heads)),
         jnp.tile(params["w_pool_k"], (1, num_heads)),
         jnp.tile(params["w_pool_v"], (1, num_heads))], axis=1,
    ).reshape(9, 1, C3)

    # LayerNorm affine; fold the attention scale into k (q must stay unscaled for the
    # residual_pooling add, so softmax(q*scale @ k^T) == softmax(q @ (scale*k)^T)).
    gamma = jnp.concatenate(
        [jnp.tile(params["ln_q_g"], num_heads),
         scale * jnp.tile(params["ln_k_g"], num_heads),
         jnp.tile(params["ln_v_g"], num_heads)]).reshape(1, C3)
    beta = jnp.concatenate(
        [jnp.tile(params["ln_q_b"], num_heads),
         scale * jnp.tile(params["ln_k_b"], num_heads),
         jnp.tile(params["ln_v_b"], num_heads)]).reshape(1, C3)

    shift_mats = _make_shift_mats(H, W)           # (9, N, N)
    grp = _make_group_matrix(C3, hd)              # (C3, C3)

    kernel = functools.partial(
        _msa_fused_kernel, num_heads=num_heads, head_dim=hd, eps=1e-5)

    out = pl.pallas_call(
        kernel,
        out_shape=jax.ShapeDtypeStruct((B, N, dim_out), jnp.float32),
        grid=(B,),
        in_specs=[
            pl.BlockSpec((1, N, dim), lambda b: (b, 0, 0)),
            pl.BlockSpec((dim, C3), lambda b: (0, 0)),
            pl.BlockSpec((1, C3), lambda b: (0, 0)),
            pl.BlockSpec((9, N, N), lambda b: (0, 0, 0)),
            pl.BlockSpec((9, 1, C3), lambda b: (0, 0, 0)),
            pl.BlockSpec((C3, C3), lambda b: (0, 0)),
            pl.BlockSpec((1, C3), lambda b: (0, 0)),
            pl.BlockSpec((1, C3), lambda b: (0, 0)),
            pl.BlockSpec((dim_out, dim_out), lambda b: (0, 0)),
            pl.BlockSpec((1, dim_out), lambda b: (0, 0)),
        ],
        out_specs=pl.BlockSpec((1, N, dim_out), lambda b: (b, 0, 0)),
        compiler_params=pltpu.CompilerParams(dimension_semantics=("parallel",)),
    )(
        x.reshape(B, N, dim),                      # free reshape (row-major)
        params["w_qkv"],
        params["b_qkv"].reshape(1, C3),
        shift_mats,
        taps,
        grp,
        gamma,
        beta,
        params["w_proj"],
        params["b_proj"].reshape(1, dim_out),
    )
    return out.reshape(B, H, W, dim_out)


# ----------------------------- pure-JAX reference -----------------------------------


def reference(x, params, num_heads):
    B, H, W, dim = x.shape
    dim_out = params["w_proj"].shape[0]
    hd = dim_out // num_heads
    scale = hd ** (-0.5)

    qkv = x.reshape(-1, dim) @ params["w_qkv"] + params["b_qkv"]
    qkv = qkv.reshape(B, H, W, 3, num_heads, hd)
    qkv = jnp.transpose(qkv, (3, 0, 4, 1, 2, 5)).reshape(3, B * num_heads, H, W, hd)

    def pn(t, w9c, g, b):
        w = w9c.reshape(3, 3, 1, hd)
        y = jax.lax.conv_general_dilated(
            t, w, (1, 1), "SAME",
            dimension_numbers=("NHWC", "HWIO", "NHWC"),
            feature_group_count=hd,
        )
        mu = y.mean(-1, keepdims=True)
        var = ((y - mu) ** 2).mean(-1, keepdims=True)
        return (y - mu) / jnp.sqrt(var + 1e-5) * g + b

    q = pn(qkv[0], params["w_pool_q"], params["ln_q_g"], params["ln_q_b"])
    k = pn(qkv[1], params["w_pool_k"], params["ln_k_g"], params["ln_k_b"])
    v = pn(qkv[2], params["w_pool_v"], params["ln_v_g"], params["ln_v_b"])

    N = H * W
    qf = q.reshape(-1, N, hd)
    kf = k.reshape(-1, N, hd)
    vf = v.reshape(-1, N, hd)
    attn = jax.nn.softmax((qf * scale) @ jnp.swapaxes(kf, -1, -2), axis=-1)
    o = attn @ vf + qf
    o = o.reshape(B, num_heads, H, W, hd)
    o = jnp.transpose(o, (0, 2, 3, 1, 4)).reshape(B, H, W, num_heads * hd)
    out = o.reshape(-1, num_heads * hd) @ params["w_proj"] + params["b_proj"]
    return out.reshape(B, H, W, dim_out)


# ----------------------------------- main -------------------------------------------


if __name__ == "__main__":
    B, H, W = 2, 8, 8
    dim, dim_out, num_heads = 32, 32, 4
    hd = dim_out // num_heads

    key = jax.random.PRNGKey(0)
    ks = jax.random.split(key, 20)

    x = jax.random.normal(ks[0], (B, H, W, dim), jnp.float32)

    # Deterministic synthetic parameters (shapes follow the PyTorch __init__).
    params = {
        "w_qkv": 0.1 * jax.random.normal(ks[1], (dim, 3 * dim_out), jnp.float32),
        "b_qkv": 0.1 * jax.random.normal(ks[2], (3 * dim_out,), jnp.float32),
        # depthwise conv weights, torch shape (hd, 1, 3, 3) stored as (9, hd) taps
        "w_pool_q": 0.2 * jax.random.normal(ks[3], (9, hd), jnp.float32),
        "w_pool_k": 0.2 * jax.random.normal(ks[4], (9, hd), jnp.float32),
        "w_pool_v": 0.2 * jax.random.normal(ks[5], (9, hd), jnp.float32),
        "ln_q_g": 1.0 + 0.05 * jax.random.normal(ks[6], (hd,), jnp.float32),
        "ln_q_b": 0.05 * jax.random.normal(ks[7], (hd,), jnp.float32),
        "ln_k_g": 1.0 + 0.05 * jax.random.normal(ks[8], (hd,), jnp.float32),
        "ln_k_b": 0.05 * jax.random.normal(ks[9], (hd,), jnp.float32),
        "ln_v_g": 1.0 + 0.05 * jax.random.normal(ks[10], (hd,), jnp.float32),
        "ln_v_b": 0.05 * jax.random.normal(ks[11], (hd,), jnp.float32),
        "w_proj": 0.1 * jax.random.normal(ks[12], (dim_out, dim_out), jnp.float32),
        "b_proj": 0.1 * jax.random.normal(ks[13], (dim_out,), jnp.float32),
    }

    out = multi_scale_attention(x, params, num_heads)
    out = jax.block_until_ready(out)

    ref = jax.block_until_ready(reference(x, params, num_heads))
    assert out.shape == (B, H, W, dim_out), out.shape
    np.testing.assert_allclose(np.asarray(out), np.asarray(ref), rtol=3e-2, atol=3e-2)

    print("KERNEL_OK")
</pallas_src>

<mosaic_0001>
module attributes {stable_mosaic.version = 11 : i64} {
  func.func @_msa_fused_kernel(%arg0: i32, %arg1: memref<1x64x32xf32, #tpu.memory_space<vmem>>, %arg2: memref<32x96xf32, #tpu.memory_space<vmem>>, %arg3: memref<1x96xf32, #tpu.memory_space<vmem>>, %arg4: memref<9x64x64xf32, #tpu.memory_space<vmem>>, %arg5: memref<9x1x96xf32, #tpu.memory_space<vmem>>, %arg6: memref<96x96xf32, #tpu.memory_space<vmem>>, %arg7: memref<1x96xf32, #tpu.memory_space<vmem>>, %arg8: memref<1x96xf32, #tpu.memory_space<vmem>>, %arg9: memref<32x32xf32, #tpu.memory_space<vmem>>, %arg10: memref<1x32xf32, #tpu.memory_space<vmem>>, %arg11: memref<1x64x32xf32, #tpu.memory_space<vmem>>) attributes {dimension_semantics = [#tpu.dimension_semantics<parallel>], iteration_bounds = array<i64: 2>, scalar_prefetch = 0 : i64, scratch_operands = 0 : i64, tpu.core_type = #tpu.core_type<tc>, window_params = [{transform_indices = @transform_0, window_bounds = array<i64: 1, 64, 32>}, {pipeline_mode = #tpu.pipeline_mode<synchronous>, transform_indices = @transform_1, window_bounds = array<i64: 32, 96>}, {pipeline_mode = #tpu.pipeline_mode<synchronous>, transform_indices = @transform_2, window_bounds = array<i64: 1, 96>}, {pipeline_mode = #tpu.pipeline_mode<synchronous>, transform_indices = @transform_3, window_bounds = array<i64: 9, 64, 64>}, {pipeline_mode = #tpu.pipeline_mode<synchronous>, transform_indices = @transform_4, window_bounds = array<i64: 9, 1, 96>}, {pipeline_mode = #tpu.pipeline_mode<synchronous>, transform_indices = @transform_5, window_bounds = array<i64: 96, 96>}, {pipeline_mode = #tpu.pipeline_mode<synchronous>, transform_indices = @transform_6, window_bounds = array<i64: 1, 96>}, {pipeline_mode = #tpu.pipeline_mode<synchronous>, transform_indices = @transform_7, window_bounds = array<i64: 1, 96>}, {pipeline_mode = #tpu.pipeline_mode<synchronous>, transform_indices = @transform_8, window_bounds = array<i64: 32, 32>}, {pipeline_mode = #tpu.pipeline_mode<synchronous>, transform_indices = @transform_9, window_bounds = array<i64: 1, 32>}, {transform_indices = @transform_10, window_bounds = array<i64: 1, 64, 32>}]} {
    %c0 = arith.constant 0 : index
    %c0_0 = arith.constant 0 : index
    %c0_1 = arith.constant 0 : index
    %0 = vector.load %arg1[%c0, %c0_0, %c0_1] : memref<1x64x32xf32, #tpu.memory_space<vmem>>, vector<1x64x32xf32>
    %1 = vector.shape_cast %0 : vector<1x64x32xf32> to vector<64x32xf32>
    %c0_2 = arith.constant 0 : index
    %c0_3 = arith.constant 0 : index
    %2 = vector.load %arg2[%c0_2, %c0_3] : memref<32x96xf32, #tpu.memory_space<vmem>>, vector<32x96xf32>
    %cst = arith.constant dense<0.000000e+00> : vector<64x96xf32>
    %3 = tpu.matmul %1, %2, %cst {dimension_numbers = #tpu.dot_dimension_numbers<[1], [0], [0], [1], [0, 0, 1, 1], [], []>} : vector<64x32xf32>, vector<32x96xf32>, vector<64x96xf32> -> vector<64x96xf32>
    %c0_4 = arith.constant 0 : index
    %c0_5 = arith.constant 0 : index
    %4 = vector.load %arg3[%c0_4, %c0_5] : memref<1x96xf32, #tpu.memory_space<vmem>>, vector<1x96xf32>
    %5 = vector.broadcast %4 : vector<1x96xf32> to vector<64x96xf32>
    %6 = arith.addf %3, %5 : vector<64x96xf32>
    %cst_6 = arith.constant 0.000000e+00 : f32
    %7 = vector.broadcast %cst_6 : f32 to vector<64x96xf32>
    %c0_7 = arith.constant 0 : index
    %c0_8 = arith.constant 0 : index
    %c0_9 = arith.constant 0 : index
    %8 = vector.load %arg4[%c0_7, %c0_8, %c0_9] : memref<9x64x64xf32, #tpu.memory_space<vmem>>, vector<1x64x64xf32>
    %9 = vector.shape_cast %8 : vector<1x64x64xf32> to vector<64x64xf32>
    %c0_10 = arith.constant 0 : index
    %c0_11 = arith.constant 0 : index
    %c0_12 = arith.constant 0 : index
    %10 = vector.load %arg5[%c0_10, %c0_11, %c0_12] : memref<9x1x96xf32, #tpu.memory_space<vmem>>, vector<1x1x96xf32>
    %11 = vector.shape_cast %10 : vector<1x1x96xf32> to vector<1x96xf32>
    %12 = vector.broadcast %11 : vector<1x96xf32> to vector<64x96xf32>
    %13 = arith.mulf %6, %12 : vector<64x96xf32>
    %cst_13 = arith.constant dense<0.000000e+00> : vector<64x96xf32>
    %14 = tpu.matmul %9, %13, %cst_13 {dimension_numbers = #tpu.dot_dimension_numbers<[1], [0], [0], [1], [0, 0, 1, 1], [], []>} : vector<64x64xf32>, vector<64x96xf32>, vector<64x96xf32> -> vector<64x96xf32>
    %15 = arith.addf %7, %14 : vector<64x96xf32>
    %c1 = arith.constant 1 : index
    %c0_14 = arith.constant 0 : index
    %c0_15 = arith.constant 0 : index
    %16 = vector.load %arg4[%c1, %c0_14, %c0_15] : memref<9x64x64xf32, #tpu.memory_space<vmem>>, vector<1x64x64xf32>
    %17 = vector.shape_cast %16 : vector<1x64x64xf32> to vector<64x64xf32>
    %c1_16 = arith.constant 1 : index
    %c0_17 = arith.constant 0 : index
    %c0_18 = arith.constant 0 : index
    %18 = vector.load %arg5[%c1_16, %c0_17, %c0_18] : memref<9x1x96xf32, #tpu.memory_space<vmem>>, vector<1x1x96xf32>
    %19 = vector.shape_cast %18 : vector<1x1x96xf32> to vector<1x96xf32>
    %20 = vector.broadcast %19 : vector<1x96xf32> to vector<64x96xf32>
    %21 = arith.mulf %6, %20 : vector<64x96xf32>
    %cst_19 = arith.constant dense<0.000000e+00> : vector<64x96xf32>
    %22 = tpu.matmul %17, %21, %cst_19 {dimension_numbers = #tpu.dot_dimension_numbers<[1], [0], [0], [1], [0, 0, 1, 1], [], []>} : vector<64x64xf32>, vector<64x96xf32>, vector<64x96xf32> -> vector<64x96xf32>
    %23 = arith.addf %15, %22 : vector<64x96xf32>
    %c2 = arith.constant 2 : index
    %c0_20 = arith.constant 0 : index
    %c0_21 = arith.constant 0 : index
    %24 = vector.load %arg4[%c2, %c0_20, %c0_21] : memref<9x64x64xf32, #tpu.memory_space<vmem>>, vector<1x64x64xf32>
    %25 = vector.shape_cast %24 : vector<1x64x64xf32> to vector<64x64xf32>
    %c2_22 = arith.constant 2 : index
    %c0_23 = arith.constant 0 : index
    %c0_24 = arith.constant 0 : index
    %26 = vector.load %arg5[%c2_22, %c0_23, %c0_24] : memref<9x1x96xf32, #tpu.memory_space<vmem>>, vector<1x1x96xf32>
    %27 = vector.shape_cast %26 : vector<1x1x96xf32> to vector<1x96xf32>
    %28 = vector.broadcast %27 : vector<1x96xf32> to vector<64x96xf32>
    %29 = arith.mulf %6, %28 : vector<64x96xf32>
    %cst_25 = arith.constant dense<0.000000e+00> : vector<64x96xf32>
    %30 = tpu.matmul %25, %29, %cst_25 {dimension_numbers = #tpu.dot_dimension_numbers<[1], [0], [0], [1], [0, 0, 1, 1], [], []>} : vector<64x64xf32>, vector<64x96xf32>, vector<64x96xf32> -> vector<64x96xf32>
    %31 = arith.addf %23, %30 : vector<64x96xf32>
    %c3 = arith.constant 3 : index
    %c0_26 = arith.constant 0 : index
    %c0_27 = arith.constant 0 : index
    %32 = vector.load %arg4[%c3, %c0_26, %c0_27] : memref<9x64x64xf32, #tpu.memory_space<vmem>>, vector<1x64x64xf32>
    %33 = vector.shape_cast %32 : vector<1x64x64xf32> to vector<64x64xf32>
    %c3_28 = arith.constant 3 : index
    %c0_29 = arith.constant 0 : index
    %c0_30 = arith.constant 0 : index
    %34 = vector.load %arg5[%c3_28, %c0_29, %c0_30] : memref<9x1x96xf32, #tpu.memory_space<vmem>>, vector<1x1x96xf32>
    %35 = vector.shape_cast %34 : vector<1x1x96xf32> to vector<1x96xf32>
    %36 = vector.broadcast %35 : vector<1x96xf32> to vector<64x96xf32>
    %37 = arith.mulf %6, %36 : vector<64x96xf32>
    %cst_31 = arith.constant dense<0.000000e+00> : vector<64x96xf32>
    %38 = tpu.matmul %33, %37, %cst_31 {dimension_numbers = #tpu.dot_dimension_numbers<[1], [0], [0], [1], [0, 0, 1, 1], [], []>} : vector<64x64xf32>, vector<64x96xf32>, vector<64x96xf32> -> vector<64x96xf32>
    %39 = arith.addf %31, %38 : vector<64x96xf32>
    %c4 = arith.constant 4 : index
    %c0_32 = arith.constant 0 : index
    %c0_33 = arith.constant 0 : index
    %40 = vector.load %arg4[%c4, %c0_32, %c0_33] : memref<9x64x64xf32, #tpu.memory_space<vmem>>, vector<1x64x64xf32>
    %41 = vector.shape_cast %40 : vector<1x64x64xf32> to vector<64x64xf32>
    %c4_34 = arith.constant 4 : index
    %c0_35 = arith.constant 0 : index
    %c0_36 = arith.constant 0 : index
    %42 = vector.load %arg5[%c4_34, %c0_35, %c0_36] : memref<9x1x96xf32, #tpu.memory_space<vmem>>, vector<1x1x96xf32>
    %43 = vector.shape_cast %42 : vector<1x1x96xf32> to vector<1x96xf32>
    %44 = vector.broadcast %43 : vector<1x96xf32> to vector<64x96xf32>
    %45 = arith.mulf %6, %44 : vector<64x96xf32>
    %cst_37 = arith.constant dense<0.000000e+00> : vector<64x96xf32>
    %46 = tpu.matmul %41, %45, %cst_37 {dimension_numbers = #tpu.dot_dimension_numbers<[1], [0], [0], [1], [0, 0, 1, 1], [], []>} : vector<64x64xf32>, vector<64x96xf32>, vector<64x96xf32> -> vector<64x96xf32>
    %47 = arith.addf %39, %46 : vector<64x96xf32>
    %c5 = arith.constant 5 : index
    %c0_38 = arith.constant 0 : index
    %c0_39 = arith.constant 0 : index
    %48 = vector.load %arg4[%c5, %c0_38, %c0_39] : memref<9x64x64xf32, #tpu.memory_space<vmem>>, vector<1x64x64xf32>
    %49 = vector.shape_cast %48 : vector<1x64x64xf32> to vector<64x64xf32>
    %c5_40 = arith.constant 5 : index
    %c0_41 = arith.constant 0 : index
    %c0_42 = arith.constant 0 : index
    %50 = vector.load %arg5[%c5_40, %c0_41, %c0_42] : memref<9x1x96xf32, #tpu.memory_space<vmem>>, vector<1x1x96xf32>
    %51 = vector.shape_cast %50 : vector<1x1x96xf32> to vector<1x96xf32>
    %52 = vector.broadcast %51 : vector<1x96xf32> to vector<64x96xf32>
    %53 = arith.mulf %6, %52 : vector<64x96xf32>
    %cst_43 = arith.constant dense<0.000000e+00> : vector<64x96xf32>
    %54 = tpu.matmul %49, %53, %cst_43 {dimension_numbers = #tpu.dot_dimension_numbers<[1], [0], [0], [1], [0, 0, 1, 1], [], []>} : vector<64x64xf32>, vector<64x96xf32>, vector<64x96xf32> -> vector<64x96xf32>
    %55 = arith.addf %47, %54 : vector<64x96xf32>
    %c6 = arith.constant 6 : index
    %c0_44 = arith.constant 0 : index
    %c0_45 = arith.constant 0 : index
    %56 = vector.load %arg4[%c6, %c0_44, %c0_45] : memref<9x64x64xf32, #tpu.memory_space<vmem>>, vector<1x64x64xf32>
    %57 = vector.shape_cast %56 : vector<1x64x64xf32> to vector<64x64xf32>
    %c6_46 = arith.constant 6 : index
    %c0_47 = arith.constant 0 : index
    %c0_48 = arith.constant 0 : index
    %58 = vector.load %arg5[%c6_46, %c0_47, %c0_48] : memref<9x1x96xf32, #tpu.memory_space<vmem>>, vector<1x1x96xf32>
    %59 = vector.shape_cast %58 : vector<1x1x96xf32> to vector<1x96xf32>
    %60 = vector.broadcast %59 : vector<1x96xf32> to vector<64x96xf32>
    %61 = arith.mulf %6, %60 : vector<64x96xf32>
    %cst_49 = arith.constant dense<0.000000e+00> : vector<64x96xf32>
    %62 = tpu.matmul %57, %61, %cst_49 {dimension_numbers = #tpu.dot_dimension_numbers<[1], [0], [0], [1], [0, 0, 1, 1], [], []>} : vector<64x64xf32>, vector<64x96xf32>, vector<64x96xf32> -> vector<64x96xf32>
    %63 = arith.addf %55, %62 : vector<64x96xf32>
    %c7 = arith.constant 7 : index
    %c0_50 = arith.constant 0 : index
    %c0_51 = arith.constant 0 : index
    %64 = vector.load %arg4[%c7, %c0_50, %c0_51] : memref<9x64x64xf32, #tpu.memory_space<vmem>>, vector<1x64x64xf32>
    %65 = vector.shape_cast %64 : vector<1x64x64xf32> to vector<64x64xf32>
    %c7_52 = arith.constant 7 : index
    %c0_53 = arith.constant 0 : index
    %c0_54 = arith.constant 0 : index
    %66 = vector.load %arg5[%c7_52, %c0_53, %c0_54] : memref<9x1x96xf32, #tpu.memory_space<vmem>>, vector<1x1x96xf32>
    %67 = vector.shape_cast %66 : vector<1x1x96xf32> to vector<1x96xf32>
    %68 = vector.broadcast %67 : vector<1x96xf32> to vector<64x96xf32>
    %69 = arith.mulf %6, %68 : vector<64x96xf32>
    %cst_55 = arith.constant dense<0.000000e+00> : vector<64x96xf32>
    %70 = tpu.matmul %65, %69, %cst_55 {dimension_numbers = #tpu.dot_dimension_numbers<[1], [0], [0], [1], [0, 0, 1, 1], [], []>} : vector<64x64xf32>, vector<64x96xf32>, vector<64x96xf32> -> vector<64x96xf32>
    %71 = arith.addf %63, %70 : vector<64x96xf32>
    %c8 = arith.constant 8 : index
    %c0_56 = arith.constant 0 : index
    %c0_57 = arith.constant 0 : index
    %72 = vector.load %arg4[%c8, %c0_56, %c0_57] : memref<9x64x64xf32, #tpu.memory_space<vmem>>, vector<1x64x64xf32>
    %73 = vector.shape_cast %72 : vector<1x64x64xf32> to vector<64x64xf32>
    %c8_58 = arith.constant 8 : index
    %c0_59 = arith.constant 0 : index
    %c0_60 = arith.constant 0 : index
    %74 = vector.load %arg5[%c8_58, %c0_59, %c0_60] : memref<9x1x96xf32, #tpu.memory_space<vmem>>, vector<1x1x96xf32>
    %75 = vector.shape_cast %74 : vector<1x1x96xf32> to vector<1x96xf32>
    %76 = vector.broadcast %75 : vector<1x96xf32> to vector<64x96xf32>
    %77 = arith.mulf %6, %76 : vector<64x96xf32>
    %cst_61 = arith.constant dense<0.000000e+00> : vector<64x96xf32>
    %78 = tpu.matmul %73, %77, %cst_61 {dimension_numbers = #tpu.dot_dimension_numbers<[1], [0], [0], [1], [0, 0, 1, 1], [], []>} : vector<64x64xf32>, vector<64x96xf32>, vector<64x96xf32> -> vector<64x96xf32>
    %79 = arith.addf %71, %78 : vector<64x96xf32>
    %c0_62 = arith.constant 0 : index
    %c0_63 = arith.constant 0 : index
    %80 = vector.load %arg6[%c0_62, %c0_63] : memref<96x96xf32, #tpu.memory_space<vmem>>, vector<96x96xf32>
    %cst_64 = arith.constant dense<0.000000e+00> : vector<64x96xf32>
    %81 = tpu.matmul %79, %80, %cst_64 {dimension_numbers = #tpu.dot_dimension_numbers<[1], [0], [0], [1], [0, 0, 1, 1], [], []>} : vector<64x96xf32>, vector<96x96xf32>, vector<64x96xf32> -> vector<64x96xf32>
    %cst_65 = arith.constant 1.250000e-01 : f32
    %82 = vector.broadcast %cst_65 : f32 to vector<64x96xf32>
    %83 = arith.mulf %81, %82 : vector<64x96xf32>
    %84 = arith.subf %79, %83 : vector<64x96xf32>
    %85 = arith.mulf %84, %84 : vector<64x96xf32>
    %c0_66 = arith.constant 0 : index
    %c0_67 = arith.constant 0 : index
    %86 = vector.load %arg6[%c0_66, %c0_67] : memref<96x96xf32, #tpu.memory_space<vmem>>, vector<96x96xf32>
    %cst_68 = arith.constant dense<0.000000e+00> : vector<64x96xf32>
    %87 = tpu.matmul %85, %86, %cst_68 {dimension_numbers = #tpu.dot_dimension_numbers<[1], [0], [0], [1], [0, 0, 1, 1], [], []>} : vector<64x96xf32>, vector<96x96xf32>, vector<64x96xf32> -> vector<64x96xf32>
    %cst_69 = arith.constant 1.250000e-01 : f32
    %88 = vector.broadcast %cst_69 : f32 to vector<64x96xf32>
    %89 = arith.mulf %87, %88 : vector<64x96xf32>
    %cst_70 = arith.constant 9.99999974E-6 : f32
    %90 = vector.broadcast %cst_70 : f32 to vector<64x96xf32>
    %91 = arith.addf %89, %90 : vector<64x96xf32>
    %92 = math.rsqrt %91 : vector<64x96xf32>
    %93 = arith.mulf %84, %92 : vector<64x96xf32>
    %c0_71 = arith.constant 0 : index
    %c0_72 = arith.constant 0 : index
    %94 = vector.load %arg7[%c0_71, %c0_72] : memref<1x96xf32, #tpu.memory_space<vmem>>, vector<1x96xf32>
    %95 = vector.broadcast %94 : vector<1x96xf32> to vector<64x96xf32>
    %96 = arith.mulf %93, %95 : vector<64x96xf32>
    %c0_73 = arith.constant 0 : index
    %c0_74 = arith.constant 0 : index
    %97 = vector.load %arg8[%c0_73, %c0_74] : memref<1x96xf32, #tpu.memory_space<vmem>>, vector<1x96xf32>
    %98 = vector.broadcast %97 : vector<1x96xf32> to vector<64x96xf32>
    %99 = arith.addf %96, %98 : vector<64x96xf32>
    %cst_75 = arith.constant 0.000000e+00 : f32
    %100 = vector.broadcast %cst_75 : f32 to vector<64x32xf32>
    %c0_76 = arith.constant 0 : index
    %c0_77 = arith.constant 0 : index
    %101 = vector.load %arg10[%c0_76, %c0_77] : memref<1x32xf32, #tpu.memory_space<vmem>>, vector<1x32xf32>
    %102 = vector.broadcast %101 : vector<1x32xf32> to vector<64x32xf32>
    %103 = arith.addf %100, %102 : vector<64x32xf32>
    %104 = vector.extract_strided_slice %99 {offsets = [0, 0], sizes = [64, 8], strides = [1, 1]} : vector<64x96xf32> to vector<64x8xf32>
    %105 = vector.extract_strided_slice %99 {offsets = [0, 32], sizes = [64, 8], strides = [1, 1]} : vector<64x96xf32> to vector<64x8xf32>
    %106 = vector.extract_strided_slice %99 {offsets = [0, 64], sizes = [64, 8], strides = [1, 1]} : vector<64x96xf32> to vector<64x8xf32>
    %cst_78 = arith.constant dense<0.000000e+00> : vector<64x64xf32>
    %107 = tpu.matmul %104, %105, %cst_78 {dimension_numbers = #tpu.dot_dimension_numbers<[1], [1], [0], [0], [0, 0, 1, 0], [], []>} : vector<64x8xf32>, vector<64x8xf32>, vector<64x64xf32> -> vector<64x64xf32>
    %cst_79 = arith.constant dense<0xFF800000> : vector<64xf32>
    %108 = vector.multi_reduction <maximumf>, %107, %cst_79 [1] : vector<64x64xf32> to vector<64xf32>
    %109 = vector.shape_cast %108 : vector<64xf32> to vector<64x1xf32>
    %110 = vector.broadcast %109 : vector<64x1xf32> to vector<64x64xf32>
    %111 = arith.subf %107, %110 : vector<64x64xf32>
    %112 = math.exp %111 : vector<64x64xf32>
    %cst_80 = arith.constant dense<0.000000e+00> : vector<64xf32>
    %113 = vector.multi_reduction <add>, %112, %cst_80 [1] : vector<64x64xf32> to vector<64xf32>
    %114 = vector.shape_cast %113 : vector<64xf32> to vector<64x1xf32>
    %115 = tpu.reciprocal %114 {approx = true} : vector<64x1xf32> -> vector<64x1xf32>
    %116 = vector.broadcast %115 : vector<64x1xf32> to vector<64x64xf32>
    %117 = arith.mulf %112, %116 : vector<64x64xf32>
    %cst_81 = arith.constant dense<0.000000e+00> : vector<64x8xf32>
    %118 = tpu.matmul %117, %106, %cst_81 {dimension_numbers = #tpu.dot_dimension_numbers<[1], [0], [0], [1], [0, 0, 1, 1], [], []>} : vector<64x64xf32>, vector<64x8xf32>, vector<64x8xf32> -> vector<64x8xf32>
    %119 = arith.addf %118, %104 : vector<64x8xf32>
    %c0_82 = arith.constant 0 : index
    %c0_83 = arith.constant 0 : index
    %120 = vector.load %arg9[%c0_82, %c0_83] : memref<32x32xf32, #tpu.memory_space<vmem>>, vector<8x32xf32>
    %cst_84 = arith.constant dense<0.000000e+00> : vector<64x32xf32>
    %121 = tpu.matmul %119, %120, %cst_84 {dimension_numbers = #tpu.dot_dimension_numbers<[1], [0], [0], [1], [0, 0, 1, 1], [], []>} : vector<64x8xf32>, vector<8x32xf32>, vector<64x32xf32> -> vector<64x32xf32>
    %122 = arith.addf %103, %121 : vector<64x32xf32>
    %123 = vector.extract_strided_slice %99 {offsets = [0, 8], sizes = [64, 8], strides = [1, 1]} : vector<64x96xf32> to vector<64x8xf32>
    %124 = vector.extract_strided_slice %99 {offsets = [0, 40], sizes = [64, 8], strides = [1, 1]} : vector<64x96xf32> to vector<64x8xf32>
    %125 = vector.extract_strided_slice %99 {offsets = [0, 72], sizes = [64, 8], strides = [1, 1]} : vector<64x96xf32> to vector<64x8xf32>
    %cst_85 = arith.constant dense<0.000000e+00> : vector<64x64xf32>
    %126 = tpu.matmul %123, %124, %cst_85 {dimension_numbers = #tpu.dot_dimension_numbers<[1], [1], [0], [0], [0, 0, 1, 0], [], []>} : vector<64x8xf32>, vector<64x8xf32>, vector<64x64xf32> -> vector<64x64xf32>
    %cst_86 = arith.constant dense<0xFF800000> : vector<64xf32>
    %127 = vector.multi_reduction <maximumf>, %126, %cst_86 [1] : vector<64x64xf32> to vector<64xf32>
    %128 = vector.shape_cast %127 : vector<64xf32> to vector<64x1xf32>
    %129 = vector.broadcast %128 : vector<64x1xf32> to vector<64x64xf32>
    %130 = arith.subf %126, %129 : vector<64x64xf32>
    %131 = math.exp %130 : vector<64x64xf32>
    %cst_87 = arith.constant dense<0.000000e+00> : vector<64xf32>
    %132 = vector.multi_reduction <add>, %131, %cst_87 [1] : vector<64x64xf32> to vector<64xf32>
    %133 = vector.shape_cast %132 : vector<64xf32> to vector<64x1xf32>
    %134 = tpu.reciprocal %133 {approx = true} : vector<64x1xf32> -> vector<64x1xf32>
    %135 = vector.broadcast %134 : vector<64x1xf32> to vector<64x64xf32>
    %136 = arith.mulf %131, %135 : vector<64x64xf32>
    %cst_88 = arith.constant dense<0.000000e+00> : vector<64x8xf32>
    %137 = tpu.matmul %136, %125, %cst_88 {dimension_numbers = #tpu.dot_dimension_numbers<[1], [0], [0], [1], [0, 0, 1, 1], [], []>} : vector<64x64xf32>, vector<64x8xf32>, vector<64x8xf32> -> vector<64x8xf32>
    %138 = arith.addf %137, %123 : vector<64x8xf32>
    %c8_89 = arith.constant 8 : index
    %c0_90 = arith.constant 0 : index
    %139 = vector.load %arg9[%c8_89, %c0_90] : memref<32x32xf32, #tpu.memory_space<vmem>>, vector<8x32xf32>
    %cst_91 = arith.constant dense<0.000000e+00> : vector<64x32xf32>
    %140 = tpu.matmul %138, %139, %cst_91 {dimension_numbers = #tpu.dot_dimension_numbers<[1], [0], [0], [1], [0, 0, 1, 1], [], []>} : vector<64x8xf32>, vector<8x32xf32>, vector<64x32xf32> -> vector<64x32xf32>
    %141 = arith.addf %122, %140 : vector<64x32xf32>
    %142 = vector.extract_strided_slice %99 {offsets = [0, 16], sizes = [64, 8], strides = [1, 1]} : vector<64x96xf32> to vector<64x8xf32>
    %143 = vector.extract_strided_slice %99 {offsets = [0, 48], sizes = [64, 8], strides = [1, 1]} : vector<64x96xf32> to vector<64x8xf32>
    %144 = vector.extract_strided_slice %99 {offsets = [0, 80], sizes = [64, 8], strides = [1, 1]} : vector<64x96xf32> to vector<64x8xf32>
    %cst_92 = arith.constant dense<0.000000e+00> : vector<64x64xf32>
    %145 = tpu.matmul %142, %143, %cst_92 {dimension_numbers = #tpu.dot_dimension_numbers<[1], [1], [0], [0], [0, 0, 1, 0], [], []>} : vector<64x8xf32>, vector<64x8xf32>, vector<64x64xf32> -> vector<64x64xf32>
    %cst_93 = arith.constant dense<0xFF800000> : vector<64xf32>
    %146 = vector.multi_reduction <maximumf>, %145, %cst_93 [1] : vector<64x64xf32> to vector<64xf32>
    %147 = vector.shape_cast %146 : vector<64xf32> to vector<64x1xf32>
    %148 = vector.broadcast %147 : vector<64x1xf32> to vector<64x64xf32>
    %149 = arith.subf %145, %148 : vector<64x64xf32>
    %150 = math.exp %149 : vector<64x64xf32>
    %cst_94 = arith.constant dense<0.000000e+00> : vector<64xf32>
    %151 = vector.multi_reduction <add>, %150, %cst_94 [1] : vector<64x64xf32> to vector<64xf32>
    %152 = vector.shape_cast %151 : vector<64xf32> to vector<64x1xf32>
    %153 = tpu.reciprocal %152 {approx = true} : vector<64x1xf32> -> vector<64x1xf32>
    %154 = vector.broadcast %153 : vector<64x1xf32> to vector<64x64xf32>
    %155 = arith.mulf %150, %154 : vector<64x64xf32>
    %cst_95 = arith.constant dense<0.000000e+00> : vector<64x8xf32>
    %156 = tpu.matmul %155, %144, %cst_95 {dimension_numbers = #tpu.dot_dimension_numbers<[1], [0], [0], [1], [0, 0, 1, 1], [], []>} : vector<64x64xf32>, vector<64x8xf32>, vector<64x8xf32> -> vector<64x8xf32>
    %157 = arith.addf %156, %142 : vector<64x8xf32>
    %c16 = arith.constant 16 : index
    %c0_96 = arith.constant 0 : index
    %158 = vector.load %arg9[%c16, %c0_96] : memref<32x32xf32, #tpu.memory_space<vmem>>, vector<8x32xf32>
    %cst_97 = arith.constant dense<0.000000e+00> : vector<64x32xf32>
    %159 = tpu.matmul %157, %158, %cst_97 {dimension_numbers = #tpu.dot_dimension_numbers<[1], [0], [0], [1], [0, 0, 1, 1], [], []>} : vector<64x8xf32>, vector<8x32xf32>, vector<64x32xf32> -> vector<64x32xf32>
    %160 = arith.addf %141, %159 : vector<64x32xf32>
    %161 = vector.extract_strided_slice %99 {offsets = [0, 24], sizes = [64, 8], strides = [1, 1]} : vector<64x96xf32> to vector<64x8xf32>
    %162 = vector.extract_strided_slice %99 {offsets = [0, 56], sizes = [64, 8], strides = [1, 1]} : vector<64x96xf32> to vector<64x8xf32>
    %163 = vector.extract_strided_slice %99 {offsets = [0, 88], sizes = [64, 8], strides = [1, 1]} : vector<64x96xf32> to vector<64x8xf32>
    %cst_98 = arith.constant dense<0.000000e+00> : vector<64x64xf32>
    %164 = tpu.matmul %161, %162, %cst_98 {dimension_numbers = #tpu.dot_dimension_numbers<[1], [1], [0], [0], [0, 0, 1, 0], [], []>} : vector<64x8xf32>, vector<64x8xf32>, vector<64x64xf32> -> vector<64x64xf32>
    %cst_99 = arith.constant dense<0xFF800000> : vector<64xf32>
    %165 = vector.multi_reduction <maximumf>, %164, %cst_99 [1] : vector<64x64xf32> to vector<64xf32>
    %166 = vector.shape_cast %165 : vector<64xf32> to vector<64x1xf32>
    %167 = vector.broadcast %166 : vector<64x1xf32> to vector<64x64xf32>
    %168 = arith.subf %164, %167 : vector<64x64xf32>
    %169 = math.exp %168 : vector<64x64xf32>
    %cst_100 = arith.constant dense<0.000000e+00> : vector<64xf32>
    %170 = vector.multi_reduction <add>, %169, %cst_100 [1] : vector<64x64xf32> to vector<64xf32>
    %171 = vector.shape_cast %170 : vector<64xf32> to vector<64x1xf32>
    %172 = tpu.reciprocal %171 {approx = true} : vector<64x1xf32> -> vector<64x1xf32>
    %173 = vector.broadcast %172 : vector<64x1xf32> to vector<64x64xf32>
    %174 = arith.mulf %169, %173 : vector<64x64xf32>
    %cst_101 = arith.constant dense<0.000000e+00> : vector<64x8xf32>
    %175 = tpu.matmul %174, %163, %cst_101 {dimension_numbers = #tpu.dot_dimension_numbers<[1], [0], [0], [1], [0, 0, 1, 1], [], []>} : vector<64x64xf32>, vector<64x8xf32>, vector<64x8xf32> -> vector<64x8xf32>
    %176 = arith.addf %175, %161 : vector<64x8xf32>
    %c24 = arith.constant 24 : index
    %c0_102 = arith.constant 0 : index
    %177 = vector.load %arg9[%c24, %c0_102] : memref<32x32xf32, #tpu.memory_space<vmem>>, vector<8x32xf32>
    %cst_103 = arith.constant dense<0.000000e+00> : vector<64x32xf32>
    %178 = tpu.matmul %176, %177, %cst_103 {dimension_numbers = #tpu.dot_dimension_numbers<[1], [0], [0], [1], [0, 0, 1, 1], [], []>} : vector<64x8xf32>, vector<8x32xf32>, vector<64x32xf32> -> vector<64x32xf32>
    %179 = arith.addf %160, %178 : vector<64x32xf32>
    %c0_104 = arith.constant 0 : index
    %c0_105 = arith.constant 0 : index
    %c0_106 = arith.constant 0 : index
    %180 = vector.load %arg11[%c0_104, %c0_105, %c0_106] : memref<1x64x32xf32, #tpu.memory_space<vmem>>, vector<1x64x32xf32>
    %181 = vector.shape_cast %180 : vector<1x64x32xf32> to vector<64x32xf32>
    %182 = vector.shape_cast %179 : vector<64x32xf32> to vector<1x64x32xf32>
    tpu.vector_store %arg11[%c0_104, %c0_105, %c0_106], %182 {strides = array<i32>} : memref<1x64x32xf32, #tpu.memory_space<vmem>>, vector<1x64x32xf32>,
    return
  }
  func.func @transform_0(%arg0: i32) -> (i32, i32, i32) {
    %c0_i32 = arith.constant 0 : i32
    %c0_i32_0 = arith.constant 0 : i32
    %c0_i32_1 = arith.constant 0 : i32
    return %arg0, %c0_i32, %c0_i32_0 : i32, i32, i32
  }
  func.func @transform_1(%arg0: i32) -> (i32, i32) {
    %c0_i32 = arith.constant 0 : i32
    %c0_i32_0 = arith.constant 0 : i32
    %c0_i32_1 = arith.constant 0 : i32
    return %c0_i32, %c0_i32_0 : i32, i32
  }
  func.func @transform_2(%arg0: i32) -> (i32, i32) {
    %c0_i32 = arith.constant 0 : i32
    %c0_i32_0 = arith.constant 0 : i32
    %c0_i32_1 = arith.constant 0 : i32
    return %c0_i32, %c0_i32_0 : i32, i32
  }
  func.func @transform_3(%arg0: i32) -> (i32, i32, i32) {
    %c0_i32 = arith.constant 0 : i32
    %c0_i32_0 = arith.constant 0 : i32
    %c0_i32_1 = arith.constant 0 : i32
    %c0_i32_2 = arith.constant 0 : i32
    return %c0_i32, %c0_i32_0, %c0_i32_1 : i32, i32, i32
  }
  func.func @transform_4(%arg0: i32) -> (i32, i32, i32) {
    %c0_i32 = arith.constant 0 : i32
    %c0_i32_0 = arith.constant 0 : i32
    %c0_i32_1 = arith.constant 0 : i32
    %c0_i32_2 = arith.constant 0 : i32
    return %c0_i32, %c0_i32_0, %c0_i32_1 : i32, i32, i32
  }
  func.func @transform_5(%arg0: i32) -> (i32, i32) {
    %c0_i32 = arith.constant 0 : i32
    %c0_i32_0 = arith.constant 0 : i32
    %c0_i32_1 = arith.constant 0 : i32
    return %c0_i32, %c0_i32_0 : i32, i32
  }
  func.func @transform_6(%arg0: i32) -> (i32, i32) {
    %c0_i32 = arith.constant 0 : i32
    %c0_i32_0 = arith.constant 0 : i32
    %c0_i32_1 = arith.constant 0 : i32
    return %c0_i32, %c0_i32_0 : i32, i32
  }
  func.func @transform_7(%arg0: i32) -> (i32, i32) {
    %c0_i32 = arith.constant 0 : i32
    %c0_i32_0 = arith.constant 0 : i32
    %c0_i32_1 = arith.constant 0 : i32
    return %c0_i32, %c0_i32_0 : i32, i32
  }
  func.func @transform_8(%arg0: i32) -> (i32, i32) {
    %c0_i32 = arith.constant 0 : i32
    %c0_i32_0 = arith.constant 0 : i32
    %c0_i32_1 = arith.constant 0 : i32
    return %c0_i32, %c0_i32_0 : i32, i32
  }
  func.func @transform_9(%arg0: i32) -> (i32, i32) {
    %c0_i32 = arith.constant 0 : i32
    %c0_i32_0 = arith.constant 0 : i32
    %c0_i32_1 = arith.constant 0 : i32
    return %c0_i32, %c0_i32_0 : i32, i32
  }
  func.func @transform_10(%arg0: i32) -> (i32, i32, i32) {
    %c0_i32 = arith.constant 0 : i32
    %c0_i32_0 = arith.constant 0 : i32
    %c0_i32_1 = arith.constant 0 : i32
    return %arg0, %c0_i32, %c0_i32_0 : i32, i32, i32
  }
}

</mosaic_0001>

<bundles_post_ra>
// kernel: tpu_custom_call.1
= control target key start
LH: loop header
LB: loop body
LE: loop exit
PB: predicated region body
PF: predicated region fallthrough
CT: control target
= control target key end

     0   :  { %15 = vsyncpa [#allocation3], 0  ;;  %s6157_s13 = smov 0   ;;  %s7400_s0 = inlined_call_operand.vmem [shape: f32[2,64,32], index: 0, kind: input, shape index: {}]   ;;  %s7401_s1 = inlined_call_operand.vmem [shape: f32[32,96], index: 1, kind: input, shape index: {}]   ;;  %s7402_s2 = inlined_call_operand.vmem [shape: f32[1,96], index: 2, kind: input, shape index: {}]   ;;  %s7403_s3 = inlined_call_operand.hbm [shape: f32[9,64,64], index: 3, kind: input, shape index: {}]   ;;  %s7404_s4 = inlined_call_operand.vmem [shape: f32[9,1,96], index: 4, kind: input, shape index: {}]   ;;  %s7405_s5 = inlined_call_operand.vmem [shape: f32[96,96], index: 5, kind: input, shape index: {}]   ;;  %s7406_s6 = inlined_call_operand.vmem [shape: f32[1,96], index: 6, kind: input, shape index: {}]   ;;  %s7407_s7 = inlined_call_operand.vmem [shape: f32[1,96], index: 7, kind: input, shape index: {}]   ;;  %s7408_s8 = inlined_call_operand.vmem [shape: f32[32,32], index: 8, kind: input, shape index: {}]   ;;  %s7409_s9 = inlined_call_operand.vmem [shape: f32[1,32], index: 9, kind: input, shape index: {}]   ;;  %s7410_s10 = inlined_call_operand.vmem [shape: f32[2,64,32], index: 10, kind: output, shape index: {}]  }
   0x1 LB: > { %s4614_s14 = sadd.s32 4294967295, %s6086_s13   ;;  %p4616_p0 = scmp.ge.s32.totalorder %s6086_s13, 1  ;;  %s6086_s13 = sphi %s6157_s13, %s21_s13  }
   0x2   : > { %p267_p1 = scmp.lt.s32.totalorder %s6086_s13, 3  ;;  %s6088_s15 = smov [#allocation2]  }
   0x3   : > { %s285_s16 = sshll.u32 %s6088_s15, 4  ;;  %p5882_p3 = scmp.eq.s32.totalorder %s4614_s14, 0  ;;  %s286_s16 = int_to_ptr.vmem [resolvable:$true] %s285_s16 }
   0x4   : > { %p6165_p2 = pnand %p4616_p0, %p267_p1  ;;  %s6061_s18 = scalar_lea.vmem %s286_s16, 9216 }
   0x5   : > { %p6062_p7 = scmp.ne.s32.totalorder %s286_s16, %s6061_s18  ;;  %p6069_p10 = scmp.lt.s32.totalorder %s286_s16, %s286_s16 }
   0x6   : > { %p5878_p4 = pneg %p6165_p2  ;;  %p6070_p11 = scmp.lt.s32.totalorder %s6061_s18, %s6061_s18 }
   0x8   : > { %p5879_p5 = pnand %p5882_p3, %p5878_p4  ;;  %p6071_p12 = por %p6070_p11, %p6069_p10 }
   0xa   : > { %p6052_p6 = pneg %p5879_p5 }
   0xc   : > { %p6064_p8 = pnand %p6062_p7, %p6052_p6 }
   0xe   : > { %p6065_p9 = pneg %p6064_p8 }
  0x10   : > { %p6072_p13 = pnand %p6071_p12, %p6065_p9 }
  0x12   : > { %6075 = shalt.err (!%p6072_p13)
}
  0x13   : > { %s6089_s19 = smov 128   ;;  %s6090_s20 = smov 8  }
  0x14   : > { %5881 = dma.hbm_to_vmem [thread:$0]  (!%p5879_p5), %s7403_s3, 9216, %s286_s16, [#allocation3], %s6089_s19, %s6089_s19, %s6090_s20  }
  0x15   : > { %327 = sbr.rel (%p6165_p2) target bundleno = 2899 (0xb53), region = 60 }
  0x1a   : > { %6081 = dma.done.wait (%p5882_p3), [#allocation3], 9216  }
  0x1b   : > { %6083 = vsyncadd (%p5882_p3), [#allocation3], 4294958080  ;;  %p365_p0 = scmp.lt.s32.totalorder %s4614_s14, 1  ;;  %vm394_vm0 = vcmask 261120   ;;  %v386_v0 = vld [vmem:[%s7401_s1 + $0x18] sm:$0xff]  ;;  %v385_v1 = vld [vmem:[%s7401_s1 + $0x10] sm:$0xff] }
  0x1c   : > { %5234 = vmatprep.subr.mxu0 %v386_v0  ;;  %v384_v3 = vld [vmem:[%s7401_s1 + $0x8] sm:$0xff]  ;;  %v383_v4 = vld [vmem:[%s7401_s1] sm:$0xff]  ;;  %vm572_vm1 = vcmask 523264   ;;  %v550_v57 = vld [vmem:[#allocation2 + $0x50] sm:$0xff]  ;;  %vm1977_vm2 = vcmask 785408   ;;  %vm2354_vm3 = vcmask 64512  }
  0x1d   : > { %s7421_s14 = smov (!%p365_p0, %s4614_s14), 1  ;;  %5235 = vmatpush3.msra.mxu0 %v386_v0  ;;  %v548_v12 = vld [vmem:[#allocation2 + $0x40] sm:$0xff]  ;;  %v549_v49 = vld [vmem:[#allocation2 + $0x48] sm:$0xff]  ;;  %v526_v58 = vld [vmem:[#allocation2 + $0x10] sm:$0xff]  ;;  %s6091_s12 = smov 96  }
  0x1e   : > { %s4872_s23 = sshll.u32 %s7421_s14, 6  ;;  %5236 = vmatprep.subr.mxu0 %v385_v1  ;;  %v524_v13 = vld [vmem:[#allocation2] sm:$0xff]  ;;  %5270 = vmatprep.mubr.msk.f32.mxu1 %vm572_vm1, %v548_v12  ;;  %v525_v50 = vld [vmem:[#allocation2 + $0x8] sm:$0xff]  ;;  %v551_v59 = vld [vmem:[#allocation2 + $0x58] sm:$0xff]  ;;  %s6092_s15 = smov 88  }
  0x1f   : > { %s369_s26 = scalar_lea.vmem %s7400_s0, %s4872_s23  ;;  %5237 = vmatpush3.msra.mxu0 %v385_v1  ;;  %v4625_v20 = vld [vmem:[%s7402_s2] ss:$0 sm:$0xff]  ;;  %v4636_v24 = vld [vmem:[%s7404_s4 + $0x1] ss:$0 sm:$0xff]  ;;  %v6253_v51 = vld [vmem:[%s7404_s4 + $0x2] ss:$0 sm:$0xff] }
  0x20   : > { %v375_v2 = vld [vmem:[%s369_s26] sm:$0xff]  ;;  %5238 = vmatprep.subr.mxu0 %v384_v3  ;;  %v376_v5 = vld [vmem:[%s369_s26 + $0x8] sm:$0xff]  ;;  %v377_v6 = vld [vmem:[%s369_s26 + $0x10] sm:$0xff]  ;;  %s6093_s16 = smov 120   ;;  %s6094_s17 = smov 64  }
  0x21   : > { %5242 = vmatprep.mubr.msk.f32.mxu0 %vm394_vm0, %v375_v2  ;;  %5239 = vmatpush3.msra.mxu0 %v384_v3  ;;  %v378_v7 = vld [vmem:[%s369_s26 + $0x18] sm:$0xff]  ;;  %v379_v8 = vld [vmem:[%s369_s26 + $0x20] sm:$0xff]  ;;  %v380_v9 = vld [vmem:[%s369_s26 + $0x28] sm:$0xff]  ;;  %s6095_s18 = smov 80   ;;  %s6096_s19 = smov 112  }
  0x22   : > { %5240 = vmatprep.subr.mxu0 %v383_v4  ;;  %v381_v10 = vld [vmem:[%s369_s26 + $0x30] sm:$0xff]  ;;  %v382_v11 = vld [vmem:[%s369_s26 + $0x38] sm:$0xff]  ;;  %v4634_v25 = vld [vmem:[%s7404_s4] ss:$0 sm:$0xff]  ;;  %s6097_s20 = smov 56   ;;  %s6098_s24 = smov 72  }
  0x23   : > { %5241 = vmatpush3.msra.mxu0 %v383_v4  ;;  %v6258_v52 = vld [vmem:[%s7404_s4 + $0x3] ss:$0 sm:$0xff]  ;;  %v527_v60 = vld [vmem:[#allocation2 + $0x18] sm:$0xff]  ;;  %v553_v3 = vld [vmem:[#allocation2 + $0x68] sm:$0xff]  ;;  %s6099_s25 = smov 104   ;;  %s6100_s26 = smov 48  }
  0x24   : > { %5243 = vmatmul.mubr.msk.f32.vlgmr.msra.gmra.mxu0 %vm394_vm0, %v376_v5  ;;  %v552_v1 = vld [vmem:[#allocation2 + $0x60] sm:$0xff]  ;;  %v529_v4 = vld [vmem:[#allocation2 + $0x28] sm:$0xff]  ;;  %v531_v12 = vld [vmem:[#allocation2 + $0x38] sm:$0xff]  ;;  %s6101_s29 = smov 40  }
  0x25   : > { %5245 = vmatprep.mubr.msk.f32.mxu0 %vm394_vm0, %v377_v6  ;;  %v528_v2 = vld [vmem:[#allocation2 + $0x20] sm:$0xff] }
  0x28   : > { %5246 = vmatmul.mubr.msk.f32.gmra.mxu0 %vm394_vm0, %v378_v7 }
  0x29   : > { %5248 = vmatprep.mubr.msk.f32.mxu0 %vm394_vm0, %v379_v8 }
  0x2c   : > { %5249 = vmatmul.mubr.msk.f32.gmra.mxu0 %vm394_vm0, %v380_v9  ;;  %v554_v9 = vld [vmem:[#allocation2 + $0x70] sm:$0xff] }
  0x2d   : > { %5251 = vmatprep.mubr.msk.f32.mxu0 %vm394_vm0, %v381_v10  ;;  %v530_v10 = vld [vmem:[#allocation2 + $0x30] sm:$0xff] }
  0x30   : > { %5252 = vmatmul.mubr.msk.f32.gmra.mxu0 %vm394_vm0, %v382_v11  ;;  %v555_v11 = vld [vmem:[#allocation2 + $0x78] sm:$0xff] }
  0x31   : > { %5298 = vmatprep.mubr.msk.f32.mxu0 %vm572_vm1, %v524_v13 }
  0xe4   : > { %v5244_v14 = vpop.f32.mrf.mxu0 }
  0xe5   : > { %v6238_v39 = vadd.f32 %v5244_v14, %v4625_v20 }
  0xe6   : > { %v485_v15 = vpop.f32.mrf.mxu0 }
  0xe7   : > { %v6242_v42 = vadd.f32 %v4625_v20, %v485_v15  ;;  %v565_v45 = vmul.f32 %v4636_v24, %v6238_v39  ;;  %v540_v46 = vmul.f32 %v4634_v25, %v6238_v39  ;;  %v849_v13 = vmul.f32 %v6253_v51, %v6238_v39 }
  0xe8   : > { %v5247_v16 = vpop.f32.mrf.mxu0  ;;  %v1011_v14 = vmul.f32 %v6258_v52, %v6238_v39 }
  0xe9   : > { %v6230_v33 = vadd.f32 %v5247_v16, %v4625_v20  ;;  %v564_v47 = vmul.f32 %v4636_v24, %v6242_v42  ;;  %v539_v48 = vmul.f32 %v4634_v25, %v6242_v42  ;;  %v848_v15 = vmul.f32 %v6253_v51, %v6242_v42 }
  0xea   : > { %v495_v17 = vpop.f32.mrf.mxu0  ;;  %v1010_v16 = vmul.f32 %v6258_v52, %v6242_v42 }
  0xeb   : > { %v6234_v36 = vadd.f32 %v4625_v20, %v495_v17  ;;  %v567_v40 = vmul.f32 %v4636_v24, %v6230_v33  ;;  %v542_v41 = vmul.f32 %v4634_v25, %v6230_v33  ;;  %v851_v5 = vmul.f32 %v6253_v51, %v6230_v33  ;;  %v832_v17 = vld [vmem:[#allocation2 + $0x80] sm:$0xff] }
  0xec   : > { %v5250_v18 = vpop.f32.mrf.mxu0  ;;  %v1013_v6 = vmul.f32 %v6258_v52, %v6230_v33 }
  0xed   : > { %v6220_v26 = vadd.f32 %v5250_v18, %v4625_v20  ;;  %v566_v43 = vmul.f32 %v4636_v24, %v6234_v36  ;;  %v541_v44 = vmul.f32 %v4634_v25, %v6234_v36  ;;  %v850_v7 = vmul.f32 %v6253_v51, %v6234_v36  ;;  %v833_v18 = vld [vmem:[#allocation2 + $0x88] sm:$0xff] }
  0xee   : > { %v505_v19 = vpop.f32.mrf.mxu0  ;;  %v1012_v8 = vmul.f32 %v6258_v52, %v6234_v36 }
  0xef   : > { %v6226_v30 = vadd.f32 %v4625_v20, %v505_v19  ;;  %v569_v34 = vmul.f32 %v4636_v24, %v6220_v26  ;;  %v544_v35 = vmul.f32 %v4634_v25, %v6220_v26  ;;  %v853_v61 = vmul.f32 %v6253_v51, %v6220_v26  ;;  %v994_v19 = vld [vmem:[#allocation2 + $0xc0] sm:$0xff] }
  0xf0   : > { %v5253_v21 = vpop.f32.mrf.mxu0  ;;  %v1015_v62 = vmul.f32 %v6258_v52, %v6220_v26 }
  0xf1   : > { %v6212_v22 = vadd.f32 %v5253_v21, %v4625_v20  ;;  %v568_v37 = vmul.f32 %v4636_v24, %v6226_v30  ;;  %v543_v38 = vmul.f32 %v4634_v25, %v6226_v30  ;;  %v852_v63 = vmul.f32 %v6253_v51, %v6226_v30 }
  0xf2   : > { %v515_v23 = vpop.f32.mrf.mxu0  ;;  %v1014_v0 = vmul.f32 %v6258_v52, %v6226_v30 }
  0xf3   : > { %v6222_v27 = vadd.f32 %v4625_v20, %v515_v23  ;;  %v571_v28 = vmul.f32 %v4636_v24, %v6212_v22  ;;  %v546_v29 = vmul.f32 %v4634_v25, %v6212_v22  ;;  %v855_v53 = vmul.f32 %v6253_v51, %v6212_v22  ;;  %v6309_v20 = vld [vmem:[%s7404_s4 + $0x4] ss:$0 sm:$0xff]  ;;  %v6317_v23 = vld [vmem:[%s7404_s4 + $0x5] ss:$0 sm:$0xff] }
  0xf4   : > { %v1017_v54 = vmul.f32 %v6258_v52, %v6212_v22  ;;  %v1179_v21 = vmul.f32 %v6309_v20, %v6212_v22 }
  0xf5   : > { %5254 = vmatprep.subr.mxu1 %v571_v28  ;;  %5282 = vmatprep.subr.mxu0 %v546_v29  ;;  %v570_v31 = vmul.f32 %v4636_v24, %v6222_v27  ;;  %v545_v32 = vmul.f32 %v4634_v25, %v6222_v27  ;;  %v854_v55 = vmul.f32 %v6253_v51, %v6222_v27  ;;  %v995_v24 = vld [vmem:[#allocation2 + $0xc8] sm:$0xff]  ;;  %v838_v51 = vld [vmem:[#allocation2 + $0xb0] sm:$0xff] }
  0xf6   : > { %5255 = vmatpush3.msra.mxu1 %v571_v28  ;;  %5283 = vmatpush3.msra.mxu0 %v546_v29  ;;  %v1016_v56 = vmul.f32 %v6258_v52, %v6222_v27  ;;  %v1341_v25 = vmul.f32 %v6317_v23, %v6212_v22  ;;  %v1178_v28 = vmul.f32 %v6309_v20, %v6222_v27  ;;  %v839_v52 = vld [vmem:[#allocation2 + $0xb8] sm:$0xff] }
  0xf7   : > { %5256 = vmatprep.subr.mxu1 %v570_v31  ;;  %5284 = vmatprep.subr.mxu0 %v545_v32  ;;  %v1340_v29 = vmul.f32 %v6317_v23, %v6222_v27 }
  0xf8   : > { %5257 = vmatpush3.msra.mxu1 %v570_v31  ;;  %5285 = vmatpush3.msra.mxu0 %v545_v32  ;;  %v834_v31 = vld [vmem:[#allocation2 + $0x90] sm:$0xff]  ;;  %v835_v32 = vld [vmem:[#allocation2 + $0x98] sm:$0xff] }
  0xf9   : > { %5258 = vmatprep.subr.mxu1 %v569_v34  ;;  %5286 = vmatprep.subr.mxu0 %v544_v35 }
  0xfa   : > { %5259 = vmatpush3.msra.mxu1 %v569_v34  ;;  %5287 = vmatpush3.msra.mxu0 %v544_v35  ;;  %v996_v34 = vld [vmem:[#allocation2 + $0xd0] sm:$0xff]  ;;  %v1177_v35 = vmul.f32 %v6309_v20, %v6220_v26 }
  0xfb   : > { %5260 = vmatprep.subr.mxu1 %v568_v37  ;;  %5288 = vmatprep.subr.mxu0 %v543_v38 }
  0xfc   : > { %5261 = vmatpush3.msra.mxu1 %v568_v37  ;;  %5289 = vmatpush3.msra.mxu0 %v543_v38  ;;  %v997_v37 = vld [vmem:[#allocation2 + $0xd8] sm:$0xff]  ;;  %v1339_v38 = vmul.f32 %v6317_v23, %v6220_v26 }
  0xfd   : > { %5262 = vmatprep.subr.mxu1 %v567_v40  ;;  %5290 = vmatprep.subr.mxu0 %v542_v41 }
  0xfe   : > { %5263 = vmatpush3.msra.mxu1 %v567_v40  ;;  %5291 = vmatpush3.msra.mxu0 %v542_v41  ;;  %v1176_v40 = vmul.f32 %v6309_v20, %v6226_v30  ;;  %v1338_v41 = vmul.f32 %v6317_v23, %v6226_v30 }
  0xff   : > { %5264 = vmatprep.subr.mxu1 %v566_v43  ;;  %5292 = vmatprep.subr.mxu0 %v541_v44 }
 0x100   : > { %5265 = vmatpush3.msra.mxu1 %v566_v43  ;;  %5293 = vmatpush3.msra.mxu0 %v541_v44  ;;  %v836_v43 = vld [vmem:[#allocation2 + $0xa0] sm:$0xff]  ;;  %v837_v44 = vld [vmem:[#allocation2 + $0xa8] sm:$0xff] }
 0x101   : > { %5266 = vmatprep.subr.mxu1 %v565_v45  ;;  %5294 = vmatprep.subr.mxu0 %v540_v46 }
 0x102   : > { %5267 = vmatpush3.msra.mxu1 %v565_v45  ;;  %5295 = vmatpush3.msra.mxu0 %v540_v46  ;;  %v998_v45 = vld [vmem:[#allocation2 + $0xe0] sm:$0xff]  ;;  %v1175_v46 = vmul.f32 %v6309_v20, %v6230_v33 }
 0x103   : > { %5268 = vmatprep.subr.mxu1 %v564_v47  ;;  %5296 = vmatprep.subr.mxu0 %v539_v48 }
 0x104   : > { %5269 = vmatpush3.msra.mxu1 %v564_v47  ;;  %5297 = vmatpush3.msra.mxu0 %v539_v48  ;;  %v999_v47 = vld [vmem:[#allocation2 + $0xe8] sm:$0xff]  ;;  %v1337_v48 = vmul.f32 %v6317_v23, %v6230_v33 }
 0x105   : > { %5271 = vmatmul.mubr.msk.f32.vlgmr.msra.gmra.mxu1 %vm572_vm1, %v549_v49  ;;  %5299 = vmatmul.mubr.msk.f32.vlgmr.msra.gmra.mxu0 %vm572_vm1, %v525_v50  ;;  %v1174_v49 = vmul.f32 %v6309_v20, %v6234_v36  ;;  %v1336_v50 = vmul.f32 %v6317_v23, %v6234_v36 }
 0x106   : > { %5310 = vmatprep.subr.mxu1 %v855_v53  ;;  %5338 = vmatprep.subr.mxu0 %v1017_v54 }
 0x107   : > { %5311 = vmatpush3.msra.mxu1 %v855_v53  ;;  %5339 = vmatpush3.msra.mxu0 %v1017_v54  ;;  %v1000_v53 = vld [vmem:[#allocation2 + $0xf0] sm:$0xff]  ;;  %v1173_v54 = vmul.f32 %v6309_v20, %v6238_v39 }
 0x108   : > { %5312 = vmatprep.subr.mxu1 %v854_v55  ;;  %5340 = vmatprep.subr.mxu0 %v1016_v56 }
 0x109   : > { %5273 = vmatprep.mubr.msk.f32.mxu1 %vm572_vm1, %v550_v57  ;;  %5301 = vmatprep.mubr.msk.f32.mxu0 %vm572_vm1, %v526_v58  ;;  %v1172_v57 = vmul.f32 %v6309_v20, %v6242_v42  ;;  %v1334_v58 = vmul.f32 %v6317_v23, %v6242_v42 }
 0x10a   : > { %5313 = vmatpush3.msra.mxu1 %v854_v55  ;;  %5341 = vmatpush3.msra.mxu0 %v1016_v56  ;;  %v1001_v55 = vld [vmem:[#allocation2 + $0xf8] sm:$0xff]  ;;  %v1335_v56 = vmul.f32 %v6317_v23, %v6238_v39 }
 0x10b   : > { %5274 = vmatmul.mubr.msk.f32.gmra.mxu1 %vm572_vm1, %v551_v59  ;;  %5302 = vmatmul.mubr.msk.f32.gmra.mxu0 %vm572_vm1, %v527_v60  ;;  %v1156_v59 = vld [vmem:[#allocation2 + $0x100] sm:$0xff]  ;;  %v1157_v60 = vld [vmem:[#allocation2 + $0x108] sm:$0xff]  ;;  %v1163_v23 = vld [vmem:[#allocation2 + $0x138] sm:$0xff] }
 0x10c   : > { %5314 = vmatprep.subr.mxu1 %v853_v61  ;;  %5342 = vmatprep.subr.mxu0 %v1015_v62 }
 0x10d   : > { %5315 = vmatpush3.msra.mxu1 %v853_v61  ;;  %5343 = vmatpush3.msra.mxu0 %v1015_v62  ;;  %v1318_v61 = vld [vmem:[#allocation2 + $0x140] sm:$0xff] }
 0x10e   : > { %5316 = vmatprep.subr.mxu1 %v852_v63  ;;  %5344 = vmatprep.subr.mxu0 %v1014_v0  ;;  %v6367_v62 = vld [vmem:[%s7404_s4 + $0x6] ss:$0 sm:$0xff] }
 0x10f   : > { %5276 = vmatprep.mubr.msk.f32.mxu1 %vm572_vm1, %v552_v1  ;;  %5304 = vmatprep.mubr.msk.f32.mxu0 %vm572_vm1, %v528_v2  ;;  %v1319_v1 = vld [vmem:[#allocation2 + $0x148] sm:$0xff] }
 0x110   : > { %5317 = vmatpush3.msra.mxu1 %v852_v63  ;;  %5345 = vmatpush3.msra.mxu0 %v1014_v0  ;;  %v1503_v63 = vmul.f32 %v6367_v62, %v6212_v22  ;;  %v6375_v0 = vld [vmem:[%s7404_s4 + $0x7] ss:$0 sm:$0xff] }
 0x111   : > { %5277 = vmatmul.mubr.msk.f32.gmra.mxu1 %vm572_vm1, %v553_v3  ;;  %5305 = vmatmul.mubr.msk.f32.gmra.mxu0 %vm572_vm1, %v529_v4  ;;  %v1665_v2 = vmul.f32 %v6375_v0, %v6212_v22  ;;  %v1502_v3 = vmul.f32 %v6367_v62, %v6222_v27  ;;  %v1664_v4 = vmul.f32 %v6375_v0, %v6222_v27 }
 0x112   : > { %5318 = vmatprep.subr.mxu1 %v851_v5  ;;  %5346 = vmatprep.subr.mxu0 %v1013_v6  ;;  %v1660_v20 = vmul.f32 %v6375_v0, %v6234_v36 }
 0x113   : > { %5319 = vmatpush3.msra.mxu1 %v851_v5  ;;  %5347 = vmatpush3.msra.mxu0 %v1013_v6  ;;  %v1158_v5 = vld [vmem:[#allocation2 + $0x110] sm:$0xff]  ;;  %v1159_v6 = vld [vmem:[#allocation2 + $0x118] sm:$0xff] }
 0x114   : > { %5320 = vmatprep.subr.mxu1 %v850_v7  ;;  %5348 = vmatprep.subr.mxu0 %v1012_v8 }
 0x115   : > { %5279 = vmatprep.mubr.msk.f32.mxu1 %vm572_vm1, %v554_v9  ;;  %5307 = vmatprep.mubr.msk.f32.mxu0 %vm572_vm1, %v530_v10  ;;  %v1320_v9 = vld [vmem:[#allocation2 + $0x150] sm:$0xff]  ;;  %v1321_v10 = vld [vmem:[#allocation2 + $0x158] sm:$0xff] }
 0x116   : > { %5321 = vmatpush3.msra.mxu1 %v850_v7  ;;  %5349 = vmatpush3.msra.mxu0 %v1012_v8  ;;  %v1501_v7 = vmul.f32 %v6367_v62, %v6220_v26  ;;  %v1663_v8 = vmul.f32 %v6375_v0, %v6220_v26 }
 0x117   : > { %5280 = vmatmul.mubr.msk.f32.gmra.mxu1 %vm572_vm1, %v555_v11  ;;  %5308 = vmatmul.mubr.msk.f32.gmra.mxu0 %vm572_vm1, %v531_v12  ;;  %v1500_v11 = vmul.f32 %v6367_v62, %v6226_v30  ;;  %v1662_v12 = vmul.f32 %v6375_v0, %v6226_v30 }
 0x118   : > { %5322 = vmatprep.subr.mxu1 %v849_v13  ;;  %5350 = vmatprep.subr.mxu0 %v1011_v14 }
 0x119   : > { %5323 = vmatpush3.msra.mxu1 %v849_v13  ;;  %5351 = vmatpush3.msra.mxu0 %v1011_v14  ;;  %v1160_v13 = vld [vmem:[#allocation2 + $0x120] sm:$0xff]  ;;  %v1161_v14 = vld [vmem:[#allocation2 + $0x128] sm:$0xff] }
 0x11a   : > { %5324 = vmatprep.subr.mxu1 %v848_v15  ;;  %5352 = vmatprep.subr.mxu0 %v1010_v16 }
 0x11b   : > { %5325 = vmatpush3.msra.mxu1 %v848_v15  ;;  %5326 = vmatprep.mubr.msk.f32.mxu1 %vm572_vm1, %v832_v17  ;;  %v1499_v15 = vmul.f32 %v6367_v62, %v6230_v33  ;;  %v1322_v17 = vld [vmem:[#allocation2 + $0x160] sm:$0xff] }
 0x11c   : > { %5353 = vmatpush3.msra.mxu0 %v1010_v16  ;;  %5327 = vmatmul.mubr.msk.f32.vlgmr.msra.gmra.mxu1 %vm572_vm1, %v833_v18  ;;  %v1661_v16 = vmul.f32 %v6375_v0, %v6230_v33  ;;  %v1323_v18 = vld [vmem:[#allocation2 + $0x168] sm:$0xff] }
 0x11d   : > { %5354 = vmatprep.mubr.msk.f32.mxu0 %vm572_vm1, %v994_v19  ;;  %5366 = vmatprep.subr.mxu1 %v1179_v21  ;;  %v1498_v19 = vmul.f32 %v6367_v62, %v6234_v36 }
 0x11e   : > { %5394 = vmatprep.subr.mxu0 %v1341_v25  ;;  %5355 = vmatmul.mubr.msk.f32.vlgmr.msra.gmra.mxu0 %vm572_vm1, %v995_v24  ;;  %v1497_v24 = vmul.f32 %v6367_v62, %v6238_v39 }
 0x11f   : > { %5367 = vmatpush3.msra.mxu1 %v1179_v21  ;;  %5395 = vmatpush3.msra.mxu0 %v1341_v25  ;;  %v1162_v21 = vld [vmem:[#allocation2 + $0x130] sm:$0xff]  ;;  %v1659_v25 = vmul.f32 %v6375_v0, %v6238_v39 }
 0x120   : > { %5368 = vmatprep.subr.mxu1 %v1178_v28  ;;  %5396 = vmatprep.subr.mxu0 %v1340_v29 }
 0x121   : > { %5329 = vmatprep.mubr.msk.f32.mxu1 %vm572_vm1, %v834_v31  ;;  %5369 = vmatpush3.msra.mxu1 %v1178_v28  ;;  %v1324_v28 = vld [vmem:[#allocation2 + $0x170] sm:$0xff]  ;;  %v1496_v31 = vmul.f32 %v6367_v62, %v6242_v42  ;;  %v1976_v62 = vld [vmem:[%s7405_s5 + $0x58] sm:$0xff] }
 0x122   : > { %5397 = vmatpush3.msra.mxu0 %v1340_v29  ;;  %5330 = vmatmul.mubr.msk.f32.gmra.mxu1 %vm572_vm1, %v835_v32  ;;  %v1325_v29 = vld [vmem:[#allocation2 + $0x178] sm:$0xff]  ;;  %v1658_v32 = vmul.f32 %v6375_v0, %v6242_v42  ;;  %v1974_v0 = vld [vmem:[%s7405_s5 + $0x48] sm:$0xff] }
 0x123   : > { %5357 = vmatprep.mubr.msk.f32.mxu0 %vm572_vm1, %v996_v34  ;;  %5370 = vmatprep.subr.mxu1 %v1177_v35  ;;  %v1480_v34 = vld [vmem:[#allocation2 + $0x180] sm:$0xff] }
 0x124   : > { %5398 = vmatprep.subr.mxu0 %v1339_v38  ;;  %5358 = vmatmul.mubr.msk.f32.gmra.mxu0 %vm572_vm1, %v997_v37  ;;  %v4714_v37 = vld [vmem:[%s7404_s4 + $0x8] ss:$0 sm:$0xff] }
 0x125   : > { %5371 = vmatpush3.msra.mxu1 %v1177_v35  ;;  %5399 = vmatpush3.msra.mxu0 %v1339_v38  ;;  %v1481_v35 = vld [vmem:[#allocation2 + $0x188] sm:$0xff]  ;;  %v1642_v38 = vld [vmem:[#allocation2 + $0x1c0] sm:$0xff] }
 0x126   : > { %5372 = vmatprep.subr.mxu1 %v1176_v40  ;;  %5400 = vmatprep.subr.mxu0 %v1338_v41 }
 0x127   : > { %5332 = vmatprep.mubr.msk.f32.mxu1 %vm572_vm1, %v836_v43  ;;  %5373 = vmatpush3.msra.mxu1 %v1176_v40  ;;  %v1827_v40 = vmul.f32 %v4714_v37, %v6212_v22  ;;  %v1482_v43 = vld [vmem:[#allocation2 + $0x190] sm:$0xff]  ;;  %v1825_v22 = vmul.f32 %v4714_v37, %v6220_v26  ;;  %v1823_v26 = vmul.f32 %v4714_v37, %v6230_v33 }
 0x128   : > { %5401 = vmatpush3.msra.mxu0 %v1338_v41  ;;  %5333 = vmatmul.mubr.msk.f32.gmra.mxu1 %vm572_vm1, %v837_v44  ;;  %v1643_v41 = vld [vmem:[#allocation2 + $0x1c8] sm:$0xff]  ;;  %v1826_v44 = vmul.f32 %v4714_v37, %v6222_v27  ;;  %v1824_v27 = vmul.f32 %v4714_v37, %v6226_v30  ;;  %v1822_v30 = vmul.f32 %v4714_v37, %v6234_v36 }
 0x129   : > { %5360 = vmatprep.mubr.msk.f32.mxu0 %vm572_vm1, %v998_v45  ;;  %5374 = vmatprep.subr.mxu1 %v1175_v46  ;;  %v1644_v45 = vld [vmem:[#allocation2 + $0x1d0] sm:$0xff]  ;;  %v1821_v33 = vmul.f32 %v4714_v37, %v6238_v39  ;;  %v1820_v36 = vmul.f32 %v4714_v37, %v6242_v42  ;;  %v1807_v39 = vld [vmem:[#allocation2 + $0x218] sm:$0xff]  ;;  %v1809_v42 = vld [vmem:[#allocation2 + $0x228] sm:$0xff] }
 0x12a   : > { %5402 = vmatprep.subr.mxu0 %v1337_v48  ;;  %5361 = vmatmul.mubr.msk.f32.gmra.mxu0 %vm572_vm1, %v999_v47  ;;  %v1645_v47 = vld [vmem:[#allocation2 + $0x1d8] sm:$0xff] }
 0x12b   : > { %5375 = vmatpush3.msra.mxu1 %v1175_v46  ;;  %5403 = vmatpush3.msra.mxu0 %v1337_v48  ;;  %v1483_v46 = vld [vmem:[#allocation2 + $0x198] sm:$0xff]  ;;  %v1484_v48 = vld [vmem:[#allocation2 + $0x1a0] sm:$0xff] }
 0x12c   : > { %5376 = vmatprep.subr.mxu1 %v1174_v49  ;;  %5404 = vmatprep.subr.mxu0 %v1336_v50 }
 0x12d   : > { %5335 = vmatprep.mubr.msk.f32.mxu1 %vm572_vm1, %v838_v51  ;;  %5377 = vmatpush3.msra.mxu1 %v1174_v49  ;;  %v1646_v49 = vld [vmem:[#allocation2 + $0x1e0] sm:$0xff]  ;;  %v1647_v51 = vld [vmem:[#allocation2 + $0x1e8] sm:$0xff] }
 0x12e   : > { %5405 = vmatpush3.msra.mxu0 %v1336_v50  ;;  %5336 = vmatmul.mubr.msk.f32.gmra.mxu1 %vm572_vm1, %v839_v52  ;;  %v1485_v50 = vld [vmem:[#allocation2 + $0x1a8] sm:$0xff]  ;;  %v1486_v52 = vld [vmem:[#allocation2 + $0x1b0] sm:$0xff] }
 0x12f   : > { %5363 = vmatprep.mubr.msk.f32.mxu0 %vm572_vm1, %v1000_v53  ;;  %5378 = vmatprep.subr.mxu1 %v1173_v54  ;;  %v1648_v53 = vld [vmem:[#allocation2 + $0x1f0] sm:$0xff] }
 0x130   : > { %5406 = vmatprep.subr.mxu0 %v1335_v56  ;;  %5364 = vmatmul.mubr.msk.f32.gmra.mxu0 %vm572_vm1, %v1001_v55  ;;  %v1649_v55 = vld [vmem:[#allocation2 + $0x1f8] sm:$0xff] }
 0x131   : > { %5379 = vmatpush3.msra.mxu1 %v1173_v54  ;;  %5407 = vmatpush3.msra.mxu0 %v1335_v56  ;;  %v1487_v54 = vld [vmem:[#allocation2 + $0x1b8] sm:$0xff]  ;;  %v1804_v56 = vld [vmem:[#allocation2 + $0x200] sm:$0xff] }
 0x132   : > { %5380 = vmatprep.subr.mxu1 %v1172_v57  ;;  %5408 = vmatprep.subr.mxu0 %v1334_v58 }
 0x133   : > { %5381 = vmatpush3.msra.mxu1 %v1172_v57  ;;  %5382 = vmatprep.mubr.msk.f32.mxu1 %vm572_vm1, %v1156_v59  ;;  %v1805_v57 = vld [vmem:[#allocation2 + $0x208] sm:$0xff]  ;;  %v1808_v59 = vld [vmem:[#allocation2 + $0x220] sm:$0xff] }
 0x134   : > { %5409 = vmatpush3.msra.mxu0 %v1334_v58  ;;  %5383 = vmatmul.mubr.msk.f32.vlgmr.msra.gmra.mxu1 %vm572_vm1, %v1157_v60  ;;  %v1806_v58 = vld [vmem:[#allocation2 + $0x210] sm:$0xff] }
 0x135   : > { %5410 = vmatprep.mubr.msk.f32.mxu0 %vm572_vm1, %v1318_v61  ;;  %5422 = vmatprep.subr.mxu1 %v1503_v63  ;;  %v1810_v60 = vld [vmem:[#allocation2 + $0x230] sm:$0xff]  ;;  %v1811_v61 = vld [vmem:[#allocation2 + $0x238] sm:$0xff] }
 0x136   : > { %5450 = vmatprep.subr.mxu0 %v1665_v2  ;;  %5411 = vmatmul.mubr.msk.f32.vlgmr.msra.gmra.mxu0 %vm572_vm1, %v1319_v1  ;;  %v1973_v1 = vld [vmem:[%s7405_s5 + $0x40] sm:$0xff] }
 0x137   : > { %5423 = vmatpush3.msra.mxu1 %v1503_v63  ;;  %5451 = vmatpush3.msra.mxu0 %v1665_v2  ;;  %v1975_v63 = vld [vmem:[%s7405_s5 + $0x50] sm:$0xff]  ;;  %v1972_v2 = vld [vmem:[%s7405_s5 + $0x38] sm:$0xff] }
 0x138   : > { %5424 = vmatprep.subr.mxu1 %v1502_v3  ;;  %5452 = vmatprep.subr.mxu0 %v1664_v4 }
 0x139   : > { %5385 = vmatprep.mubr.msk.f32.mxu1 %vm572_vm1, %v1158_v5  ;;  %5425 = vmatpush3.msra.mxu1 %v1502_v3  ;;  %v1971_v3 = vld [vmem:[%s7405_s5 + $0x30] sm:$0xff]  ;;  %v1969_v5 = vld [vmem:[%s7405_s5 + $0x20] sm:$0xff] }
 0x13a   : > { %5453 = vmatpush3.msra.mxu0 %v1664_v4  ;;  %5386 = vmatmul.mubr.msk.f32.gmra.mxu1 %vm572_vm1, %v1159_v6  ;;  %v1970_v4 = vld [vmem:[%s7405_s5 + $0x28] sm:$0xff]  ;;  %v1968_v6 = vld [vmem:[%s7405_s5 + $0x18] sm:$0xff] }
 0x13b   : > { %5426 = vmatprep.subr.mxu1 %v1501_v7  ;;  %5454 = vmatprep.subr.mxu0 %v1663_v8 }
 0x13c   : > { %5413 = vmatprep.mubr.msk.f32.mxu0 %vm572_vm1, %v1320_v9  ;;  %5427 = vmatpush3.msra.mxu1 %v1501_v7  ;;  %v1967_v7 = vld [vmem:[%s7405_s5 + $0x10] sm:$0xff]  ;;  %v1965_v9 = vld [vmem:[%s7405_s5] sm:$0xff] }
 0x13d   : > { %5455 = vmatpush3.msra.mxu0 %v1663_v8  ;;  %5428 = vmatprep.subr.mxu1 %v1500_v11  ;;  %v1966_v8 = vld [vmem:[%s7405_s5 + $0x8] sm:$0xff] }
 0x13e   : > { %5414 = vmatmul.mubr.msk.f32.gmra.mxu0 %vm572_vm1, %v1321_v10  ;;  %5456 = vmatprep.subr.mxu0 %v1662_v12 }
 0x13f   : > { %5388 = vmatprep.mubr.msk.f32.mxu1 %vm572_vm1, %v1160_v13  ;;  %5429 = vmatpush3.msra.mxu1 %v1500_v11 }
 0x140   : > { %5457 = vmatpush3.msra.mxu0 %v1662_v12  ;;  %5389 = vmatmul.mubr.msk.f32.gmra.mxu1 %vm572_vm1, %v1161_v14 }
 0x141   : > { %5430 = vmatprep.subr.mxu1 %v1499_v15  ;;  %5458 = vmatprep.subr.mxu0 %v1661_v16 }
 0x142   : > { %5416 = vmatprep.mubr.msk.f32.mxu0 %vm572_vm1, %v1322_v17  ;;  %5431 = vmatpush3.msra.mxu1 %v1499_v15 }
 0x143   : > { %5459 = vmatpush3.msra.mxu0 %v1661_v16  ;;  %5432 = vmatprep.subr.mxu1 %v1498_v19 }
 0x144   : > { %5417 = vmatmul.mubr.msk.f32.gmra.mxu0 %vm572_vm1, %v1323_v18  ;;  %5460 = vmatprep.subr.mxu0 %v1660_v20 }
 0x145   : > { %5391 = vmatprep.mubr.msk.f32.mxu1 %vm572_vm1, %v1162_v21  ;;  %5433 = vmatpush3.msra.mxu1 %v1498_v19 }
 0x146   : > { %5461 = vmatpush3.msra.mxu0 %v1660_v20  ;;  %5392 = vmatmul.mubr.msk.f32.gmra.mxu1 %vm572_vm1, %v1163_v23 }
 0x147   : > { %5434 = vmatprep.subr.mxu1 %v1497_v24  ;;  %5462 = vmatprep.subr.mxu0 %v1659_v25 }
 0x148   : > { %5419 = vmatprep.mubr.msk.f32.mxu0 %vm572_vm1, %v1324_v28  ;;  %5435 = vmatpush3.msra.mxu1 %v1497_v24 }
 0x149   : > { %5463 = vmatpush3.msra.mxu0 %v1659_v25  ;;  %5436 = vmatprep.subr.mxu1 %v1496_v31 }
 0x14a   : > { %5420 = vmatmul.mubr.msk.f32.gmra.mxu0 %vm572_vm1, %v1325_v29  ;;  %5464 = vmatprep.subr.mxu0 %v1658_v32 }
 0x14b   : > { %5437 = vmatpush3.msra.mxu1 %v1496_v31  ;;  %5438 = vmatprep.mubr.msk.f32.mxu1 %vm572_vm1, %v1480_v34 }
 0x14c   : > { %5465 = vmatpush3.msra.mxu0 %v1658_v32  ;;  %5439 = vmatmul.mubr.msk.f32.vlgmr.msra.gmra.mxu1 %vm572_vm1, %v1481_v35 }
 0x14d   : > { %5478 = vmatprep.subr.mxu1 %v1827_v40  ;;  %5466 = vmatprep.mubr.msk.f32.mxu0 %vm572_vm1, %v1642_v38 }
 0x14e   : > { %5479 = vmatpush3.msra.mxu1 %v1827_v40  ;;  %5467 = vmatmul.mubr.msk.f32.vlgmr.msra.gmra.mxu0 %vm572_vm1, %v1643_v41 }
 0x14f   : > { %5480 = vmatprep.subr.mxu1 %v1826_v44  ;;  %5441 = vmatprep.mubr.msk.f32.mxu1 %vm572_vm1, %v1482_v43 }
 0x150   : > { %5481 = vmatpush3.msra.mxu1 %v1826_v44  ;;  %5469 = vmatprep.mubr.msk.f32.mxu0 %vm572_vm1, %v1644_v45 }
 0x151   : > { %5442 = vmatmul.mubr.msk.f32.gmra.mxu1 %vm572_vm1, %v1483_v46  ;;  %5482 = vmatprep.subr.mxu1 %v1825_v22 }
 0x152   : > { %5483 = vmatpush3.msra.mxu1 %v1825_v22  ;;  %5470 = vmatmul.mubr.msk.f32.gmra.mxu0 %vm572_vm1, %v1645_v47 }
 0x153   : > { %5484 = vmatprep.subr.mxu1 %v1824_v27  ;;  %5444 = vmatprep.mubr.msk.f32.mxu1 %vm572_vm1, %v1484_v48 }
 0x154   : > { %5485 = vmatpush3.msra.mxu1 %v1824_v27  ;;  %5472 = vmatprep.mubr.msk.f32.mxu0 %vm572_vm1, %v1646_v49 }
 0x155   : > { %5445 = vmatmul.mubr.msk.f32.gmra.mxu1 %vm572_vm1, %v1485_v50  ;;  %5486 = vmatprep.subr.mxu1 %v1823_v26 }
 0x156   : > { %5487 = vmatpush3.msra.mxu1 %v1823_v26  ;;  %5473 = vmatmul.mubr.msk.f32.gmra.mxu0 %vm572_vm1, %v1647_v51 }
 0x157   : > { %5488 = vmatprep.subr.mxu1 %v1822_v30  ;;  %5447 = vmatprep.mubr.msk.f32.mxu1 %vm572_vm1, %v1486_v52 }
 0x158   : > { %5489 = vmatpush3.msra.mxu1 %v1822_v30  ;;  %5475 = vmatprep.mubr.msk.f32.mxu0 %vm572_vm1, %v1648_v53 }
 0x159   : > { %5448 = vmatmul.mubr.msk.f32.gmra.mxu1 %vm572_vm1, %v1487_v54  ;;  %5490 = vmatprep.subr.mxu1 %v1821_v33 }
 0x15a   : > { %5491 = vmatpush3.msra.mxu1 %v1821_v33  ;;  %5476 = vmatmul.mubr.msk.f32.gmra.mxu0 %vm572_vm1, %v1649_v55 }
 0x15b   : > { %5492 = vmatprep.subr.mxu1 %v1820_v36  ;;  %5494 = vmatprep.mubr.msk.f32.mxu1 %vm572_vm1, %v1804_v56 }
 0x15c   : > { %5493 = vmatpush3.msra.mxu1 %v1820_v36  ;;  %5506 = vmatprep.subr.mxu0 %v1976_v62 }
 0x15d   : > { %5495 = vmatmul.mubr.msk.f32.vlgmr.msra.gmra.mxu1 %vm572_vm1, %v1805_v57  ;;  %5542 = vmatprep.subr.mxu1 %v1976_v62 }
 0x15e   : > { %5497 = vmatprep.mubr.msk.f32.mxu1 %vm572_vm1, %v1806_v58  ;;  %5507 = vmatpush3.msra.mxu0 %v1976_v62 }
 0x15f   : > { %5543 = vmatpush3.msra.mxu1 %v1976_v62  ;;  %5508 = vmatprep.subr.mxu0 %v1975_v63 }
 0x160   : > { %5544 = vmatprep.subr.mxu1 %v1975_v63  ;;  %5509 = vmatpush3.msra.mxu0 %v1975_v63 }
 0x161   : > { %5498 = vmatmul.mubr.msk.f32.gmra.mxu1 %vm572_vm1, %v1807_v39  ;;  %5510 = vmatprep.subr.mxu0 %v1974_v0 }
 0x162   : > { %5500 = vmatprep.mubr.msk.f32.mxu1 %vm572_vm1, %v1808_v59  ;;  %5545 = vmatpush3.msra.mxu1 %v1975_v63 }
 0x163   : > { %5546 = vmatprep.subr.mxu1 %v1974_v0  ;;  %5511 = vmatpush3.msra.mxu0 %v1974_v0 }
 0x164   : > { %5547 = vmatpush3.msra.mxu1 %v1974_v0  ;;  %5512 = vmatprep.subr.mxu0 %v1973_v1 }
 0x165   : > { %5501 = vmatmul.mubr.msk.f32.gmra.mxu1 %vm572_vm1, %v1809_v42  ;;  %5548 = vmatprep.subr.mxu1 %v1973_v1 }
 0x166   : > { %5503 = vmatprep.mubr.msk.f32.mxu1 %vm572_vm1, %v1810_v60  ;;  %5513 = vmatpush3.msra.mxu0 %v1973_v1 }
 0x167   : > { %5549 = vmatpush3.msra.mxu1 %v1973_v1  ;;  %5514 = vmatprep.subr.mxu0 %v1972_v2 }
 0x168   : > { %5550 = vmatprep.subr.mxu1 %v1972_v2  ;;  %5515 = vmatpush3.msra.mxu0 %v1972_v2 }
 0x169   : > { %5504 = vmatmul.mubr.msk.f32.gmra.mxu1 %vm572_vm1, %v1811_v61  ;;  %5516 = vmatprep.subr.mxu0 %v1971_v3 }
 0x16a   : > { %5551 = vmatpush3.msra.mxu1 %v1972_v2  ;;  %5517 = vmatpush3.msra.mxu0 %v1971_v3 }
 0x16b   : > { %5552 = vmatprep.subr.mxu1 %v1971_v3  ;;  %5518 = vmatprep.subr.mxu0 %v1970_v4 }
 0x16c   : > { %5553 = vmatpush3.msra.mxu1 %v1971_v3  ;;  %5519 = vmatpush3.msra.mxu0 %v1970_v4 }
 0x16d   : > { %5554 = vmatprep.subr.mxu1 %v1970_v4  ;;  %5520 = vmatprep.subr.mxu0 %v1969_v5 }
 0x16e   : > { %5555 = vmatpush3.msra.mxu1 %v1970_v4  ;;  %5521 = vmatpush3.msra.mxu0 %v1969_v5 }
 0x16f   : > { %5556 = vmatprep.subr.mxu1 %v1969_v5  ;;  %5522 = vmatprep.subr.mxu0 %v1968_v6 }
 0x170   : > { %5557 = vmatpush3.msra.mxu1 %v1969_v5  ;;  %5523 = vmatpush3.msra.mxu0 %v1968_v6 }
 0x171   : > { %5558 = vmatprep.subr.mxu1 %v1968_v6  ;;  %5524 = vmatprep.subr.mxu0 %v1967_v7 }
 0x172   : > { %5559 = vmatpush3.msra.mxu1 %v1968_v6  ;;  %5525 = vmatpush3.msra.mxu0 %v1967_v7 }
 0x173   : > { %5560 = vmatprep.subr.mxu1 %v1967_v7  ;;  %5526 = vmatprep.subr.mxu0 %v1966_v8 }
 0x174   : > { %5561 = vmatpush3.msra.mxu1 %v1967_v7  ;;  %5527 = vmatpush3.msra.mxu0 %v1966_v8 }
 0x175   : > { %5562 = vmatprep.subr.mxu1 %v1966_v8  ;;  %5528 = vmatprep.subr.mxu0 %v1965_v9 }
 0x176   : > { %5563 = vmatpush3.msra.mxu1 %v1966_v8  ;;  %5529 = vmatpush3.msra.mxu0 %v1965_v9 }
 0x177   : > { %5564 = vmatprep.subr.mxu1 %v1965_v9 }
 0x178   : > { %5565 = vmatpush3.msra.mxu1 %v1965_v9 }
 0x1c5   : > { %v5272_v10 = vpop.f32.mrf.mxu1  ;;  %v5300_v11 = vpop.f32.mrf.mxu0 }
 0x1c6   : > { %v798_v60 = vadd.f32 %v5300_v11, %v5272_v10 }
 0x1c7   : > { %v663_v12 = vpop.f32.mrf.mxu1  ;;  %v792_v13 = vpop.f32.mrf.mxu0 }
 0x1c8   : > { %v793_v39 = vadd.f32 %v792_v13, %v663_v12 }
 0x1cb   : > { %v5275_v14 = vpop.f32.mrf.mxu1  ;;  %v5303_v15 = vpop.f32.mrf.mxu0 }
 0x1cc   : > { %v808_v3 = vadd.f32 %v5303_v15, %v5275_v14 }
 0x1cd   : > { %v673_v16 = vpop.f32.mrf.mxu1  ;;  %v802_v17 = vpop.f32.mrf.mxu0 }
 0x1ce   : > { %v803_v1 = vadd.f32 %v802_v17, %v673_v16 }
 0x1d1   : > { %v5278_v18 = vpop.f32.mrf.mxu1  ;;  %v5306_v19 = vpop.f32.mrf.mxu0 }
 0x1d2   : > { %v818_v13 = vadd.f32 %v5306_v19, %v5278_v18 }
 0x1d3   : > { %v683_v20 = vpop.f32.mrf.mxu1  ;;  %v812_v21 = vpop.f32.mrf.mxu0 }
 0x1d7   : > { %v6493_v23 = vpop.f32.mrf.mxu1  ;;  %v6495_v24 = vpop.f32.mrf.mxu0 }
 0x1d9   : > { %v693_v25 = vpop.f32.mrf.mxu1  ;;  %v822_v28 = vpop.f32.mrf.mxu0 }
 0x1da   : > { %v823_v17 = vadd.f32 %v822_v28, %v693_v25 }
 0x1dc   : > { %v5328_v29 = vpop.f32.mrf.mxu1 }
 0x1dd   : > { %v986_v0 = vadd.f32 %v5328_v29, %v798_v60 }
 0x1de   : > { %v946_v31 = vpop.f32.mrf.mxu1  ;;  %v5356_v32 = vpop.f32.mrf.mxu0 }
 0x1df   : > { %v985_v61 = vadd.f32 %v946_v31, %v793_v39  ;;  %v1148_v7 = vadd.f32 %v5356_v32, %v986_v0  ;;  %v828_v32 = vadd.f32 %v6495_v24, %v6493_v23 }
 0x1e0   : > { %v1108_v34 = vpop.f32.mrf.mxu0 }
 0x1e1   : > { %v1147_v5 = vadd.f32 %v1108_v34, %v985_v61 }
 0x1e2   : > { %v5331_v35 = vpop.f32.mrf.mxu1 }
 0x1e3   : > { %v988_v8 = vadd.f32 %v5331_v35, %v808_v3 }
 0x1e4   : > { %v956_v37 = vpop.f32.mrf.mxu1  ;;  %v5359_v38 = vpop.f32.mrf.mxu0 }
 0x1e5   : > { %v987_v6 = vadd.f32 %v956_v37, %v803_v1  ;;  %v1150_v31 = vadd.f32 %v5359_v38, %v988_v8 }
 0x1e6   : > { %v1118_v40 = vpop.f32.mrf.mxu0 }
 0x1e7   : > { %v1149_v10 = vadd.f32 %v1118_v40, %v987_v6 }
 0x1e8   : > { %v5334_v41 = vpop.f32.mrf.mxu1 }
 0x1e9   : > { %v990_v39 = vadd.f32 %v5334_v41, %v818_v13 }
 0x1ea   : > { %v966_v43 = vpop.f32.mrf.mxu1  ;;  %v5362_v44 = vpop.f32.mrf.mxu0 }
 0x1eb   : > { %v1152_v19 = vadd.f32 %v5362_v44, %v990_v39 }
 0x1ec   : > { %v1128_v45 = vpop.f32.mrf.mxu0 }
 0x1ee   : > { %v5337_v46 = vpop.f32.mrf.mxu1 }
 0x1f0   : > { %v976_v22 = vpop.f32.mrf.mxu1  ;;  %v6497_v47 = vpop.f32.mrf.mxu0 }
 0x1f2   : > { %v6499_v48 = vpop.f32.mrf.mxu0 }
 0x1f4   : > { %v5384_v27 = vpop.f32.mrf.mxu1 }
 0x1f6   : > { %v1270_v49 = vpop.f32.mrf.mxu1  ;;  %v5412_v50 = vpop.f32.mrf.mxu0 }
 0x1f7   : > { %v1309_v12 = vadd.f32 %v1270_v49, %v1147_v5 }
 0x1f8   : > { %v1432_v51 = vpop.f32.mrf.mxu0 }
 0x1f9   : > { %v1471_v14 = vadd.f32 %v1432_v51, %v1309_v12 }
 0x1fa   : > { %v5387_v26 = vpop.f32.mrf.mxu1 }
 0x1fb   : > { %v1312_v35 = vadd.f32 %v5387_v26, %v1150_v31 }
 0x1fc   : > { %v1280_v52 = vpop.f32.mrf.mxu1 }
 0x1fd   : > { %v1311_v15 = vadd.f32 %v1280_v52, %v1149_v10 }
 0x1fe   : > { %v5415_v30 = vpop.f32.mrf.mxu0 }
 0x200   : > { %v5390_v53 = vpop.f32.mrf.mxu1  ;;  %v1442_v54 = vpop.f32.mrf.mxu0 }
 0x201   : > { %v1473_v41 = vadd.f32 %v1442_v54, %v1311_v15  ;;  %v1314_v25 = vadd.f32 %v5390_v53, %v1152_v19 }
 0x202   : > { %v1290_v33 = vpop.f32.mrf.mxu1 }
 0x204   : > { %v6501_v55 = vpop.f32.mrf.mxu0 }
 0x205   : > { %7412 = vst [vmem:[#allocation5_spill] sm:$0xff] %v6501_v55 }
 0x206   : > { %v6503_v56 = vpop.f32.mrf.mxu1  ;;  %v1452_v36 = vpop.f32.mrf.mxu0 }
 0x207   : > { %7413 = vst [vmem:[#allocation6_spill] sm:$0xff] %v6503_v56 }
 0x208   : > { %v1300_v57 = vpop.f32.mrf.mxu1 }
 0x20a   : > { %v6505_v58 = vpop.f32.mrf.mxu0 }
 0x20b   : > { %7414 = vst [vmem:[#allocation7_spill] sm:$0xff] %v6505_v58  ;;  %v813_v58 = vadd.f32 %v812_v21, %v683_v20  ;;  %v991_v21 = vadd.f32 %v976_v22, %v823_v17 }
 0x20c   : > { %v6507_v59 = vpop.f32.mrf.mxu0  ;;  %v5440_v42 = vpop.f32.mrf.mxu1 }
 0x20d   : > { %7415 = vst [vmem:[#allocation8_spill] sm:$0xff] %v6507_v59  ;;  %v1310_v59 = vadd.f32 %v5384_v27, %v1148_v7  ;;  %v989_v11 = vadd.f32 %v966_v43, %v813_v58  ;;  %v992_v27 = vadd.f32 %v5337_v46, %v828_v32  ;;  %v1474_v58 = vadd.f32 %v5415_v30, %v1312_v35 }
 0x20e   : > { %v1594_v62 = vpop.f32.mrf.mxu1  ;;  %v5468_v63 = vpop.f32.mrf.mxu0  ;;  %v1153_v51 = vadd.f32 %v6499_v48, %v991_v21 }
 0x20f   : > { %v1472_v34 = vadd.f32 %v5412_v50, %v1310_v59  ;;  %v1151_v20 = vadd.f32 %v1128_v45, %v989_v11  ;;  %v1633_v18 = vadd.f32 %v1594_v62, %v1471_v14  ;;  %v1154_v24 = vadd.f32 %v6497_v47, %v992_v27 }
 0x210   : > { %v1756_v2 = vpop.f32.mrf.mxu0  ;;  %v1315_v46 = vadd.f32 %v1300_v57, %v1153_v51 }
 0x211   : > { %v5443_v4 = vpop.f32.mrf.mxu1  ;;  %v1634_v40 = vadd.f32 %v5440_v42, %v1472_v34  ;;  %v1313_v49 = vadd.f32 %v1290_v33, %v1151_v20  ;;  %v1795_v52 = vadd.f32 %v1756_v2, %v1633_v18  ;;  %v7416_v42 = vld [vmem:[#allocation5_spill] sm:$0xff]  ;;  %v7417_v33 = vld [vmem:[#allocation6_spill] sm:$0xff] }
 0x212   : > { %v5471_v56 = vpop.f32.mrf.mxu0  ;;  %v1636_v45 = vadd.f32 %v5443_v4, %v1474_v58  ;;  %v1476_v54 = vadd.f32 %v7416_v42, %v1314_v25  ;;  %v1316_v30 = vadd.f32 %v7417_v33, %v1154_v24  ;;  %v7419_v2 = vld [vmem:[#allocation7_spill] sm:$0xff] }
 0x213   : > { %v1604_v9 = vpop.f32.mrf.mxu1  ;;  %v1796_v50 = vadd.f32 %v5468_v63, %v1634_v40  ;;  %v1475_v44 = vadd.f32 %v1452_v36, %v1313_v49 }
 0x214   : > { %v1766_v29 = vpop.f32.mrf.mxu0  ;;  %v1635_v23 = vadd.f32 %v1604_v9, %v1473_v41  ;;  %v1798_v62 = vadd.f32 %v5471_v56, %v1636_v45  ;;  %v7418_v1 = vld [vmem:[#allocation8_spill] sm:$0xff]  ;;  %v1478_v3 = vadd.f32 %v7419_v2, %v1316_v30 }
 0x215   : > { %v5446_v55 = vpop.f32.mrf.mxu1  ;;  %v1477_v36 = vadd.f32 %v7418_v1, %v1315_v46 }
 0x216   : > { %v5474_v43 = vpop.f32.mrf.mxu0  ;;  %v1797_v61 = vadd.f32 %v1766_v29, %v1635_v23  ;;  %v1638_v47 = vadd.f32 %v5446_v55, %v1476_v54 }
 0x217   : > { %v1614_v16 = vpop.f32.mrf.mxu1 }
 0x218   : > { %v1776_v22 = vpop.f32.mrf.mxu0  ;;  %v1637_v48 = vadd.f32 %v1614_v16, %v1475_v44  ;;  %v1800_v8 = vadd.f32 %v5474_v43, %v1638_v47 }
 0x219   : > { %v5449_v37 = vpop.f32.mrf.mxu1 }
 0x21a   : > { %v5477_v63 = vpop.f32.mrf.mxu0  ;;  %v1799_v6 = vadd.f32 %v1776_v22, %v1637_v48  ;;  %v1640_v9 = vadd.f32 %v5449_v37, %v1478_v3 }
 0x21b   : > { %v1624_v38 = vpop.f32.mrf.mxu1 }
 0x21c   : > { %v1639_v7 = vadd.f32 %v1624_v38, %v1477_v36  ;;  %v1786_v12 = vpop.f32.mrf.mxu0  ;;  %v1802_v31 = vadd.f32 %v5477_v63, %v1640_v9 }
 0x21d   : > { %v5496_v28 = vpop.f32.mrf.mxu1 }
 0x21e   : > { %v1958_v53 = vadd.f32 %v5496_v28, %v1796_v50  ;;  %v1801_v11 = vadd.f32 %v1786_v12, %v1639_v7 }
 0x21f   : > { %v1918_v26 = vpop.f32.mrf.mxu1 }
 0x220   : > { %v1957_v59 = vadd.f32 %v1918_v26, %v1795_v52 }
 0x221   : > { %v5499_v60 = vpop.f32.mrf.mxu1 }
 0x222   : > { %5530 = vmatprep.mubr.msk.f32.mxu0 %vm1977_vm2, %v1957_v59  ;;  %v1960_v4 = vadd.f32 %v5499_v60, %v1798_v62 }
 0x223   : > { %v1928_v0 = vpop.f32.mrf.mxu1  ;;  %5531 = vmatmul.mubr.msk.f32.vlgmr.msra.gmra.mxu0 %vm1977_vm2, %v1958_v53 }
 0x224   : > { %v1959_v57 = vadd.f32 %v1928_v0, %v1797_v61 }
 0x225   : > { %v5502_v5 = vpop.f32.mrf.mxu1 }
 0x226   : > { %5533 = vmatprep.mubr.msk.f32.mxu0 %vm1977_vm2, %v1959_v57  ;;  %v1962_v13 = vadd.f32 %v5502_v5, %v1800_v8 }
 0x227   : > { %v1938_v56 = vpop.f32.mrf.mxu1  ;;  %5534 = vmatmul.mubr.msk.f32.gmra.mxu0 %vm1977_vm2, %v1960_v4 }
 0x228   : > { %v1961_v55 = vadd.f32 %v1938_v56, %v1799_v6 }
 0x229   : > { %v5505_v10 = vpop.f32.mrf.mxu1 }
 0x22a   : > { %5536 = vmatprep.mubr.msk.f32.mxu0 %vm1977_vm2, %v1961_v55  ;;  %v1964_v16 = vadd.f32 %v5505_v10, %v1802_v31  ;;  %v4739_v10 = vld [vmem:[%s7406_s6] ss:$0 sm:$0xff] }
 0x22b   : > { %v1948_v39 = vpop.f32.mrf.mxu1  ;;  %5537 = vmatmul.mubr.msk.f32.gmra.mxu0 %vm1977_vm2, %v1962_v13  ;;  %v4740_v31 = vld [vmem:[%s7407_s7] ss:$0 sm:$0xff] }
 0x22c   : > { %v1963_v29 = vadd.f32 %v1948_v39, %v1801_v11 }
 0x22e   : > { %5539 = vmatprep.mubr.msk.f32.mxu0 %vm1977_vm2, %v1963_v29 }
 0x22f   : > { %5540 = vmatmul.mubr.msk.f32.gmra.mxu0 %vm1977_vm2, %v1964_v16 }
 0x2e3   : > { %v5532_v17 = vpop.f32.mrf.mxu0 }
 0x2e4   : > { %v2108_v14 = vmul.f32 0.125, %v5532_v17 }
 0x2e5   : > { %v2068_v15 = vpop.f32.mrf.mxu0 }
 0x2e6   : > { %v2107_v32 = vmul.f32 0.125, %v2068_v15  ;;  %v6525_v34 = vsub.f32 %v1958_v53, %v2108_v14 }
 0x2e7   : > { %v5535_v35 = vpop.f32.mrf.mxu0 }
 0x2e8   : > { %v6527_v37 = vsub.f32 %v1957_v59, %v2107_v32  ;;  %v2110_v20 = vmul.f32 0.125, %v5535_v35  ;;  %v2124_v27 = vmul.f32 %v6525_v34, %v6525_v34 }
 0x2e9   : > { %v2078_v21 = vpop.f32.mrf.mxu0 }
 0x2ea   : > { %v2123_v18 = vmul.f32 %v6527_v37, %v6527_v37  ;;  %v2109_v19 = vmul.f32 0.125, %v2078_v21  ;;  %v6533_v40 = vsub.f32 %v1960_v4, %v2110_v20 }
 0x2eb   : > { %v5538_v43 = vpop.f32.mrf.mxu0 }
 0x2ec   : > { %v6535_v38 = vsub.f32 %v1959_v57, %v2109_v19  ;;  %v2112_v41 = vmul.f32 0.125, %v5538_v43  ;;  %5566 = vmatprep.mubr.msk.f32.mxu1 %vm1977_vm2, %v2123_v18  ;;  %v2126_v28 = vmul.f32 %v6533_v40, %v6533_v40 }
 0x2ed   : > { %v2088_v49 = vpop.f32.mrf.mxu0  ;;  %5567 = vmatmul.mubr.msk.f32.vlgmr.msra.gmra.mxu1 %vm1977_vm2, %v2124_v27 }
 0x2ee   : > { %v2125_v58 = vmul.f32 %v6535_v38, %v6535_v38  ;;  %v2111_v25 = vmul.f32 0.125, %v2088_v49  ;;  %v2120_v51 = vsub.f32 %v1962_v13, %v2112_v41 }
 0x2ef   : > { %v5541_v52 = vpop.f32.mrf.mxu0 }
 0x2f0   : > { %v2119_v23 = vsub.f32 %v1961_v55, %v2111_v25  ;;  %v2114_v24 = vmul.f32 0.125, %v5541_v52  ;;  %5569 = vmatprep.mubr.msk.f32.mxu1 %vm1977_vm2, %v2125_v58  ;;  %v2128_v26 = vmul.f32 %v2120_v51, %v2120_v51 }
 0x2f1   : > { %v2098_v50 = vpop.f32.mrf.mxu0  ;;  %5570 = vmatmul.mubr.msk.f32.gmra.mxu1 %vm1977_vm2, %v2126_v28 }
 0x2f2   : > { %v2127_v45 = vmul.f32 %v2119_v23, %v2119_v23  ;;  %v2113_v22 = vmul.f32 0.125, %v2098_v50  ;;  %v2122_v44 = vsub.f32 %v1964_v16, %v2114_v24 }
 0x2f4   : > { %v2121_v46 = vsub.f32 %v1963_v29, %v2113_v22  ;;  %5572 = vmatprep.mubr.msk.f32.mxu1 %vm1977_vm2, %v2127_v45  ;;  %v2130_v42 = vmul.f32 %v2122_v44, %v2122_v44 }
 0x2f5   : > { %5573 = vmatmul.mubr.msk.f32.gmra.mxu1 %vm1977_vm2, %v2128_v26 }
 0x2f6   : > { %v2129_v59 = vmul.f32 %v2121_v46, %v2121_v46 }
 0x2f8   : > { %5575 = vmatprep.mubr.msk.f32.mxu1 %vm1977_vm2, %v2129_v59 }
 0x2f9   : > { %5576 = vmatmul.mubr.msk.f32.gmra.mxu1 %vm1977_vm2, %v2130_v42 }
 0x3ad   : > { %v5568_v54 = vpop.f32.mrf.mxu1 }
 0x3ae   : > { %v2261_v7 = vmul.f32 0.125, %v5568_v54 }
 0x3af   : > { %v2221_v33 = vpop.f32.mrf.mxu1 }
 0x3b0   : > { %v2260_v30 = vmul.f32 0.125, %v2221_v33  ;;  %v2269_v56 = vadd.f32 1e-05, %v2261_v7 }
 0x3b1   : > { %v5571_v53 = vpop.f32.mrf.mxu1 }
 0x3b2   : > { %v2268_v60 = vadd.f32 1e-05, %v2260_v30  ;;  %v2263_v63 = vmul.f32 0.125, %v5571_v53 }
 0x3b3   : > { %v2231_v61 = vpop.f32.mrf.mxu1 }
 0x3b4   : > { %5906 = vrsqrt.f32 %v2268_v60  ;;  %v2262_v48 = vmul.f32 0.125, %v2231_v61  ;;  %v2271_v5 = vadd.f32 1e-05, %v2263_v63 }
 0x3b5   : > { %v5574_v62 = vpop.f32.mrf.mxu1 }
 0x3b6   : > { %v2265_v47 = vmul.f32 0.125, %v5574_v62  ;;  %v2270_v0 = vadd.f32 1e-05, %v2262_v48 }
 0x3b7   : > { %v2241_v1 = vpop.f32.mrf.mxu1 }
 0x3b8   : > { %v2273_v36 = vadd.f32 1e-05, %v2265_v47  ;;  %v2264_v57 = vmul.f32 0.125, %v2241_v1 }
 0x3b9   : > { %v5577_v2 = vpop.f32.mrf.mxu1 }
 0x3ba   : > { %5908 = vrsqrt.f32 %v2273_v36  ;;  %v2272_v3 = vadd.f32 1e-05, %v2264_v57  ;;  %v2267_v4 = vmul.f32 0.125, %v5577_v2 }
 0x3bb   : > { %5910 = vrsqrt.f32 %v2270_v0  ;;  %v2251_v6 = vpop.f32.mrf.mxu1 }
 0x3bc   : > { %5912 = vrsqrt.f32 %v2272_v3  ;;  %v2275_v8 = vadd.f32 1e-05, %v2267_v4  ;;  %v2266_v9 = vmul.f32 0.125, %v2251_v6 }
 0x3be   : > { %5914 = vrsqrt.f32 %v2275_v8  ;;  %v2274_v12 = vadd.f32 1e-05, %v2266_v9 }
 0x3bf   : > { %5916 = vrsqrt.f32 %v2271_v5 }
 0x3c0   : > { %5918 = vrsqrt.f32 %v2274_v12 }
 0x3c1   : > { %v5907_v55 = vpop.eup %5906  ;;  %5920 = vrsqrt.f32 %v2269_v56 }
 0x3c2   : > { %v2284_v13 = vmul.f32 %v5907_v55, %v6527_v37 }
 0x3c4   : > { %v2299_v11 = vmul.f32 %v4739_v10, %v2284_v13 }
 0x3c6   : > { %v6556_v39 = vadd.f32 %v4740_v31, %v2299_v11 }
 0x3c7   : > { %v5909_v29 = vpop.eup %5908 }
 0x3c8   : > { %v5911_v16 = vpop.eup %5910  ;;  %v2289_v17 = vmul.f32 %v5909_v29, %v2120_v51  ;;  %5594 = vmatprep.mubr.msk.f32.mxu0 %vm2354_vm3, %v6556_v39 }
 0x3c9   : > { %v5913_v14 = vpop.eup %5912  ;;  %v2286_v20 = vmul.f32 %v5911_v16, %v6535_v38 }
 0x3ca   : > { %v2304_v15 = vmul.f32 %v4739_v10, %v2289_v17  ;;  %v2288_v32 = vmul.f32 %v5913_v14, %v2119_v23 }
 0x3cb   : > { %v5915_v35 = vpop.eup %5914  ;;  %v2301_v58 = vmul.f32 %v4739_v10, %v2286_v20 }
 0x3cc   : > { %v5917_v37 = vpop.eup %5916  ;;  %v6561_v21 = vadd.f32 %v4740_v31, %v2304_v15  ;;  %v2303_v18 = vmul.f32 %v4739_v10, %v2288_v32  ;;  %v2291_v19 = vmul.f32 %v5915_v35, %v2122_v44 }
 0x3cd   : > { %v5919_v27 = vpop.eup %5918  ;;  %v2287_v49 = vmul.f32 %v5917_v37, %v6533_v40  ;;  %v6572_v24 = vadd.f32 %v4740_v31, %v2301_v58 }
 0x3ce   : > { %v2306_v43 = vmul.f32 %v4739_v10, %v2291_v19  ;;  %v2290_v41 = vmul.f32 %v5919_v27, %v2121_v46  ;;  %2348 = vrot.lane.b32.xlu1 %v6561_v21, %s6091_s12  ;;  %v6565_v25 = vadd.f32 %v4740_v31, %v2303_v18  ;;  %v5921_v52 = vpop.eup %5920 }
 0x3cf   : > { %v2285_v38 = vmul.f32 %v5921_v52, %v6525_v34  ;;  %v2302_v23 = vmul.f32 %v4739_v10, %v2287_v49 }
 0x3d0   : > { %v6567_v28 = vadd.f32 %v4740_v31, %v2306_v43  ;;  %v2305_v51 = vmul.f32 %v4739_v10, %v2290_v41 }
 0x3d1   : > { %v2300_v40 = vmul.f32 %v4739_v10, %v2285_v38  ;;  %v6578_v45 = vadd.f32 %v4740_v31, %v2302_v23 }
 0x3d2   : > { %2346 = vrot.lane.b32.xlu1 %v6565_v25, %s6091_s12  ;;  %2352 = vrot.lane.b32.xlu0 %v6567_v28, %s6091_s12  ;;  %v6574_v50 = vadd.f32 %v4740_v31, %v2305_v51 }
 0x3d3   : > { %v6582_v22 = vadd.f32 %v4740_v31, %v2300_v40 }
 0x3d6   : > { %2342 = vrot.lane.b32.xlu1 %v6572_v24, %s6091_s12  ;;  %2350 = vrot.lane.b32.xlu0 %v6574_v50, %s6091_s12 }
 0x3da   : > { %2338 = vrot.lane.b32.xlu1 %v6556_v39, %s6091_s12  ;;  %2344 = vrot.lane.b32.xlu0 %v6578_v45, %s6091_s12 }
 0x3de   : > { %2895 = vrot.lane.b32.xlu1 %v6565_v25, %s6092_s15  ;;  %2340 = vrot.lane.b32.xlu0 %v6582_v22, %s6091_s12 }
 0x3e2   : > { %2891 = vrot.lane.b32.xlu1 %v6572_v24, %s6092_s15  ;;  %2901 = vrot.lane.b32.xlu0 %v6567_v28, %s6092_s15 }
 0x3e6   : > { %2887 = vrot.lane.b32.xlu1 %v6556_v39, %s6092_s15  ;;  %2897 = vrot.lane.b32.xlu0 %v6561_v21, %s6092_s15 }
 0x3ea   : > { %2873 = vrot.lane.b32.xlu1 %v6582_v22, %s6093_s16  ;;  %2893 = vrot.lane.b32.xlu0 %v6578_v45, %s6092_s15 }
 0x3ee   : > { %2877 = vrot.lane.b32.xlu1 %v6578_v45, %s6093_s16  ;;  %2889 = vrot.lane.b32.xlu0 %v6582_v22, %s6092_s15 }
 0x3f2   : > { %2881 = vrot.lane.b32.xlu1 %v6561_v21, %s6093_s16  ;;  %2871 = vrot.lane.b32.xlu0 %v6556_v39, %s6093_s16 }
 0x3f6   : > { %2899 = vrot.lane.b32.xlu1 %v6574_v50, %s6092_s15  ;;  %2875 = vrot.lane.b32.xlu0 %v6572_v24, %s6093_s16 }
 0x3fa   : > { %2885 = vrot.lane.b32.xlu1 %v6567_v28, %s6093_s16  ;;  %2879 = vrot.lane.b32.xlu0 %v6565_v25, %s6093_s16 }
 0x3fe   : > { %2883 = vrot.lane.b32.xlu0 %v6574_v50, %s6093_s16 }
 0x440   : > { %v2349_v34 = vpop.permute.xlu1 %2348 }
 0x444   : > { %v2347_v26 = vpop.permute.xlu1 %2346  ;;  %v2353_v44 = vpop.permute.xlu0 %2352 }
 0x445   : > { %5578 = vmatprep.subr.msk.mxu0 %vm2354_vm3, %v2353_v44 }
 0x446   : > { %5579 = vmatpush3.xpose.msk.msra.mxu0 %vm2354_vm3, %v2353_v44 }
 0x448   : > { %v2343_v46 = vpop.permute.xlu1 %2342  ;;  %v2351_v59 = vpop.permute.xlu0 %2350 }
 0x449   : > { %5580 = vmatprep.subr.msk.mxu0 %vm2354_vm3, %v2351_v59 }
 0x44a   : > { %5581 = vmatpush3.xpose.msk.msra.mxu0 %vm2354_vm3, %v2351_v59 }
 0x44b   : > { %5582 = vmatprep.subr.msk.mxu0 %vm2354_vm3, %v2349_v34 }
 0x44c   : > { %v2339_v42 = vpop.permute.xlu1 %2338  ;;  %v2345_v54 = vpop.permute.xlu0 %2344 }
 0x44e   : > { %5583 = vmatpush3.xpose.msk.msra.mxu0 %vm2354_vm3, %v2349_v34 }
 0x44f   : > { %5584 = vmatprep.subr.msk.mxu0 %vm2354_vm3, %v2347_v26 }
 0x450   : > { %v2896_v33 = vpop.permute.xlu1 %2895  ;;  %v2341_v30 = vpop.permute.xlu0 %2340 }
 0x452   : > { %5585 = vmatpush3.xpose.msk.msra.mxu0 %vm2354_vm3, %v2347_v26 }
 0x453   : > { %5586 = vmatprep.subr.msk.mxu0 %vm2354_vm3, %v2345_v54 }
 0x454   : > { %v2892_v53 = vpop.permute.xlu1 %2891  ;;  %v2902_v61 = vpop.permute.xlu0 %2901 }
 0x456   : > { %5587 = vmatpush3.xpose.msk.msra.mxu0 %vm2354_vm3, %v2345_v54 }
 0x457   : > { %5588 = vmatprep.subr.msk.mxu0 %vm2354_vm3, %v2343_v46 }
 0x458   : > { %v2888_v60 = vpop.permute.xlu1 %2887  ;;  %v2898_v62 = vpop.permute.xlu0 %2897 }
 0x45a   : > { %5589 = vmatpush3.xpose.msk.msra.mxu0 %vm2354_vm3, %v2343_v46 }
 0x45b   : > { %5590 = vmatprep.subr.msk.mxu0 %vm2354_vm3, %v2341_v30 }
 0x45c   : > { %v6614_v48 = vpop.permute.xlu1 %2873  ;;  %v2894_v0 = vpop.permute.xlu0 %2893 }
 0x45e   : > { %5591 = vmatpush3.xpose.msk.msra.mxu0 %vm2354_vm3, %v2341_v30 }
 0x45f   : > { %5592 = vmatprep.subr.msk.mxu0 %vm2354_vm3, %v2339_v42 }
 0x460   : > { %v6618_v47 = vpop.permute.xlu1 %2877  ;;  %v2890_v36 = vpop.permute.xlu0 %2889 }
 0x462   : > { %5593 = vmatpush3.xpose.msk.msra.mxu0 %vm2354_vm3, %v2339_v42 }
 0x463   : > { %5648 = vmatprep.subr.msk.mxu0 %vm2354_vm3, %v2902_v61 }
 0x464   : > { %v6622_v63 = vpop.permute.xlu1 %2881  ;;  %v6642_v57 = vpop.permute.xlu0 %2871 }
 0x465   : > { %5595 = vmatmul.mubr.msk.f32.vlgmr.msra.gmra.mxu0 %vm2354_vm3, %v6582_v22 }
 0x466   : > { %5597 = vmatprep.mubr.msk.f32.mxu0 %vm2354_vm3, %v6572_v24  ;;  %5649 = vmatpush3.xpose.msk.msra.mxu0 %vm2354_vm3, %v2902_v61 }
 0x468   : > { %v2900_v1 = vpop.permute.xlu1 %2899  ;;  %v6656_v2 = vpop.permute.xlu0 %2875 }
 0x469   : > { %5598 = vmatmul.mubr.msk.f32.gmra.mxu0 %vm2354_vm3, %v6578_v45  ;;  %5650 = vmatprep.subr.msk.mxu0 %vm2354_vm3, %v2900_v1 }
 0x46a   : > { %5600 = vmatprep.mubr.msk.f32.mxu0 %vm2354_vm3, %v6565_v25  ;;  %5651 = vmatpush3.xpose.msk.msra.mxu0 %vm2354_vm3, %v2900_v1 }
 0x46b   : > { %5652 = vmatprep.subr.msk.mxu0 %vm2354_vm3, %v2898_v62 }
 0x46c   : > { %v6663_v3 = vpop.permute.xlu0 %2879  ;;  %v6675_v5 = vpop.permute.xlu1 %2885 }
 0x46d   : > { %5601 = vmatmul.mubr.msk.f32.gmra.mxu0 %vm2354_vm3, %v6561_v21 }
 0x46e   : > { %5603 = vmatprep.mubr.msk.f32.mxu0 %vm2354_vm3, %v6574_v50  ;;  %5653 = vmatpush3.xpose.msk.msra.mxu0 %vm2354_vm3, %v2898_v62 }
 0x46f   : > { %5654 = vmatprep.subr.msk.mxu0 %vm2354_vm3, %v2896_v33 }
 0x470   : > { %v6669_v4 = vpop.permute.xlu0 %2883 }
 0x471   : > { %5604 = vmatmul.mubr.msk.f32.gmra.mxu0 %vm2354_vm3, %v6567_v28 }
 0x472   : > { %5655 = vmatpush3.xpose.msk.msra.mxu0 %vm2354_vm3, %v2896_v33  ;;  %5664 = vmatprep.mubr.msk.f32.mxu0 %vm2354_vm3, %v6642_v57 }
 0x473   : > { %5656 = vmatprep.subr.msk.mxu0 %vm2354_vm3, %v2894_v0 }
 0x476   : > { %5657 = vmatpush3.xpose.msk.msra.mxu0 %vm2354_vm3, %v2894_v0 }
 0x477   : > { %5658 = vmatprep.subr.msk.mxu0 %vm2354_vm3, %v2892_v53 }
 0x47a   : > { %5659 = vmatpush3.xpose.msk.msra.mxu0 %vm2354_vm3, %v2892_v53 }
 0x47b   : > { %5660 = vmatprep.subr.msk.mxu0 %vm2354_vm3, %v2890_v36 }
 0x47e   : > { %5661 = vmatpush3.xpose.msk.msra.mxu0 %vm2354_vm3, %v2890_v36 }
 0x47f   : > { %5662 = vmatprep.subr.msk.mxu0 %vm2354_vm3, %v2888_v60 }
 0x482   : > { %5663 = vmatpush3.xpose.msk.msra.mxu0 %vm2354_vm3, %v2888_v60 }
 0x485   : > { %5665 = vmatmul.mubr.msk.f32.vlgmr.msra.gmra.mxu0 %vm2354_vm3, %v6614_v48 }
 0x486   : > { %5667 = vmatprep.mubr.msk.f32.mxu0 %vm2354_vm3, %v6656_v2 }
 0x489   : > { %5668 = vmatmul.mubr.msk.f32.gmra.mxu0 %vm2354_vm3, %v6618_v47 }
 0x48a   : > { %5670 = vmatprep.mubr.msk.f32.mxu0 %vm2354_vm3, %v6663_v3 }
 0x48d   : > { %5671 = vmatmul.mubr.msk.f32.gmra.mxu0 %vm2354_vm3, %v6622_v63 }
 0x48e   : > { %5673 = vmatprep.mubr.msk.f32.mxu0 %vm2354_vm3, %v6669_v4 }
 0x491   : > { %5674 = vmatmul.mubr.msk.f32.gmra.mxu0 %vm2354_vm3, %v6675_v5 }
 0x525   : > { %v5596_v6 = vpop.f32.mrf.mxu0 }
 0x526   : > { %v2495_v7 = vsel %vm572_vm1, %v5596_v6, -inf }
 0x527   : > { %2496 = vmax.xlane.f32.xlu1 %v2495_v7  ;;  %v2453_v8 = vpop.f32.mrf.mxu0 }
 0x528   : > { %v2492_v9 = vsel %vm572_vm1, %v2453_v8, -inf }
 0x529   : > { %2493 = vmax.xlane.f32.xlu0 %v2492_v9  ;;  %v5599_v12 = vpop.f32.mrf.mxu0 }
 0x52a   : > { %v2501_v11 = vsel %vm572_vm1, %v5599_v12, -inf }
 0x52b   : > { %v2463_v56 = vpop.f32.mrf.mxu0 }
 0x52c   : > { %v2498_v55 = vsel %vm572_vm1, %v2463_v56, -inf }
 0x52d   : > { %2499 = vmax.xlane.f32.xlu0 %v2498_v55  ;;  %v5602_v13 = vpop.f32.mrf.mxu0 }
 0x52e   : > { %v2507_v29 = vsel %vm572_vm1, %v5602_v13, -inf }
 0x52f   : > { %v2473_v10 = vpop.f32.mrf.mxu0 }
 0x530   : > { %v2504_v31 = vsel %vm572_vm1, %v2473_v10, -inf }
 0x531   : > { %2502 = vmax.xlane.f32.xlu0 %v2501_v11  ;;  %2505 = vmax.xlane.f32.xlu1 %v2504_v31  ;;  %v5605_v16 = vpop.f32.mrf.mxu0 }
 0x532   : > { %v2513_v17 = vsel %vm572_vm1, %v5605_v16, -inf }
 0x533   : > { %v6694_v14 = vpop.f32.mrf.mxu0 }
 0x534   : > { %v2510_v15 = vsel %vm572_vm1, %v6694_v14, -inf }
 0x535   : > { %2508 = vmax.xlane.f32.xlu0 %v2507_v29 }
 0x539   : > { %2514 = vmax.xlane.f32.xlu0 %v2513_v17 }
 0x542   : > { %2594 = vrot.lane.b32.xlu1 %v6567_v28, %s6094_s17 }
 0x546   : > { %2590 = vrot.lane.b32.xlu1 %v6561_v21, %s6094_s17 }
 0x54f   : > { %2592 = vrot.lane.b32.xlu0 %v6574_v50, %s6094_s17 }
 0x553   : > { %2586 = vrot.lane.b32.xlu0 %v6578_v45, %s6094_s17 }
 0x56a   : > { %2511 = vmax.xlane.f32.xlu1 %v2510_v15 }
 0x57b   : > { %2588 = vrot.lane.b32.xlu1 %v6565_v25, %s6094_s17 }
 0x57f   : > { %2584 = vrot.lane.b32.xlu1 %v6572_v24, %s6094_s17 }
 0x5b0   : > { %v2497_v32 = vpop.xlane.xlu1 %2496 }
 0x5b1   : > { %v2517_v35 = vsub.f32 %v5596_v6, %v2497_v32 }
 0x5b2   : > { %v2494_v37 = vpop.xlane.xlu0 %2493 }
 0x5b3   : > { %v2526_v20 = vmul.f32 1.442695, %v2517_v35  ;;  %v2516_v18 = vsub.f32 %v2453_v8, %v2494_v37 }
 0x5b5   : > { %5922 = vpow2.f32 %v2526_v20  ;;  %v2524_v19 = vmul.f32 1.442695, %v2516_v18 }
 0x5b6   : > { %v2500_v27 = vpop.xlane.xlu0 %2499 }
 0x5b7   : > { %5924 = vpow2.f32 %v2524_v19  ;;  %v2518_v43 = vsub.f32 %v2463_v56, %v2500_v27 }
 0x5b9   : > { %v2528_v41 = vmul.f32 1.442695, %v2518_v43 }
 0x5ba   : > { %v2506_v49 = vpop.xlane.xlu1 %2505  ;;  %v2503_v58 = vpop.xlane.xlu0 %2502 }
 0x5bb   : > { %5926 = vpow2.f32 %v2528_v41  ;;  %v2520_v51 = vsub.f32 %v2473_v10, %v2506_v49  ;;  %v2519_v52 = vsub.f32 %v5599_v12, %v2503_v58 }
 0x5bd   : > { %v2532_v38 = vmul.f32 1.442695, %v2520_v51  ;;  %v2530_v23 = vmul.f32 1.442695, %v2519_v52 }
 0x5be   : > { %v2595_v40 = vpop.permute.xlu1 %2594  ;;  %v2509_v34 = vpop.xlane.xlu0 %2508 }
 0x5bf   : > { %5928 = vpow2.f32 %v2532_v38  ;;  %v2521_v26 = vsub.f32 %v5602_v13, %v2509_v34  ;;  %5606 = vmatprep.subr.mxu1 %v2595_v40 }
 0x5c0   : > { %5930 = vpow2.f32 %v2530_v23  ;;  %5607 = vmatpush3.msra.mxu1 %v2595_v40 }
 0x5c1   : > { %v2534_v44 = vmul.f32 1.442695, %v2521_v26 }
 0x5c2   : > { %v6702_v46 = vpop.eup %5922  ;;  %v2515_v59 = vpop.xlane.xlu0 %2514 }
 0x5c3   : > { %5932 = vpow2.f32 %v2534_v44  ;;  %v2523_v42 = vsub.f32 %v5605_v16, %v2515_v59  ;;  %v2543_v54 = vsel %vm572_vm1, %v6702_v46, 0.0  ;;  %v2591_v62 = vpop.permute.xlu1 %2590 }
 0x5c4   : > { %v6706_v33 = vpop.eup %5924  ;;  %2544 = vadd.xlane.f32.xlu0 %v2543_v54 }
 0x5c5   : > { %v2538_v30 = vmul.f32 1.442695, %v2523_v42  ;;  %v2540_v53 = vsel %vm572_vm1, %v6706_v33, 0.0 }
 0x5c6   : > { %2541 = vadd.xlane.f32.xlu1 %v2540_v53  ;;  %v2593_v60 = vpop.permute.xlu0 %2592 }
 0x5c7   : > { %5934 = vpow2.f32 %v2538_v30  ;;  %5608 = vmatprep.subr.mxu1 %v2593_v60 }
 0x5c8   : > { %v6710_v61 = vpop.eup %5926  ;;  %5609 = vmatpush3.msra.mxu1 %v2593_v60 }
 0x5c9   : > { %5610 = vmatprep.subr.mxu1 %v2591_v62  ;;  %v2546_v0 = vsel %vm572_vm1, %v6710_v61, 0.0 }
 0x5ca   : > { %2547 = vadd.xlane.f32.xlu1 %v2546_v0  ;;  %5611 = vmatpush3.msra.mxu1 %v2591_v62  ;;  %v2587_v31 = vpop.permute.xlu0 %2586 }
 0x5cc   : > { %v6714_v1 = vpop.eup %5928 }
 0x5cd   : > { %v6716_v36 = vpop.eup %5930  ;;  %v2552_v6 = vsel %vm572_vm1, %v6714_v1, 0.0 }
 0x5ce   : > { %2553 = vadd.xlane.f32.xlu1 %v2552_v6  ;;  %v2549_v7 = vsel %vm572_vm1, %v6716_v36, 0.0 }
 0x5cf   : > { %2550 = vadd.xlane.f32.xlu0 %v2549_v7 }
 0x5d0   : > { %v6722_v8 = vpop.eup %5932 }
 0x5d1   : > { %v2555_v9 = vsel %vm572_vm1, %v6722_v8, 0.0 }
 0x5d3   : > { %2556 = vadd.xlane.f32.xlu0 %v2555_v9 }
 0x5d4   : > { %v6726_v12 = vpop.eup %5934 }
 0x5d5   : > { %v2561_v56 = vsel %vm572_vm1, %v6726_v12, 0.0 }
 0x5d7   : > { %2562 = vadd.xlane.f32.xlu0 %v2561_v56 }
 0x5ed   : > { %2582 = vrot.lane.b32.xlu0 %v6582_v22, %s6094_s17 }
 0x5f1   : > { %3457 = vrot.lane.b32.xlu0 %v6567_v28, %s6095_s18 }
 0x5f3   : > { %v2512_v55 = vpop.xlane.xlu1 %2511 }
 0x5f4   : > { %v2522_v13 = vsub.f32 %v6694_v14, %v2512_v55  ;;  %v6757_v14 = vpop.f32.mrf.mxu0 }
 0x5f5   : > { %3453 = vrot.lane.b32.xlu0 %v6561_v21, %s6095_s18  ;;  %v3043_v38 = vsel %vm572_vm1, %v6757_v14, -inf }
 0x5f6   : > { %v2536_v10 = vmul.f32 1.442695, %v2522_v13  ;;  %v6761_v15 = vpop.f32.mrf.mxu0  ;;  %v2733_v13 = vld [vmem:[%s7408_s8] sm:$0xff] }
 0x5f7   : > { %v2589_v11 = vpop.permute.xlu1 %2588  ;;  %v3040_v35 = vsel %vm572_vm1, %v6761_v15, -inf }
 0x5f8   : > { %5936 = vpow2.f32 %v2536_v10  ;;  %5612 = vmatprep.subr.mxu1 %v2589_v11  ;;  %v6765_v32 = vpop.f32.mrf.mxu0 }
 0x5f9   : > { %3449 = vrot.lane.b32.xlu0 %v6578_v45, %s6095_s18  ;;  %5613 = vmatpush3.msra.mxu1 %v2589_v11  ;;  %v3049_v19 = vsel %vm572_vm1, %v6765_v32, -inf }
 0x5fa   : > { %5614 = vmatprep.subr.mxu1 %v2587_v31  ;;  %v6771_v37 = vpop.f32.mrf.mxu0 }
 0x5fb   : > { %v2585_v29 = vpop.permute.xlu1 %2584  ;;  %5615 = vmatpush3.msra.mxu1 %v2587_v31  ;;  %v3046_v20 = vsel %vm572_vm1, %v6771_v37, -inf }
 0x5fc   : > { %5616 = vmatprep.subr.mxu1 %v2585_v29  ;;  %v6777_v18 = vpop.f32.mrf.mxu0 }
 0x5fd   : > { %3445 = vrot.lane.b32.xlu0 %v6582_v22, %s6095_s18  ;;  %5617 = vmatpush3.msra.mxu1 %v2585_v29  ;;  %v3055_v43 = vsel %vm572_vm1, %v6777_v18, -inf }
 0x5fe   : > { %v6783_v27 = vpop.f32.mrf.mxu0 }
 0x5ff   : > { %v3052_v26 = vsel %vm572_vm1, %v6783_v27, -inf }
 0x600   : > { %v6789_v41 = vpop.f32.mrf.mxu0 }
 0x601   : > { %3427 = vrot.lane.b32.xlu0 %v6556_v39, %s6096_s19  ;;  %v3061_v49 = vsel %vm572_vm1, %v6789_v41, -inf }
 0x602   : > { %v6804_v44 = vpop.f32.mrf.mxu0 }
 0x603   : > { %v3058_v42 = vsel %vm572_vm1, %v6804_v44, -inf }
 0x605   : > { %v6743_v16 = vpop.eup %5936  ;;  %3431 = vrot.lane.b32.xlu0 %v6572_v24, %s6096_s19 }
 0x606   : > { %v2558_v17 = vsel %vm572_vm1, %v6743_v16, 0.0 }
 0x607   : > { %2559 = vadd.xlane.f32.xlu1 %v2558_v17 }
 0x609   : > { %3435 = vrot.lane.b32.xlu0 %v6565_v25, %s6096_s19 }
 0x60d   : > { %3439 = vrot.lane.b32.xlu0 %v6574_v50, %s6096_s19 }
 0x618   : > { %2580 = vrot.lane.b32.xlu1 %v6556_v39, %s6094_s17 }
 0x61c   : > { %3455 = vrot.lane.b32.xlu1 %v6574_v50, %s6095_s18 }
 0x620   : > { %3451 = vrot.lane.b32.xlu1 %v6565_v25, %s6095_s18 }
 0x624   : > { %3447 = vrot.lane.b32.xlu1 %v6572_v24, %s6095_s18 }
 0x628   : > { %3443 = vrot.lane.b32.xlu1 %v6556_v39, %s6095_s18 }
 0x62c   : > { %3041 = vmax.xlane.f32.xlu0 %v3040_v35  ;;  %3429 = vrot.lane.b32.xlu1 %v6582_v22, %s6096_s19 }
 0x630   : > { %3047 = vmax.xlane.f32.xlu0 %v3046_v20  ;;  %3433 = vrot.lane.b32.xlu1 %v6578_v45, %s6096_s19 }
 0x634   : > { %3050 = vmax.xlane.f32.xlu0 %v3049_v19  ;;  %3437 = vrot.lane.b32.xlu1 %v6561_v21, %s6096_s19 }
 0x638   : > { %3056 = vmax.xlane.f32.xlu0 %v3055_v43  ;;  %3441 = vrot.lane.b32.xlu1 %v6567_v28, %s6096_s19 }
 0x63c   : > { %3062 = vmax.xlane.f32.xlu0 %v3061_v49 }
 0x64d   : > { %v2545_v51 = vpop.xlane.xlu0 %2544 }
 0x64f   : > { %v2542_v58 = vpop.xlane.xlu1 %2541 }
 0x650   : > { %5938 = vrcp.f32 %v2542_v58 }
 0x651   : > { %5940 = vrcp.f32 %v2545_v51 }
 0x652   : > { %3140 = vrot.lane.b32.xlu0 %v6574_v50, %s6097_s20 }
 0x653   : > { %v2548_v0 = vpop.xlane.xlu1 %2547 }
 0x654   : > { %5942 = vrcp.f32 %v2548_v0 }
 0x656   : > { %3134 = vrot.lane.b32.xlu0 %v6578_v45, %s6097_s20 }
 0x657   : > { %v2554_v6 = vpop.xlane.xlu1 %2553 }
 0x658   : > { %v2551_v52 = vpop.xlane.xlu0 %2550 }
 0x659   : > { %5944 = vrcp.f32 %v2551_v52 }
 0x65a   : > { %5946 = vrcp.f32 %v2554_v6 }
 0x65c   : > { %v2557_v23 = vpop.xlane.xlu0 %2556  ;;  %3044 = vmax.xlane.f32.xlu1 %v3043_v38 }
 0x65d   : > { %v5939_v40 = vpop.eup %5938  ;;  %5948 = vrcp.f32 %v2557_v23 }
 0x65e   : > { %v2572_v34 = vmul.f32 %v5939_v40, %v6706_v33  ;;  %v5941_v9 = vpop.eup %5940 }
 0x65f   : > { %v2573_v10 = vmul.f32 %v5941_v9, %v6702_v46 }
 0x660   : > { %v2563_v59 = vpop.xlane.xlu0 %2562  ;;  %5622 = vmatprep.mubr.msk.f32.mxu1 %vm572_vm1, %v2572_v34  ;;  %3053 = vmax.xlane.f32.xlu1 %v3052_v26 }
 0x661   : > { %5950 = vrcp.f32 %v2563_v59  ;;  %v5943_v56 = vpop.eup %5942 }
 0x662   : > { %v2574_v31 = vmul.f32 %v5943_v56, %v6710_v61 }
 0x664   : > { %v2583_v54 = vpop.permute.xlu0 %2582  ;;  %3059 = vmax.xlane.f32.xlu1 %v3058_v42 }
 0x665   : > { %5618 = vmatprep.subr.mxu1 %v2583_v54 }
 0x666   : > { %5619 = vmatpush3.msra.mxu1 %v2583_v54  ;;  %v5945_v11 = vpop.eup %5944 }
 0x667   : > { %v5947_v29 = vpop.eup %5946  ;;  %v2575_v35 = vmul.f32 %v5945_v11, %v6716_v36 }
 0x668   : > { %v3458_v30 = vpop.permute.xlu0 %3457  ;;  %v2576_v46 = vmul.f32 %v5947_v29, %v6714_v1 }
 0x669   : > { %5718 = vmatprep.subr.msk.mxu0 %vm2354_vm3, %v3458_v30 }
 0x66a   : > { %5719 = vmatpush3.xpose.msk.msra.mxu0 %vm2354_vm3, %v3458_v30  ;;  %v5949_v20 = vpop.eup %5948 }
 0x66b   : > { %v2577_v43 = vmul.f32 %v5949_v20, %v6722_v8 }
 0x66c   : > { %v3454_v33 = vpop.permute.xlu0 %3453 }
 0x66e   : > { %v5951_v19 = vpop.eup %5950 }
 0x66f   : > { %v2579_v1 = vmul.f32 %v5951_v19, %v6726_v12 }
 0x670   : > { %v3450_v53 = vpop.permute.xlu0 %3449 }
 0x674   : > { %v3446_v60 = vpop.permute.xlu0 %3445 }
 0x675   : > { %3142 = vrot.lane.b32.xlu1 %v6567_v28, %s6097_s20 }
 0x678   : > { %v6813_v62 = vpop.permute.xlu0 %3427 }
 0x679   : > { %5734 = vmatprep.mubr.msk.f32.mxu0 %vm2354_vm3, %v6813_v62  ;;  %3138 = vrot.lane.b32.xlu1 %v6561_v21, %s6097_s20 }
 0x67c   : > { %v6847_v8 = vpop.permute.xlu0 %3431 }
 0x67d   : > { %3136 = vrot.lane.b32.xlu1 %v6565_v25, %s6097_s20 }
 0x681   : > { %3132 = vrot.lane.b32.xlu1 %v6572_v24, %s6097_s20 }
 0x690   : > { %v2560_v7 = vpop.xlane.xlu1 %2559 }
 0x691   : > { %5952 = vrcp.f32 %v2560_v7 }
 0x694   : > { %v2581_v55 = vpop.permute.xlu1 %2580 }
 0x695   : > { %5620 = vmatprep.subr.mxu1 %v2581_v55 }
 0x696   : > { %5621 = vmatpush3.msra.mxu1 %v2581_v55 }
 0x697   : > { %5623 = vmatmul.mubr.msk.f32.vlgmr.msra.gmra.mxu1 %vm572_vm1, %v2573_v10  ;;  %5634 = vmatprep.subr.mxu1 %v2733_v13 }
 0x698   : > { %v3456_v17 = vpop.permute.xlu1 %3455  ;;  %5625 = vmatprep.mubr.msk.f32.mxu1 %vm572_vm1, %v2574_v31  ;;  %5635 = vmatpush3.msra.mxu1 %v2733_v13 }
 0x699   : > { %5720 = vmatprep.subr.msk.mxu0 %vm2354_vm3, %v3456_v17 }
 0x69a   : > { %5721 = vmatpush3.xpose.msk.msra.mxu0 %vm2354_vm3, %v3456_v17 }
 0x69b   : > { %5626 = vmatmul.mubr.msk.f32.gmra.mxu1 %vm572_vm1, %v2575_v35  ;;  %5722 = vmatprep.subr.msk.mxu0 %vm2354_vm3, %v3454_v33 }
 0x69c   : > { %v3452_v61 = vpop.permute.xlu1 %3451  ;;  %5628 = vmatprep.mubr.msk.f32.mxu1 %vm572_vm1, %v2576_v46 }
 0x69e   : > { %v5953_v49 = vpop.eup %5952  ;;  %5723 = vmatpush3.xpose.msk.msra.mxu0 %vm2354_vm3, %v3454_v33 }
 0x69f   : > { %5629 = vmatmul.mubr.msk.f32.gmra.mxu1 %vm572_vm1, %v2577_v43  ;;  %5724 = vmatprep.subr.msk.mxu0 %vm2354_vm3, %v3452_v61  ;;  %v2578_v36 = vmul.f32 %v5953_v49, %v6743_v16  ;;  %v6852_v16 = vpop.permute.xlu0 %3435 }
 0x6a0   : > { %v3448_v58 = vpop.permute.xlu1 %3447 }
 0x6a1   : > { %5631 = vmatprep.mubr.msk.f32.mxu1 %vm572_vm1, %v2578_v36 }
 0x6a2   : > { %5725 = vmatpush3.xpose.msk.msra.mxu0 %vm2354_vm3, %v3452_v61 }
 0x6a3   : > { %5632 = vmatmul.mubr.msk.f32.gmra.mxu1 %vm572_vm1, %v2579_v1  ;;  %5726 = vmatprep.subr.msk.mxu0 %vm2354_vm3, %v3450_v53  ;;  %v6859_v52 = vpop.permute.xlu0 %3439 }
 0x6a4   : > { %v3444_v51 = vpop.permute.xlu1 %3443 }
 0x6a6   : > { %5727 = vmatpush3.xpose.msk.msra.mxu0 %vm2354_vm3, %v3450_v53 }
 0x6a7   : > { %5728 = vmatprep.subr.msk.mxu0 %vm2354_vm3, %v3448_v58 }
 0x6a8   : > { %v6855_v12 = vpop.permute.xlu1 %3429 }
 0x6aa   : > { %5729 = vmatpush3.xpose.msk.msra.mxu0 %vm2354_vm3, %v3448_v58 }
 0x6ab   : > { %5730 = vmatprep.subr.msk.mxu0 %vm2354_vm3, %v3446_v60 }
 0x6ac   : > { %v6862_v38 = vpop.permute.xlu1 %3433 }
 0x6ae   : > { %5731 = vmatpush3.xpose.msk.msra.mxu0 %vm2354_vm3, %v3446_v60 }
 0x6af   : > { %5732 = vmatprep.subr.msk.mxu0 %vm2354_vm3, %v3444_v51 }
 0x6b0   : > { %v6871_v59 = vpop.permute.xlu1 %3437 }
 0x6b2   : > { %5733 = vmatpush3.xpose.msk.msra.mxu0 %vm2354_vm3, %v3444_v51 }
 0x6b5   : > { %v3042_v23 = vpop.xlane.xlu0 %3041  ;;  %5735 = vmatmul.mubr.msk.f32.vlgmr.msra.gmra.mxu0 %vm2354_vm3, %v6855_v12 }
 0x6b6   : > { %v3064_v40 = vsub.f32 %v6761_v15, %v3042_v23  ;;  %5737 = vmatprep.mubr.msk.f32.mxu0 %vm2354_vm3, %v6847_v8  ;;  %v6880_v15 = vpop.permute.xlu1 %3441 }
 0x6b8   : > { %v3072_v34 = vmul.f32 1.442695, %v3064_v40 }
 0x6b9   : > { %v3048_v26 = vpop.xlane.xlu0 %3047  ;;  %5738 = vmatmul.mubr.msk.f32.gmra.mxu0 %vm2354_vm3, %v6862_v38 }
 0x6ba   : > { %5954 = vpow2.f32 %v3072_v34  ;;  %v3066_v42 = vsub.f32 %v6771_v37, %v3048_v26  ;;  %5740 = vmatprep.mubr.msk.f32.mxu0 %vm2354_vm3, %v6852_v16 }
 0x6bc   : > { %v3076_v54 = vmul.f32 1.442695, %v3066_v42 }
 0x6bd   : > { %5741 = vmatmul.mubr.msk.f32.gmra.mxu0 %vm2354_vm3, %v6871_v59  ;;  %v3051_v60 = vpop.xlane.xlu0 %3050 }
 0x6be   : > { %5956 = vpow2.f32 %v3076_v54  ;;  %5743 = vmatprep.mubr.msk.f32.mxu0 %vm2354_vm3, %v6859_v52  ;;  %v3067_v6 = vsub.f32 %v6765_v32, %v3051_v60 }
 0x6c0   : > { %v3078_v56 = vmul.f32 1.442695, %v3067_v6 }
 0x6c1   : > { %5744 = vmatmul.mubr.msk.f32.gmra.mxu0 %vm2354_vm3, %v6880_v15  ;;  %v3057_v0 = vpop.xlane.xlu0 %3056 }
 0x6c2   : > { %v3069_v55 = vsub.f32 %v6777_v18, %v3057_v0 }
 0x6c4   : > { %v3082_v29 = vmul.f32 1.442695, %v3069_v55 }
 0x6c5   : > { %v3063_v10 = vpop.xlane.xlu0 %3062 }
 0x6c6   : > { %v3071_v17 = vsub.f32 %v6789_v41, %v3063_v10 }
 0x6c7   : > { %v6884_v30 = vpop.eup %5954 }
 0x6c8   : > { %v3088_v37 = vsel %vm572_vm1, %v6884_v30, 0.0 }
 0x6c9   : > { %3089 = vadd.xlane.f32.xlu1 %v3088_v37 }
 0x6cb   : > { %v6888_v33 = vpop.eup %5956 }
 0x6cc   : > { %v3094_v53 = vsel %vm572_vm1, %v6888_v33, 0.0 }
 0x6cd   : > { %3095 = vadd.xlane.f32.xlu1 %v3094_v53 }
 0x6e5   : > { %v3045_v7 = vpop.xlane.xlu1 %3044 }
 0x6e6   : > { %v3065_v9 = vsub.f32 %v6757_v14, %v3045_v7  ;;  %v3086_v14 = vmul.f32 1.442695, %v3071_v17  ;;  %v3141_v7 = vpop.permute.xlu0 %3140 }
 0x6e8   : > { %v3074_v13 = vmul.f32 1.442695, %v3065_v9 }
 0x6e9   : > { %v3054_v11 = vpop.xlane.xlu1 %3053 }
 0x6ea   : > { %5958 = vpow2.f32 %v3074_v13  ;;  %v3068_v31 = vsub.f32 %v6783_v27, %v3054_v11 }
 0x6eb   : > { %5960 = vpow2.f32 %v3078_v56 }
 0x6ec   : > { %v3080_v35 = vmul.f32 1.442695, %v3068_v31 }
 0x6ed   : > { %v3060_v20 = vpop.xlane.xlu1 %3059 }
 0x6ee   : > { %5962 = vpow2.f32 %v3080_v35  ;;  %v3070_v32 = vsub.f32 %v6804_v44, %v3060_v20 }
 0x6ef   : > { %5964 = vpow2.f32 %v3082_v29  ;;  %v3135_v29 = vpop.permute.xlu0 %3134 }
 0x6f0   : > { %v3084_v46 = vmul.f32 1.442695, %v3070_v32 }
 0x6f1   : > { %v3143_v61 = vpop.permute.xlu1 %3142 }
 0x6f2   : > { %5966 = vpow2.f32 %v3084_v46  ;;  %5676 = vmatprep.subr.mxu1 %v3143_v61 }
 0x6f3   : > { %5968 = vpow2.f32 %v3086_v14 }
 0x6f5   : > { %v3139_v40 = vpop.permute.xlu1 %3138 }
 0x6f7   : > { %v6898_v18 = vpop.eup %5958 }
 0x6f8   : > { %v3091_v27 = vsel %vm572_vm1, %v6898_v18, 0.0  ;;  %v6902_v19 = vpop.eup %5960 }
 0x6f9   : > { %3092 = vadd.xlane.f32.xlu0 %v3091_v27  ;;  %v3097_v43 = vsel %vm572_vm1, %v6902_v19, 0.0  ;;  %v3137_v34 = vpop.permute.xlu1 %3136 }
 0x6fb   : > { %v6904_v41 = vpop.eup %5962 }
 0x6fc   : > { %v3100_v44 = vsel %vm572_vm1, %v6904_v41, 0.0  ;;  %v6910_v49 = vpop.eup %5964 }
 0x6fd   : > { %3101 = vadd.xlane.f32.xlu1 %v3100_v44  ;;  %3098 = vadd.xlane.f32.xlu0 %v3097_v43  ;;  %v3103_v58 = vsel %vm572_vm1, %v6910_v49, 0.0  ;;  %v3133_v26 = vpop.permute.xlu1 %3132 }
 0x6ff   : > { %v6912_v36 = vpop.eup %5966 }
 0x700   : > { %v3106_v1 = vsel %vm572_vm1, %v6912_v36, 0.0  ;;  %v6918_v51 = vpop.eup %5968 }
 0x701   : > { %3107 = vadd.xlane.f32.xlu1 %v3106_v1  ;;  %3104 = vadd.xlane.f32.xlu0 %v3103_v58  ;;  %v3109_v23 = vsel %vm572_vm1, %v6918_v51, 0.0 }
 0x705   : > { %3110 = vadd.xlane.f32.xlu0 %v3109_v23 }
 0x712   : > { %3128 = vrot.lane.b32.xlu1 %v6556_v39, %s6097_s20 }
 0x716   : > { %4011 = vrot.lane.b32.xlu1 %v6574_v50, %s6098_s24 }
 0x71a   : > { %4007 = vrot.lane.b32.xlu1 %v6565_v25, %s6098_s24 }
 0x71b   : > { %3130 = vrot.lane.b32.xlu0 %v6582_v22, %s6097_s20  ;;  %s374_s20 = scalar_lea.vmem %s7410_s10, %s4872_s23 }
 0x71e   : > { %4003 = vrot.lane.b32.xlu1 %v6572_v24, %s6098_s24 }
 0x71f   : > { %4013 = vrot.lane.b32.xlu0 %v6567_v28, %s6098_s24 }
 0x722   : > { %3999 = vrot.lane.b32.xlu1 %v6556_v39, %s6098_s24 }
 0x723   : > { %4009 = vrot.lane.b32.xlu0 %v6561_v21, %s6098_s24 }
 0x726   : > { %3985 = vrot.lane.b32.xlu1 %v6582_v22, %s6099_s25 }
 0x727   : > { %4005 = vrot.lane.b32.xlu0 %v6578_v45, %s6098_s24 }
 0x72a   : > { %3989 = vrot.lane.b32.xlu1 %v6578_v45, %s6099_s25 }
 0x72b   : > { %4001 = vrot.lane.b32.xlu0 %v6582_v22, %s6098_s24 }
 0x72e   : > { %3993 = vrot.lane.b32.xlu1 %v6561_v21, %s6099_s25 }
 0x72f   : > { %3983 = vrot.lane.b32.xlu0 %v6556_v39, %s6099_s25 }
 0x732   : > { %3997 = vrot.lane.b32.xlu1 %v6567_v28, %s6099_s25 }
 0x733   : > { %3987 = vrot.lane.b32.xlu0 %v6572_v24, %s6099_s25 }
 0x737   : > { %3991 = vrot.lane.b32.xlu0 %v6565_v25, %s6099_s25 }
 0x73b   : > { %3995 = vrot.lane.b32.xlu0 %v6574_v50, %s6099_s25 }
 0x752   : > { %v3090_v42 = vpop.xlane.xlu1 %3089 }
 0x753   : > { %5970 = vrcp.f32 %v3090_v42 }
 0x756   : > { %v3096_v42 = vpop.xlane.xlu1 %3095 }
 0x757   : > { %v5624_v54 = vpop.f32.mrf.mxu1 }
 0x758   : > { %v2700_v60 = vadd.f32 %v5624_v54, %v6582_v22 }
 0x759   : > { %v2694_v37 = vpop.f32.mrf.mxu1 }
 0x75a   : > { %v2695_v53 = vadd.f32 %v2694_v37, %v6556_v39 }
 0x75b   : > { %v5627_v0 = vpop.f32.mrf.mxu1 }
 0x75c   : > { %5636 = vmatprep.mubr.msk.f32.mxu1 %vm2354_vm3, %v2695_v53  ;;  %v2710_v56 = vadd.f32 %v5627_v0, %v6578_v45 }
 0x75d   : > { %v2704_v6 = vpop.f32.mrf.mxu1  ;;  %5637 = vmatmul.mubr.msk.f32.vlgmr.msra.gmra.mxu1 %vm2354_vm3, %v2700_v60 }
 0x75e   : > { %v2705_v9 = vadd.f32 %v2704_v6, %v6572_v24  ;;  %5677 = vmatpush3.msra.mxu1 %v3143_v61 }
 0x75f   : > { %5678 = vmatprep.subr.mxu1 %v3141_v7  ;;  %v5630_v55 = vpop.f32.mrf.mxu1 }
 0x760   : > { %5679 = vmatpush3.msra.mxu1 %v3141_v7  ;;  %5639 = vmatprep.mubr.msk.f32.mxu1 %vm2354_vm3, %v2705_v9  ;;  %v2720_v11 = vadd.f32 %v5630_v55, %v6561_v21  ;;  %v5971_v17 = vpop.eup %5970 }
 0x761   : > { %5680 = vmatprep.subr.mxu1 %v3139_v40  ;;  %v2714_v13 = vpop.f32.mrf.mxu1  ;;  %5640 = vmatmul.mubr.msk.f32.gmra.mxu1 %vm2354_vm3, %v2710_v56  ;;  %v3120_v14 = vmul.f32 %v5971_v17, %v6884_v30 }
 0x762   : > { %v2715_v10 = vadd.f32 %v2714_v13, %v6565_v25  ;;  %5681 = vmatpush3.msra.mxu1 %v3139_v40 }
 0x763   : > { %5682 = vmatprep.subr.mxu1 %v3137_v34  ;;  %v5633_v31 = vpop.f32.mrf.mxu1 }
 0x764   : > { %5683 = vmatpush3.msra.mxu1 %v3137_v34  ;;  %5642 = vmatprep.mubr.msk.f32.mxu1 %vm2354_vm3, %v2715_v10  ;;  %v2730_v32 = vadd.f32 %v5633_v31, %v6567_v28 }
 0x765   : > { %5684 = vmatprep.subr.mxu1 %v3135_v29  ;;  %v2724_v35 = vpop.f32.mrf.mxu1  ;;  %5643 = vmatmul.mubr.msk.f32.gmra.mxu1 %vm2354_vm3, %v2720_v11 }
 0x766   : > { %v2725_v20 = vadd.f32 %v2724_v35, %v6574_v50  ;;  %5685 = vmatpush3.msra.mxu1 %v3135_v29 }
 0x767   : > { %5686 = vmatprep.subr.mxu1 %v3133_v26 }
 0x768   : > { %5687 = vmatpush3.msra.mxu1 %v3133_v26  ;;  %5645 = vmatprep.mubr.msk.f32.mxu1 %vm2354_vm3, %v2725_v20 }
 0x769   : > { %5646 = vmatmul.mubr.msk.f32.gmra.mxu1 %vm2354_vm3, %v2730_v32  ;;  %v3289_v32 = vld [vmem:[%s7408_s8 + $0x8] sm:$0xff] }
 0x76a   : > { %5692 = vmatprep.mubr.msk.f32.mxu1 %vm572_vm1, %v3120_v14 }
 0x775   : > { %v6960_v46 = vpop.f32.mrf.mxu0 }
 0x776   : > { %v3599_v61 = vsel %vm572_vm1, %v6960_v46, -inf }
 0x777   : > { %v6964_v27 = vpop.f32.mrf.mxu0  ;;  %3600 = vmax.xlane.f32.xlu1 %v3599_v61 }
 0x778   : > { %v3596_v44 = vsel %vm572_vm1, %v6964_v27, -inf }
 0x779   : > { %v6968_v43 = vpop.f32.mrf.mxu0  ;;  %3597 = vmax.xlane.f32.xlu0 %v3596_v44 }
 0x77a   : > { %v3605_v34 = vsel %vm572_vm1, %v6968_v43, -inf }
 0x77b   : > { %v6970_v1 = vpop.f32.mrf.mxu0 }
 0x77c   : > { %v3602_v30 = vsel %vm572_vm1, %v6970_v1, -inf }
 0x77d   : > { %v6974_v58 = vpop.f32.mrf.mxu0  ;;  %3603 = vmax.xlane.f32.xlu0 %v3602_v30 }
 0x77e   : > { %v3611_v60 = vsel %vm572_vm1, %v6974_v58, -inf }
 0x77f   : > { %v6976_v23 = vpop.f32.mrf.mxu0 }
 0x780   : > { %v3608_v40 = vsel %vm572_vm1, %v6976_v23, -inf }
 0x781   : > { %v6982_v26 = vpop.f32.mrf.mxu0  ;;  %3609 = vmax.xlane.f32.xlu1 %v3608_v40  ;;  %3606 = vmax.xlane.f32.xlu0 %v3605_v34 }
 0x782   : > { %v3093_v54 = vpop.xlane.xlu0 %3092  ;;  %v3617_v7 = vsel %vm572_vm1, %v6982_v26, -inf }
 0x783   : > { %v6984_v37 = vpop.f32.mrf.mxu0  ;;  %5972 = vrcp.f32 %v3093_v54 }
 0x784   : > { %v3614_v53 = vsel %vm572_vm1, %v6984_v37, -inf  ;;  %5974 = vrcp.f32 %v3096_v42 }
 0x785   : > { %3615 = vmax.xlane.f32.xlu1 %v3614_v53  ;;  %3612 = vmax.xlane.f32.xlu0 %v3611_v60 }
 0x786   : > { %v3102_v0 = vpop.xlane.xlu1 %3101  ;;  %v3099_v6 = vpop.xlane.xlu0 %3098 }
 0x787   : > { %5976 = vrcp.f32 %v3099_v6 }
 0x788   : > { %5978 = vrcp.f32 %v3102_v0 }
 0x789   : > { %3618 = vmax.xlane.f32.xlu0 %v3617_v7 }
 0x78a   : > { %v3105_v9 = vpop.xlane.xlu0 %3104  ;;  %v3108_v56 = vpop.xlane.xlu1 %3107 }
 0x78b   : > { %5980 = vrcp.f32 %v3105_v9 }
 0x78c   : > { %5982 = vrcp.f32 %v3108_v56 }
 0x78e   : > { %v3111_v55 = vpop.xlane.xlu0 %3110  ;;  %v3129_v10 = vpop.permute.xlu1 %3128 }
 0x78f   : > { %5984 = vrcp.f32 %v3111_v55 }
 0x790   : > { %v5973_v13 = vpop.eup %5972 }
 0x791   : > { %v5975_v31 = vpop.eup %5974  ;;  %v3121_v29 = vmul.f32 %v5973_v13, %v6898_v18 }
 0x792   : > { %v3131_v11 = vpop.permute.xlu0 %3130  ;;  %v3122_v20 = vmul.f32 %v5975_v31, %v6888_v33  ;;  %v4012_v18 = vpop.permute.xlu1 %4011 }
 0x793   : > { %5688 = vmatprep.subr.mxu1 %v3131_v11 }
 0x794   : > { %5689 = vmatpush3.msra.mxu1 %v3131_v11  ;;  %v5977_v17 = vpop.eup %5976 }
 0x795   : > { %5690 = vmatprep.subr.mxu1 %v3129_v10  ;;  %v5979_v14 = vpop.eup %5978  ;;  %v3123_v61 = vmul.f32 %v5977_v17, %v6902_v19 }
 0x796   : > { %3698 = vrot.lane.b32.xlu1 %v6567_v28, %s6100_s26  ;;  %5691 = vmatpush3.msra.mxu1 %v3129_v10  ;;  %v4014_v35 = vpop.permute.xlu0 %4013  ;;  %v3124_v30 = vmul.f32 %v5979_v14, %v6904_v41  ;;  %v4008_v42 = vpop.permute.xlu1 %4007 }
 0x797   : > { %5693 = vmatmul.mubr.msk.f32.vlgmr.msra.gmra.mxu1 %vm572_vm1, %v3121_v29  ;;  %5788 = vmatprep.subr.msk.mxu0 %vm2354_vm3, %v4014_v35 }
 0x798   : > { %5695 = vmatprep.mubr.msk.f32.mxu1 %vm572_vm1, %v3122_v20  ;;  %5789 = vmatpush3.xpose.msk.msra.mxu0 %vm2354_vm3, %v4014_v35  ;;  %v5981_v33 = vpop.eup %5980 }
 0x799   : > { %5790 = vmatprep.subr.msk.mxu0 %vm2354_vm3, %v4012_v18  ;;  %5704 = vmatprep.subr.mxu1 %v3289_v32  ;;  %v5983_v40 = vpop.eup %5982  ;;  %v3125_v19 = vmul.f32 %v5981_v33, %v6910_v49 }
 0x79a   : > { %3694 = vrot.lane.b32.xlu1 %v6561_v21, %s6100_s26  ;;  %v4010_v44 = vpop.permute.xlu0 %4009  ;;  %5705 = vmatpush3.msra.mxu1 %v3289_v32  ;;  %v3126_v41 = vmul.f32 %v5983_v40, %v6912_v36  ;;  %v4004_v36 = vpop.permute.xlu1 %4003 }
 0x79b   : > { %5696 = vmatmul.mubr.msk.f32.gmra.mxu1 %vm572_vm1, %v3123_v61 }
 0x79c   : > { %5698 = vmatprep.mubr.msk.f32.mxu1 %vm572_vm1, %v3124_v30  ;;  %5791 = vmatpush3.xpose.msk.msra.mxu0 %vm2354_vm3, %v4012_v18  ;;  %v5985_v34 = vpop.eup %5984 }
 0x79d   : > { %5792 = vmatprep.subr.msk.mxu0 %vm2354_vm3, %v4010_v44  ;;  %v3127_v49 = vmul.f32 %v5985_v34, %v6918_v51 }
 0x79e   : > { %3692 = vrot.lane.b32.xlu1 %v6565_v25, %s6100_s26  ;;  %v4006_v54 = vpop.permute.xlu0 %4005  ;;  %v4000_v51 = vpop.permute.xlu1 %3999 }
 0x79f   : > { %3696 = vrot.lane.b32.xlu0 %v6574_v50, %s6100_s26  ;;  %5699 = vmatmul.mubr.msk.f32.gmra.mxu1 %vm572_vm1, %v3125_v19 }
 0x7a0   : > { %5701 = vmatprep.mubr.msk.f32.mxu1 %vm572_vm1, %v3126_v41  ;;  %5793 = vmatpush3.xpose.msk.msra.mxu0 %vm2354_vm3, %v4010_v44 }
 0x7a1   : > { %5794 = vmatprep.subr.msk.mxu0 %vm2354_vm3, %v4008_v42 }
 0x7a2   : > { %3688 = vrot.lane.b32.xlu1 %v6572_v24, %s6100_s26  ;;  %v4002_v53 = vpop.permute.xlu0 %4001  ;;  %v7038_v0 = vpop.permute.xlu1 %3985 }
 0x7a3   : > { %3690 = vrot.lane.b32.xlu0 %v6578_v45, %s6100_s26  ;;  %5702 = vmatmul.mubr.msk.f32.gmra.mxu1 %vm572_vm1, %v3127_v49 }
 0x7a4   : > { %5795 = vmatpush3.xpose.msk.msra.mxu0 %vm2354_vm3, %v4008_v42 }
 0x7a5   : > { %5796 = vmatprep.subr.msk.mxu0 %vm2354_vm3, %v4006_v54 }
 0x7a6   : > { %v7030_v60 = vpop.permute.xlu0 %3983  ;;  %v7045_v7 = vpop.permute.xlu1 %3989 }
 0x7a7   : > { %5804 = vmatprep.mubr.msk.f32.mxu0 %vm2354_vm3, %v7030_v60 }
 0x7a8   : > { %5797 = vmatpush3.xpose.msk.msra.mxu0 %vm2354_vm3, %v4006_v54 }
 0x7a9   : > { %5798 = vmatprep.subr.msk.mxu0 %vm2354_vm3, %v4004_v36 }
 0x7aa   : > { %v7042_v6 = vpop.permute.xlu0 %3987  ;;  %v7055_v56 = vpop.permute.xlu1 %3993 }
 0x7ac   : > { %5799 = vmatpush3.xpose.msk.msra.mxu0 %vm2354_vm3, %v4004_v36 }
 0x7ad   : > { %5800 = vmatprep.subr.msk.mxu0 %vm2354_vm3, %v4002_v53 }
 0x7ae   : > { %v7051_v9 = vpop.permute.xlu0 %3991  ;;  %v7065_v13 = vpop.permute.xlu1 %3997 }
 0x7b0   : > { %5801 = vmatpush3.xpose.msk.msra.mxu0 %vm2354_vm3, %v4002_v53 }
 0x7b1   : > { %5802 = vmatprep.subr.msk.mxu0 %vm2354_vm3, %v4000_v51 }
 0x7b2   : > { %v7059_v55 = vpop.permute.xlu0 %3995 }
 0x7b4   : > { %5803 = vmatpush3.xpose.msk.msra.mxu0 %vm2354_vm3, %v4000_v51 }
 0x7b7   : > { %5805 = vmatmul.mubr.msk.f32.vlgmr.msra.gmra.mxu0 %vm2354_vm3, %v7038_v0 }
 0x7b8   : > { %5807 = vmatprep.mubr.msk.f32.mxu0 %vm2354_vm3, %v7042_v6 }
 0x7bb   : > { %5808 = vmatmul.mubr.msk.f32.gmra.mxu0 %vm2354_vm3, %v7045_v7 }
 0x7bc   : > { %5810 = vmatprep.mubr.msk.f32.mxu0 %vm2354_vm3, %v7051_v9 }
 0x7bf   : > { %5811 = vmatmul.mubr.msk.f32.gmra.mxu0 %vm2354_vm3, %v7055_v56 }
 0x7c0   : > { %5813 = vmatprep.mubr.msk.f32.mxu0 %vm2354_vm3, %v7059_v55 }
 0x7c3   : > { %5814 = vmatmul.mubr.msk.f32.gmra.mxu0 %vm2354_vm3, %v7065_v13 }
 0x800   : > { %v3601_v10 = vpop.xlane.xlu1 %3600 }
 0x801   : > { %v3621_v11 = vsub.f32 %v6960_v46, %v3601_v10 }
 0x802   : > { %v3598_v31 = vpop.xlane.xlu0 %3597 }
 0x803   : > { %v3630_v29 = vmul.f32 1.442695, %v3621_v11  ;;  %v3620_v17 = vsub.f32 %v6964_v27, %v3598_v31 }
 0x805   : > { %5986 = vpow2.f32 %v3630_v29  ;;  %v3628_v35 = vmul.f32 1.442695, %v3620_v17 }
 0x806   : > { %v3604_v20 = vpop.xlane.xlu0 %3603 }
 0x807   : > { %5988 = vpow2.f32 %v3628_v35  ;;  %v3622_v32 = vsub.f32 %v6970_v1, %v3604_v20 }
 0x809   : > { %v3632_v14 = vmul.f32 1.442695, %v3622_v32 }
 0x80a   : > { %v3610_v18 = vpop.xlane.xlu1 %3609  ;;  %v3607_v61 = vpop.xlane.xlu0 %3606 }
 0x80b   : > { %5990 = vpow2.f32 %v3632_v14  ;;  %v3624_v33 = vsub.f32 %v6976_v23, %v3610_v18  ;;  %v3623_v44 = vsub.f32 %v6968_v43, %v3607_v61 }
 0x80d   : > { %v3636_v30 = vmul.f32 1.442695, %v3624_v33  ;;  %v3634_v46 = vmul.f32 1.442695, %v3623_v44 }
 0x80e   : > { %v3616_v40 = vpop.xlane.xlu1 %3615  ;;  %v3613_v19 = vpop.xlane.xlu0 %3612 }
 0x80f   : > { %5992 = vpow2.f32 %v3636_v30  ;;  %v3626_v27 = vsub.f32 %v6984_v37, %v3616_v40  ;;  %v3625_v34 = vsub.f32 %v6974_v58, %v3613_v19 }
 0x810   : > { %5994 = vpow2.f32 %v3634_v46 }
 0x811   : > { %v3640_v42 = vmul.f32 1.442695, %v3626_v27  ;;  %v3638_v1 = vmul.f32 1.442695, %v3625_v34 }
 0x812   : > { %v7076_v54 = vpop.eup %5986  ;;  %v3699_v41 = vpop.permute.xlu1 %3698 }
 0x813   : > { %v3619_v49 = vpop.xlane.xlu0 %3618  ;;  %5996 = vpow2.f32 %v3640_v42  ;;  %5746 = vmatprep.subr.mxu1 %v3699_v41  ;;  %v3647_v43 = vsel %vm572_vm1, %v7076_v54, 0.0 }
 0x814   : > { %v3627_v23 = vsub.f32 %v6982_v26, %v3619_v49  ;;  %v7081_v53 = vpop.eup %5988  ;;  %5998 = vpow2.f32 %v3638_v1  ;;  %3648 = vadd.xlane.f32.xlu0 %v3647_v43 }
 0x815   : > { %v3644_v58 = vsel %vm572_vm1, %v7081_v53, 0.0 }
 0x816   : > { %v3642_v37 = vmul.f32 1.442695, %v3627_v23  ;;  %3645 = vadd.xlane.f32.xlu1 %v3644_v58  ;;  %v3695_v42 = vpop.permute.xlu1 %3694 }
 0x818   : > { %6000 = vpow2.f32 %v3642_v37  ;;  %v7085_v36 = vpop.eup %5990  ;;  %v3697_v37 = vpop.permute.xlu0 %3696 }
 0x819   : > { %v3650_v51 = vsel %vm572_vm1, %v7085_v36, 0.0 }
 0x81a   : > { %3651 = vadd.xlane.f32.xlu1 %v3650_v51 }
 0x81c   : > { %v7089_v26 = vpop.eup %5992 }
 0x81d   : > { %v7091_v10 = vpop.eup %5994  ;;  %v3656_v11 = vsel %vm572_vm1, %v7089_v26, 0.0  ;;  %v7111_v18 = vpop.f32.mrf.mxu1 }
 0x81e   : > { %3657 = vadd.xlane.f32.xlu1 %v3656_v11  ;;  %v3653_v31 = vsel %vm572_vm1, %v7091_v10, 0.0 }
 0x81f   : > { %3654 = vadd.xlane.f32.xlu0 %v3653_v31  ;;  %v7113_v61 = vpop.f32.mrf.mxu1  ;;  %v3693_v31 = vpop.permute.xlu1 %3692 }
 0x820   : > { %v7097_v29 = vpop.eup %5996 }
 0x821   : > { %v7099_v17 = vpop.eup %5998  ;;  %v3662_v35 = vsel %vm572_vm1, %v7097_v29, 0.0  ;;  %v7117_v33 = vpop.f32.mrf.mxu1 }
 0x822   : > { %3663 = vadd.xlane.f32.xlu1 %v3662_v35  ;;  %v3659_v20 = vsel %vm572_vm1, %v7099_v17, 0.0 }
 0x823   : > { %3660 = vadd.xlane.f32.xlu0 %v3659_v20  ;;  %v7119_v44 = vpop.f32.mrf.mxu1  ;;  %v3689_v20 = vpop.permute.xlu1 %3688 }
 0x825   : > { %v7105_v32 = vpop.eup %6000  ;;  %v7121_v30 = vpop.f32.mrf.mxu1 }
 0x826   : > { %v3665_v14 = vsel %vm572_vm1, %v7105_v32, 0.0 }
 0x827   : > { %3666 = vadd.xlane.f32.xlu0 %v3665_v14  ;;  %v7123_v46 = vpop.f32.mrf.mxu1 }
 0x829   : > { %v7125_v40 = vpop.f32.mrf.mxu1 }
 0x82b   : > { %v7127_v19 = vpop.f32.mrf.mxu1 }
 0x833   : > { %3684 = vrot.lane.b32.xlu1 %v6556_v39, %s6100_s26 }
 0x83d   : > { %3686 = vrot.lane.b32.xlu0 %v6582_v22, %s6100_s26 }
 0x857   : > { %v5694_v27 = vpop.f32.mrf.mxu1 }
 0x858   : > { %v3256_v49 = vadd.f32 %v5694_v27, %v6614_v48 }
 0x859   : > { %v3250_v34 = vpop.f32.mrf.mxu1 }
 0x85a   : > { %v3251_v1 = vadd.f32 %v3250_v34, %v6642_v57 }
 0x85b   : > { %v5697_v23 = vpop.f32.mrf.mxu1 }
 0x85c   : > { %5706 = vmatprep.mubr.msk.f32.mxu1 %vm2354_vm3, %v3251_v1  ;;  %v3266_v51 = vadd.f32 %v5697_v23, %v6618_v47 }
 0x85d   : > { %v3260_v43 = vpop.f32.mrf.mxu1  ;;  %5707 = vmatmul.mubr.msk.f32.vlgmr.msra.gmra.mxu1 %vm2354_vm3, %v3256_v49 }
 0x85e   : > { %v3261_v58 = vadd.f32 %v3260_v43, %v6656_v2  ;;  %5747 = vmatpush3.msra.mxu1 %v3699_v41  ;;  %v3691_v41 = vpop.permute.xlu0 %3690 }
 0x85f   : > { %5748 = vmatprep.subr.mxu1 %v3697_v37  ;;  %v5700_v11 = vpop.f32.mrf.mxu1 }
 0x860   : > { %5749 = vmatpush3.msra.mxu1 %v3697_v37  ;;  %5709 = vmatprep.mubr.msk.f32.mxu1 %vm2354_vm3, %v3261_v58  ;;  %v3276_v35 = vadd.f32 %v5700_v11, %v6622_v63 }
 0x861   : > { %5750 = vmatprep.subr.mxu1 %v3695_v42  ;;  %v3270_v48 = vpop.f32.mrf.mxu1  ;;  %5710 = vmatmul.mubr.msk.f32.gmra.mxu1 %vm2354_vm3, %v3266_v51 }
 0x862   : > { %v3271_v57 = vadd.f32 %v3270_v48, %v6663_v3  ;;  %5751 = vmatpush3.msra.mxu1 %v3695_v42 }
 0x863   : > { %5752 = vmatprep.subr.mxu1 %v3693_v31  ;;  %v5703_v2 = vpop.f32.mrf.mxu1 }
 0x864   : > { %5753 = vmatpush3.msra.mxu1 %v3693_v31  ;;  %5712 = vmatprep.mubr.msk.f32.mxu1 %vm2354_vm3, %v3271_v57  ;;  %v3286_v27 = vadd.f32 %v5703_v2, %v6675_v5 }
 0x865   : > { %5754 = vmatprep.subr.mxu1 %v3691_v41  ;;  %v3280_v47 = vpop.f32.mrf.mxu1  ;;  %5713 = vmatmul.mubr.msk.f32.gmra.mxu1 %vm2354_vm3, %v3276_v35 }
 0x866   : > { %v3281_v14 = vadd.f32 %v3280_v47, %v6669_v4  ;;  %5755 = vmatpush3.msra.mxu1 %v3691_v41 }
 0x867   : > { %5756 = vmatprep.subr.mxu1 %v3689_v20 }
 0x868   : > { %5757 = vmatpush3.msra.mxu1 %v3689_v20  ;;  %5715 = vmatprep.mubr.msk.f32.mxu1 %vm2354_vm3, %v3281_v14 }
 0x869   : > { %5716 = vmatmul.mubr.msk.f32.gmra.mxu1 %vm2354_vm3, %v3286_v27 }
 0x877   : > { %v7145_v63 = vpop.f32.mrf.mxu0 }
 0x878   : > { %v4155_v3 = vsel %vm572_vm1, %v7145_v63, -inf }
 0x879   : > { %v7149_v34 = vpop.f32.mrf.mxu0  ;;  %4156 = vmax.xlane.f32.xlu1 %v4155_v3  ;;  %v3845_v3 = vld [vmem:[%s7408_s8 + $0x10] sm:$0xff] }
 0x87a   : > { %v4152_v4 = vsel %vm572_vm1, %v7149_v34, -inf }
 0x87b   : > { %v7153_v42 = vpop.f32.mrf.mxu0  ;;  %4153 = vmax.xlane.f32.xlu0 %v4152_v4 }
 0x87c   : > { %v4161_v37 = vsel %vm572_vm1, %v7153_v42, -inf }
 0x87d   : > { %v7155_v5 = vpop.f32.mrf.mxu0 }
 0x87e   : > { %v4158_v1 = vsel %vm572_vm1, %v7155_v5, -inf }
 0x87f   : > { %v7159_v49 = vpop.f32.mrf.mxu0  ;;  %4159 = vmax.xlane.f32.xlu0 %v4158_v1 }
 0x880   : > { %v4167_v31 = vsel %vm572_vm1, %v7159_v49, -inf }
 0x881   : > { %v7161_v23 = vpop.f32.mrf.mxu0 }
 0x882   : > { %v4164_v43 = vsel %vm572_vm1, %v7161_v23, -inf }
 0x883   : > { %v7167_v58 = vpop.f32.mrf.mxu0  ;;  %4165 = vmax.xlane.f32.xlu1 %v4164_v43  ;;  %4162 = vmax.xlane.f32.xlu0 %v4161_v37 }
 0x884   : > { %v4173_v48 = vsel %vm572_vm1, %v7167_v58, -inf }
 0x885   : > { %v7169_v51 = vpop.f32.mrf.mxu0 }
 0x886   : > { %v4170_v11 = vsel %vm572_vm1, %v7169_v51, -inf }
 0x887   : > { %4171 = vmax.xlane.f32.xlu1 %v4170_v11  ;;  %4168 = vmax.xlane.f32.xlu0 %v4167_v31 }
 0x88b   : > { %4174 = vmax.xlane.f32.xlu0 %v4173_v48 }
 0x898   : > { %4254 = vrot.lane.b32.xlu1 %v6567_v28, %s6101_s29 }
 0x89c   : > { %4250 = vrot.lane.b32.xlu1 %v6561_v21, %s6101_s29 }
 0x89d   : > { %v3649_v2 = vpop.xlane.xlu0 %3648 }
 0x89f   : > { %v3646_v57 = vpop.xlane.xlu1 %3645 }
 0x8a0   : > { %6002 = vrcp.f32 %v3646_v57  ;;  %4248 = vrot.lane.b32.xlu1 %v6565_v25, %s6101_s29 }
 0x8a1   : > { %4252 = vrot.lane.b32.xlu0 %v6574_v50, %s6101_s29  ;;  %6004 = vrcp.f32 %v3649_v2 }
 0x8a3   : > { %v3652_v35 = vpop.xlane.xlu1 %3651 }
 0x8a4   : > { %4244 = vrot.lane.b32.xlu1 %v6572_v24, %s6101_s29  ;;  %6006 = vrcp.f32 %v3652_v35 }
 0x8a5   : > { %4246 = vrot.lane.b32.xlu0 %v6578_v45, %s6101_s29 }
 0x8a7   : > { %v3658_v28 = vpop.xlane.xlu1 %3657 }
 0x8a8   : > { %v3655_v21 = vpop.xlane.xlu0 %3654 }
 0x8a9   : > { %6008 = vrcp.f32 %v3655_v21 }
 0x8aa   : > { %6010 = vrcp.f32 %v3658_v28 }
 0x8ab   : > { %v3664_v25 = vpop.xlane.xlu1 %3663 }
 0x8ac   : > { %v3661_v41 = vpop.xlane.xlu0 %3660 }
 0x8ad   : > { %v6003_v47 = vpop.eup %6002  ;;  %6012 = vrcp.f32 %v3661_v41 }
 0x8ae   : > { %v3676_v20 = vmul.f32 %v6003_v47, %v7081_v53  ;;  %6014 = vrcp.f32 %v3664_v25  ;;  %v6005_v24 = vpop.eup %6004 }
 0x8af   : > { %v3685_v27 = vpop.permute.xlu1 %3684  ;;  %v3677_v4 = vmul.f32 %v6005_v24, %v7076_v54 }
 0x8b0   : > { %v3667_v50 = vpop.xlane.xlu0 %3666  ;;  %5762 = vmatprep.mubr.msk.f32.mxu1 %vm572_vm1, %v3676_v20 }
 0x8b1   : > { %6016 = vrcp.f32 %v3667_v50  ;;  %v6007_v45 = vpop.eup %6006 }
 0x8b2   : > { %v3678_v1 = vmul.f32 %v6007_v45, %v7085_v36 }
 0x8b4   : > { %v3687_v14 = vpop.permute.xlu0 %3686 }
 0x8b5   : > { %5758 = vmatprep.subr.mxu1 %v3687_v14 }
 0x8b6   : > { %5759 = vmatpush3.msra.mxu1 %v3687_v14  ;;  %v6009_v53 = vpop.eup %6008 }
 0x8b7   : > { %5760 = vmatprep.subr.mxu1 %v3685_v27  ;;  %v6011_v43 = vpop.eup %6010  ;;  %v3679_v37 = vmul.f32 %v6009_v53, %v7091_v10 }
 0x8b8   : > { %5761 = vmatpush3.msra.mxu1 %v3685_v27  ;;  %v3680_v31 = vmul.f32 %v6011_v43, %v7089_v26 }
 0x8b9   : > { %5763 = vmatmul.mubr.msk.f32.vlgmr.msra.gmra.mxu1 %vm572_vm1, %v3677_v4  ;;  %5774 = vmatprep.subr.mxu1 %v3845_v3 }
 0x8ba   : > { %5765 = vmatprep.mubr.msk.f32.mxu1 %vm572_vm1, %v3678_v1  ;;  %5775 = vmatpush3.msra.mxu1 %v3845_v3  ;;  %v6013_v11 = vpop.eup %6012 }
 0x8bb   : > { %v6015_v48 = vpop.eup %6014  ;;  %v3681_v54 = vmul.f32 %v6013_v11, %v7099_v17  ;;  %v7236_v11 = vld [vmem:[%s7409_s9] ss:$0 sm:$0xff] }
 0x8bc   : > { %v3682_v57 = vmul.f32 %v6015_v48, %v7097_v29 }
 0x8bd   : > { %5766 = vmatmul.mubr.msk.f32.gmra.mxu1 %vm572_vm1, %v3679_v37 }
 0x8be   : > { %5768 = vmatprep.mubr.msk.f32.mxu1 %vm572_vm1, %v3680_v31  ;;  %v6017_v36 = vpop.eup %6016 }
 0x8bf   : > { %v3683_v35 = vmul.f32 %v6017_v36, %v7105_v32 }
 0x8c1   : > { %5769 = vmatmul.mubr.msk.f32.gmra.mxu1 %vm572_vm1, %v3681_v54  ;;  %v2864_v54 = vadd.f32 %v7111_v18, %v7236_v11 }
 0x8c2   : > { %5771 = vmatprep.mubr.msk.f32.mxu1 %vm572_vm1, %v3682_v57 }
 0x8c5   : > { %5772 = vmatmul.mubr.msk.f32.gmra.mxu1 %vm572_vm1, %v3683_v35 }
 0x902   : > { %v4157_v10 = vpop.xlane.xlu1 %4156 }
 0x903   : > { %v4177_v26 = vsub.f32 %v7145_v63, %v4157_v10  ;;  %v2863_v10 = vadd.f32 %v7236_v11, %v7113_v61 }
 0x904   : > { %v4154_v2 = vpop.xlane.xlu0 %4153 }
 0x905   : > { %v4186_v28 = vmul.f32 1.442695, %v4177_v26  ;;  %v4176_v21 = vsub.f32 %v7149_v34, %v4154_v2 }
 0x907   : > { %6018 = vpow2.f32 %v4186_v28  ;;  %v4184_v17 = vmul.f32 1.442695, %v4176_v21 }
 0x908   : > { %v4160_v41 = vpop.xlane.xlu0 %4159 }
 0x909   : > { %6020 = vpow2.f32 %v4184_v17  ;;  %v4178_v29 = vsub.f32 %v7155_v5, %v4160_v41  ;;  %v2866_v17 = vadd.f32 %v7117_v33, %v7236_v11 }
 0x90b   : > { %v4188_v47 = vmul.f32 1.442695, %v4178_v29 }
 0x90c   : > { %v4166_v25 = vpop.xlane.xlu1 %4165  ;;  %v4163_v20 = vpop.xlane.xlu0 %4162 }
 0x90d   : > { %6022 = vpow2.f32 %v4188_v47  ;;  %v4180_v32 = vsub.f32 %v7161_v23, %v4166_v25  ;;  %v4179_v50 = vsub.f32 %v7153_v42, %v4163_v20  ;;  %v2865_v20 = vadd.f32 %v7236_v11, %v7119_v44 }
 0x90f   : > { %v4192_v24 = vmul.f32 1.442695, %v4180_v32  ;;  %v4190_v63 = vmul.f32 1.442695, %v4179_v50 }
 0x910   : > { %v4172_v14 = vpop.xlane.xlu1 %4171  ;;  %v4169_v45 = vpop.xlane.xlu0 %4168 }
 0x911   : > { %6024 = vpow2.f32 %v4192_v24  ;;  %v4182_v34 = vsub.f32 %v7169_v51, %v4172_v14  ;;  %v4181_v27 = vsub.f32 %v7159_v49, %v4169_v45 }
 0x912   : > { %6026 = vpow2.f32 %v4190_v63  ;;  %v2868_v63 = vadd.f32 %v7121_v30, %v7236_v11  ;;  %v2870_v30 = vadd.f32 %v7125_v40, %v7236_v11 }
 0x913   : > { %v4196_v3 = vmul.f32 1.442695, %v4182_v34  ;;  %v4194_v5 = vmul.f32 1.442695, %v4181_v27  ;;  %v2867_v27 = vadd.f32 %v7236_v11, %v7123_v46 }
 0x914   : > { %v7215_v4 = vpop.eup %6018  ;;  %v7217_v53 = vpop.permute.xlu1 %4254 }
 0x915   : > { %v4175_v1 = vpop.xlane.xlu0 %4174  ;;  %6028 = vpow2.f32 %v4196_v3  ;;  %5816 = vmatprep.subr.mxu0 %v7217_v53  ;;  %5858 = vmatprep.subr.mxu1 %v7217_v53  ;;  %v4203_v23 = vsel %vm572_vm1, %v7215_v4, 0.0 }
 0x916   : > { %v4183_v42 = vsub.f32 %v7167_v58, %v4175_v1  ;;  %v7224_v51 = vpop.eup %6020  ;;  %6030 = vpow2.f32 %v4194_v5  ;;  %5817 = vmatpush3.msra.mxu0 %v7217_v53  ;;  %4204 = vadd.xlane.f32.xlu0 %v4203_v23 }
 0x917   : > { %v4200_v43 = vsel %vm572_vm1, %v7224_v51, 0.0 }
 0x918   : > { %v4198_v49 = vmul.f32 1.442695, %v4183_v42  ;;  %v7229_v37 = vpop.permute.xlu1 %4250  ;;  %4201 = vadd.xlane.f32.xlu1 %v4200_v43 }
 0x919   : > { %v7231_v58 = vpop.permute.xlu0 %4252 }
 0x91a   : > { %6032 = vpow2.f32 %v4198_v49  ;;  %5818 = vmatprep.subr.mxu0 %v7231_v58  ;;  %v7239_v31 = vpop.eup %6022 }
 0x91b   : > { %5819 = vmatpush3.msra.mxu0 %v7231_v58  ;;  %v4206_v48 = vsel %vm572_vm1, %v7239_v31, 0.0 }
 0x91c   : > { %5820 = vmatprep.subr.mxu0 %v7229_v37  ;;  %v7247_v36 = vpop.permute.xlu1 %4248  ;;  %4207 = vadd.xlane.f32.xlu1 %v4206_v48 }
 0x91d   : > { %5821 = vmatpush3.msra.mxu0 %v7229_v37  ;;  %v5708_v57 = vpop.f32.mrf.mxu1  ;;  %v7255_v26 = vpop.permute.xlu0 %4246 }
 0x91e   : > { %5822 = vmatprep.subr.mxu0 %v7247_v36  ;;  %v7251_v35 = vpop.eup %6024  ;;  %v7257_v2 = vadd.f32 %v5708_v57, %v2864_v54 }
 0x91f   : > { %5823 = vmatpush3.msra.mxu0 %v7247_v36  ;;  %v7260_v18 = vpop.eup %6026  ;;  %v3380_v28 = vpop.f32.mrf.mxu1  ;;  %v4212_v21 = vsel %vm572_vm1, %v7251_v35, 0.0 }
 0x920   : > { %5824 = vmatprep.subr.mxu0 %v7255_v26  ;;  %v7267_v41 = vadd.f32 %v3380_v28, %v2863_v10  ;;  %v7269_v61 = vpop.permute.xlu1 %4244  ;;  %4213 = vadd.xlane.f32.xlu1 %v4212_v21  ;;  %v4209_v29 = vsel %vm572_vm1, %v7260_v18, 0.0 }
 0x921   : > { %5825 = vmatpush3.msra.mxu0 %v7255_v26  ;;  %4210 = vadd.xlane.f32.xlu0 %v4209_v29  ;;  %v5711_v47 = vpop.f32.mrf.mxu1 }
 0x922   : > { %5826 = vmatprep.subr.mxu0 %v7269_v61  ;;  %v7275_v25 = vpop.eup %6028  ;;  %v7279_v33 = vadd.f32 %v5711_v47, %v2866_v17 }
 0x923   : > { %5827 = vmatpush3.msra.mxu0 %v7269_v61  ;;  %v7282_v32 = vpop.eup %6030  ;;  %v3390_v50 = vpop.f32.mrf.mxu1  ;;  %v4218_v24 = vsel %vm572_vm1, %v7275_v25, 0.0 }
 0x924   : > { %v7288_v14 = vadd.f32 %v3390_v50, %v2865_v20  ;;  %4219 = vadd.xlane.f32.xlu1 %v4218_v24  ;;  %v4215_v45 = vsel %vm572_vm1, %v7282_v32, 0.0 }
 0x925   : > { %4216 = vadd.xlane.f32.xlu0 %v4215_v45  ;;  %v5714_v44 = vpop.f32.mrf.mxu1 }
 0x926   : > { %v7296_v3 = vadd.f32 %v5714_v44, %v2868_v63 }
 0x927   : > { %v7292_v34 = vpop.eup %6032  ;;  %v3400_v5 = vpop.f32.mrf.mxu1 }
 0x928   : > { %v4221_v1 = vsel %vm572_vm1, %v7292_v34, 0.0  ;;  %v7302_v42 = vadd.f32 %v3400_v5, %v2867_v27 }
 0x929   : > { %4222 = vadd.xlane.f32.xlu0 %v4221_v1  ;;  %v5717_v23 = vpop.f32.mrf.mxu1 }
 0x92a   : > { %v7304_v49 = vadd.f32 %v5717_v23, %v2870_v30  ;;  %v4401_v23 = vld [vmem:[%s7408_s8 + $0x18] sm:$0xff] }
 0x92b   : > { %v7310_v46 = vpop.f32.mrf.mxu1 }
 0x935   : > { %4240 = vrot.lane.b32.xlu1 %v6556_v39, %s6101_s29 }
 0x93f   : > { %4242 = vrot.lane.b32.xlu0 %v6582_v22, %s6101_s29 }
 0x979   : > { %v5764_v43 = vpop.f32.mrf.mxu1 }
 0x97a   : > { %v3812_v40 = vadd.f32 %v5764_v43, %v6855_v12 }
 0x97b   : > { %v3806_v48 = vpop.f32.mrf.mxu1 }
 0x97c   : > { %v3807_v54 = vadd.f32 %v3806_v48, %v6813_v62 }
 0x97d   : > { %v5767_v57 = vpop.f32.mrf.mxu1 }
 0x97e   : > { %5776 = vmatprep.mubr.msk.f32.mxu1 %vm2354_vm3, %v3807_v54  ;;  %v3822_v39 = vadd.f32 %v5767_v57, %v6862_v38 }
 0x97f   : > { %v3816_v10 = vpop.f32.mrf.mxu1  ;;  %5777 = vmatmul.mubr.msk.f32.vlgmr.msra.gmra.mxu1 %vm2354_vm3, %v3812_v40 }
 0x980   : > { %v3817_v28 = vadd.f32 %v3816_v10, %v6847_v8  ;;  %5866 = vmatpush3.msra.mxu1 %v7217_v53 }
 0x981   : > { %5859 = vmatprep.subr.mxu1 %v7231_v58  ;;  %v5770_v22 = vpop.f32.mrf.mxu1 }
 0x982   : > { %5867 = vmatpush3.msra.mxu1 %v7231_v58  ;;  %5779 = vmatprep.mubr.msk.f32.mxu1 %vm2354_vm3, %v3817_v28  ;;  %v3832_v8 = vadd.f32 %v5770_v22, %v6871_v59  ;;  %v2869_v22 = vadd.f32 %v7236_v11, %v7127_v19 }
 0x983   : > { %5860 = vmatprep.subr.mxu1 %v7229_v37  ;;  %v3826_v62 = vpop.f32.mrf.mxu1  ;;  %5780 = vmatmul.mubr.msk.f32.gmra.mxu1 %vm2354_vm3, %v3822_v39 }
 0x984   : > { %v3827_v12 = vadd.f32 %v3826_v62, %v6852_v16  ;;  %5868 = vmatpush3.msra.mxu1 %v7229_v37 }
 0x985   : > { %5861 = vmatprep.subr.mxu1 %v7247_v36  ;;  %v5773_v38 = vpop.f32.mrf.mxu1 }
 0x986   : > { %5869 = vmatpush3.msra.mxu1 %v7247_v36  ;;  %5782 = vmatprep.mubr.msk.f32.mxu1 %vm2354_vm3, %v3827_v12  ;;  %v3842_v16 = vadd.f32 %v5773_v38, %v6880_v15 }
 0x987   : > { %5862 = vmatprep.subr.mxu1 %v7255_v26  ;;  %v3836_v53 = vpop.f32.mrf.mxu1  ;;  %5783 = vmatmul.mubr.msk.f32.gmra.mxu1 %vm2354_vm3, %v3832_v8 }
 0x988   : > { %v3837_v58 = vadd.f32 %v3836_v53, %v6859_v52  ;;  %5870 = vmatpush3.msra.mxu1 %v7255_v26 }
 0x989   : > { %5863 = vmatprep.subr.mxu1 %v7269_v61 }
 0x98a   : > { %5871 = vmatpush3.msra.mxu1 %v7269_v61  ;;  %5785 = vmatprep.mubr.msk.f32.mxu1 %vm2354_vm3, %v3837_v58 }
 0x98b   : > { %5786 = vmatmul.mubr.msk.f32.gmra.mxu1 %vm2354_vm3, %v3842_v16 }
 0x99f   : > { %v4205_v36 = vpop.xlane.xlu0 %4204 }
 0x9a1   : > { %v4202_v59 = vpop.xlane.xlu1 %4201 }
 0x9a2   : > { %6034 = vrcp.f32 %v4202_v59 }
 0x9a5   : > { %v4208_v37 = vpop.xlane.xlu1 %4207 }
 0x9a6   : > { %6036 = vrcp.f32 %v4208_v37 }
 0x9a7   : > { %6038 = vrcp.f32 %v4205_v36 }
 0x9a9   : > { %v4214_v21 = vpop.xlane.xlu1 %4213 }
 0x9aa   : > { %6040 = vrcp.f32 %v4214_v21  ;;  %v4211_v52 = vpop.xlane.xlu0 %4210 }
 0x9ab   : > { %6042 = vrcp.f32 %v4211_v52 }
 0x9ad   : > { %v4220_v26 = vpop.xlane.xlu1 %4219 }
 0x9ae   : > { %6044 = vrcp.f32 %v4220_v26  ;;  %v4217_v15 = vpop.xlane.xlu0 %4216 }
 0x9af   : > { %v6035_v17 = vpop.eup %6034  ;;  %6046 = vrcp.f32 %v4217_v15 }
 0x9b0   : > { %v4232_v61 = vmul.f32 %v6035_v17, %v7224_v51 }
 0x9b1   : > { %v4241_v44 = vpop.permute.xlu1 %4240 }
 0x9b2   : > { %v4223_v29 = vpop.xlane.xlu0 %4222  ;;  %5832 = vmatprep.mubr.msk.f32.mxu0 %vm572_vm1, %v4232_v61 }
 0x9b3   : > { %v6037_v47 = vpop.eup %6036  ;;  %6048 = vrcp.f32 %v4223_v29 }
 0x9b4   : > { %v4234_v20 = vmul.f32 %v6037_v47, %v7239_v31  ;;  %v6039_v50 = vpop.eup %6038 }
 0x9b5   : > { %v4233_v27 = vmul.f32 %v6039_v50, %v7215_v4 }
 0x9b6   : > { %v4243_v24 = vpop.permute.xlu0 %4242  ;;  %5835 = vmatprep.mubr.msk.f32.mxu1 %vm572_vm1, %v4234_v20 }
 0x9b7   : > { %v6041_v63 = vpop.eup %6040  ;;  %5828 = vmatprep.subr.mxu0 %v4243_v24  ;;  %5864 = vmatprep.subr.mxu1 %v4243_v24 }
 0x9b8   : > { %v6043_v45 = vpop.eup %6042  ;;  %5829 = vmatpush3.msra.mxu0 %v4243_v24  ;;  %5872 = vmatpush3.msra.mxu1 %v4243_v24  ;;  %v4236_v51 = vmul.f32 %v6041_v63, %v7251_v35 }
 0x9b9   : > { %v4235_v5 = vmul.f32 %v6043_v45, %v7260_v18  ;;  %5830 = vmatprep.subr.mxu0 %v4241_v44  ;;  %5865 = vmatprep.subr.mxu1 %v4241_v44 }
 0x9ba   : > { %5831 = vmatpush3.msra.mxu0 %v4241_v44  ;;  %5873 = vmatpush3.msra.mxu1 %v4241_v44 }
 0x9bb   : > { %v6045_v31 = vpop.eup %6044  ;;  %5833 = vmatmul.mubr.msk.f32.vlgmr.msra.gmra.mxu0 %vm572_vm1, %v4233_v27  ;;  %5836 = vmatmul.mubr.msk.f32.vlgmr.msra.gmra.mxu1 %vm572_vm1, %v4235_v5 }
 0x9bc   : > { %v6047_v1 = vpop.eup %6046  ;;  %5838 = vmatprep.mubr.msk.f32.mxu1 %vm572_vm1, %v4236_v51  ;;  %v4238_v30 = vmul.f32 %v6045_v31, %v7275_v25  ;;  %5844 = vmatprep.subr.mxu1 %v4401_v23 }
 0x9bd   : > { %v4237_v35 = vmul.f32 %v6047_v1, %v7282_v32  ;;  %5845 = vmatpush3.msra.mxu1 %v4401_v23 }
 0x9bf   : > { %5839 = vmatmul.mubr.msk.f32.gmra.mxu1 %vm572_vm1, %v4237_v35 }
 0x9c0   : > { %v6049_v4 = vpop.eup %6048  ;;  %5841 = vmatprep.mubr.msk.f32.mxu1 %vm572_vm1, %v4238_v30 }
 0x9c1   : > { %v4239_v18 = vmul.f32 %v6049_v4, %v7292_v34 }
 0x9c3   : > { %5842 = vmatmul.mubr.msk.f32.gmra.mxu1 %vm572_vm1, %v4239_v18 }
 0xa3f   : > { %v5778_v43 = vpop.f32.mrf.mxu1 }
 0xa40   : > { %v3976_v25 = vadd.f32 %v5778_v43, %v7257_v2  ;;  %v3425_v2 = vadd.f32 %v7310_v46, %v2869_v22 }
 0xa41   : > { %v3936_v48 = vpop.f32.mrf.mxu1 }
 0xa42   : > { %v3975_v32 = vadd.f32 %v3936_v48, %v7267_v41 }
 0xa43   : > { %v5781_v54 = vpop.f32.mrf.mxu1 }
 0xa44   : > { %v3978_v40 = vadd.f32 %v5781_v54, %v7279_v33 }
 0xa45   : > { %v3946_v57 = vpop.f32.mrf.mxu1 }
 0xa46   : > { %v3977_v34 = vadd.f32 %v3946_v57, %v7288_v14 }
 0xa47   : > { %v5784_v10 = vpop.f32.mrf.mxu1 }
 0xa48   : > { %v3980_v28 = vadd.f32 %v5784_v10, %v7296_v3 }
 0xa49   : > { %v3956_v39 = vpop.f32.mrf.mxu1 }
 0xa4a   : > { %v3979_v62 = vadd.f32 %v3956_v39, %v7302_v42 }
 0xa4b   : > { %v5787_v12 = vpop.f32.mrf.mxu1 }
 0xa4c   : > { %v3982_v41 = vadd.f32 %v5787_v12, %v7304_v49 }
 0xa4d   : > { %v3966_v8 = vpop.f32.mrf.mxu1 }
 0xa4e   : > { %v3981_v38 = vadd.f32 %v3966_v8, %v3425_v2 }
 0xa7b   : > { %v5834_v33 = vpop.f32.mrf.mxu0  ;;  %v5837_v53 = vpop.f32.mrf.mxu1 }
 0xa7c   : > { %v4368_v3 = vadd.f32 %v5834_v33, %v7038_v0  ;;  %v4378_v42 = vadd.f32 %v5837_v53, %v7045_v7 }
 0xa7d   : > { %v4362_v58 = vpop.f32.mrf.mxu0  ;;  %v4372_v14 = vpop.f32.mrf.mxu1 }
 0xa7e   : > { %v4363_v16 = vadd.f32 %v4362_v58, %v7030_v60  ;;  %v4373_v19 = vadd.f32 %v4372_v14, %v7042_v6 }
 0xa7f   : > { %v5840_v59 = vpop.f32.mrf.mxu1 }
 0xa80   : > { %5846 = vmatprep.mubr.msk.f32.mxu1 %vm2354_vm3, %v4363_v16  ;;  %v4388_v60 = vadd.f32 %v5840_v59, %v7055_v56 }
 0xa81   : > { %v4382_v11 = vpop.f32.mrf.mxu1  ;;  %5847 = vmatmul.mubr.msk.f32.vlgmr.msra.gmra.mxu1 %vm2354_vm3, %v4368_v3 }
 0xa82   : > { %5849 = vmatprep.mubr.msk.f32.mxu1 %vm2354_vm3, %v4373_v19  ;;  %v4383_v46 = vadd.f32 %v4382_v11, %v7051_v9 }
 0xa83   : > { %v5843_v49 = vpop.f32.mrf.mxu1 }
 0xa84   : > { %v4398_v6 = vadd.f32 %v5843_v49, %v7065_v13 }
 0xa85   : > { %v4392_v37 = vpop.f32.mrf.mxu1  ;;  %5850 = vmatmul.mubr.msk.f32.gmra.mxu1 %vm2354_vm3, %v4378_v42 }
 0xa86   : > { %5852 = vmatprep.mubr.msk.f32.mxu1 %vm2354_vm3, %v4383_v46  ;;  %v4393_v0 = vadd.f32 %v4392_v37, %v7059_v55 }
 0xa89   : > { %5853 = vmatmul.mubr.msk.f32.gmra.mxu1 %vm2354_vm3, %v4388_v60 }
 0xa8a   : > { %5855 = vmatprep.mubr.msk.f32.mxu1 %vm2354_vm3, %v4393_v0 }
 0xa8d   : > { %5856 = vmatmul.mubr.msk.f32.gmra.mxu1 %vm2354_vm3, %v4398_v6 }
 0xb41   : > { %v5848_v7 = vpop.f32.mrf.mxu1 }
 0xb42   : > { %v4532_v9 = vadd.f32 %v5848_v7, %v3976_v25 }
 0xb43   : > { %v4492_v36 = vpop.f32.mrf.mxu1 }
 0xb44   : > { %4540 = vst.msk [vmem:[%s374_s20 + $0x8] sm:$0xff] %vm394_vm0, %v4532_v9  ;;  %v4531_v56 = vadd.f32 %v4492_v36, %v3975_v32 }
 0xb45   : > { %v5851_v55 = vpop.f32.mrf.mxu1 }
 0xb46   : > { %4539 = vst.msk [vmem:[%s374_s20] sm:$0xff] %vm394_vm0, %v4531_v56  ;;  %v4534_v21 = vadd.f32 %v5851_v55, %v3978_v40 }
 0xb47   : > { %v4502_v52 = vpop.f32.mrf.mxu1 }
 0xb48   : > { %4542 = vst.msk [vmem:[%s374_s20 + $0x18] sm:$0xff] %vm394_vm0, %v4534_v21  ;;  %v4533_v13 = vadd.f32 %v4502_v52, %v3977_v34 }
 0xb49   : > { %v5854_v26 = vpop.f32.mrf.mxu1 }
 0xb4a   : > { %4541 = vst.msk [vmem:[%s374_s20 + $0x10] sm:$0xff] %vm394_vm0, %v4533_v13  ;;  %v4536_v15 = vadd.f32 %v5854_v26, %v3980_v28 }
 0xb4b   : > { %v4512_v17 = vpop.f32.mrf.mxu1 }
 0xb4c   : > { %4544 = vst.msk [vmem:[%s374_s20 + $0x28] sm:$0xff] %vm394_vm0, %v4536_v15  ;;  %v4535_v61 = vadd.f32 %v4512_v17, %v3979_v62 }
 0xb4d   : > { %v5857_v29 = vpop.f32.mrf.mxu1 }
 0xb4e   : > { %4543 = vst.msk [vmem:[%s374_s20 + $0x20] sm:$0xff] %vm394_vm0, %v4535_v61  ;;  %v4538_v47 = vadd.f32 %v5857_v29, %v3982_v41 }
 0xb4f   : > { %v4522_v20 = vpop.f32.mrf.mxu1 }
 0xb50   : > { %4546 = vst.msk [vmem:[%s374_s20 + $0x38] sm:$0xff] %vm394_vm0, %v4538_v47  ;;  %v4537_v50 = vadd.f32 %v4522_v20, %v3981_v38 }
 0xb52   : > { %4545 = vst.msk [vmem:[%s374_s20 + $0x30] sm:$0xff] %vm394_vm0, %v4537_v50 }
 0xb53 PF: > { %s21_s13 = sadd.s32 1, %s6086_s13  }
 0xb54   : > { %p18_p1 = scmp.ge.s32.totalorder %s21_s13, 4  }
 0xb56   :  { %20 = sbr.rel (!%p18_p1) target bundleno = 1 (0x1), region = 111 }
 0xb5b   :  { %4568 = vsyncpa [#allocation3], 1 }
 0xb5c   :  { %4570 = vsyncpa [#allocation3 + $0x1], 1 }

</bundles_post_ra>
